<compile_context>
chip_gen: v5e
topology: v5e:2x2
jax: 0.10.0
libtpu: 0.0.40
codegen_flags: <defaults>
</compile_context>

<pallas_src>
import functools

import jax
import jax.numpy as jnp
import numpy as np
from jax.experimental import pallas as pl
from jax.experimental.pallas import tpu as pltpu

# Safe on every generation (v7x scoped default is 32 MiB of 64 MiB physical).
# On v5e/v6e this can be raised to 64-96 MiB together with bigger tiles.
_VMEM_LIMIT = 32 * 1024 * 1024


def _pick_tile(dim, target, quantum):
    """Largest multiple of `quantum` (<= target) dividing `dim`, else the full dim."""
    if dim <= target:
        return dim
    t = (target // quantum) * quantum
    while t >= quantum:
        if dim % t == 0:
            return t
        t -= quantum
    return dim


def _isize(dt):
    return np.dtype(dt).itemsize


# ---------------------- kernel 1: tiled matmul + bias + ReLU -----------------

def _matmul_bias_relu_kernel(x_ref, w_ref, b_ref, o_ref, acc_ref):
    @pl.when(pl.program_id(2) == 0)
    def _():
        acc_ref[...] = jnp.zeros_like(acc_ref)

    # f32 input block is cast to bf16 per tile in-kernel (saves an XLA cast pass).
    acc_ref[...] += jnp.dot(x_ref[...].astype(jnp.bfloat16), w_ref[...],
                            preferred_element_type=jnp.float32)

    @pl.when(pl.program_id(2) == pl.num_programs(2) - 1)
    def _():
        y = acc_ref[...] + b_ref[...]                    # f32 epilogue
        o_ref[...] = jnp.maximum(y, 0.0).astype(o_ref.dtype)


def matmul_bias_relu(x, w, b, *, out_dtype=jnp.bfloat16, tm=512, tn=256, tk=512):
    """relu(x @ w + b): f32 (or bf16) x, bf16 w, f32 accumulation, tiled M/N/K grid."""
    M, K = x.shape
    N = w.shape[1]
    tm = _pick_tile(M, tm, 8)
    tn = _pick_tile(N, tn, 128)
    tk = _pick_tile(K, tk, 128)
    grid = (M // tm, N // tn, K // tk)
    cost = pl.CostEstimate(
        flops=int(2 * M * K * N),
        transcendentals=0,
        bytes_accessed=int(M * K * _isize(x.dtype) + K * N * _isize(w.dtype)
                           + M * N * _isize(out_dtype) + N * 4))
    return pl.pallas_call(
        _matmul_bias_relu_kernel,
        out_shape=jax.ShapeDtypeStruct((M, N), out_dtype),
        grid=grid,
        in_specs=[pl.BlockSpec((tm, tk), lambda i, j, k: (i, k)),
                  pl.BlockSpec((tk, tn), lambda i, j, k: (k, j)),
                  pl.BlockSpec((1, tn), lambda i, j, k: (0, j))],
        out_specs=pl.BlockSpec((tm, tn), lambda i, j, k: (i, j)),
        scratch_shapes=[pltpu.VMEM((tm, tn), jnp.float32)],
        compiler_params=pltpu.CompilerParams(
            dimension_semantics=("parallel", "parallel", "arbitrary"),
            vmem_limit_bytes=_VMEM_LIMIT),
        cost_estimate=cost,
    )(x, w, b)


# ------------- kernel 2: 3x3 conv (9 accumulating matmuls) + bias + ReLU -----

def _conv3x3_kernel(x_ref, w_ref, b_ref, o_ref, pad_ref, acc_ref, *, H, W):
    """3x3 conv, stride 1, pad 1.

    x_ref:   (1, H, W, C)  bf16 compact input image for one batch element.
    w_ref:   (3, 3, C, TCout) bf16 (BN scale folded in).
    b_ref:   (1, TCout) f32 bias.
    o_ref:   (1, H*W, TCout) compact output block.
    pad_ref: VMEM ((H+2)*(W+2)+2, C) bf16 scratch - zero-padded, row-flattened
             activation (built in VMEM; no XLA pad pass). With rows flattened,
             the inputs of filter tap (dy, dx) are the contiguous rows
             [dy*(W+2)+dx : dy*(W+2)+dx + H*(W+2)).
    acc_ref: VMEM (H*(W+2), TCout) f32 scratch accumulator (bounded by Cout tile).
    """
    Wp = W + 2
    Mext = H * Wp

    # Build the padded/flattened activation in VMEM (rebuilt every step: cheap,
    # and keeps both grid axes safely "parallel" across TensorCores).
    pad_ref[...] = jnp.zeros_like(pad_ref)
    # TODO(synk): for large H replace these unrolled Python loops with lax.fori_loop.
    for h in range(H):
        pad_ref[pl.ds((h + 1) * Wp + 1, W), :] = x_ref[0, h]

    # 9 accumulating MXU matmuls over contiguous bf16 row slabs (no f32 upcast).
    # TODO(synk): fold the 3 dx taps into K (K'=3C -> 3 matmuls) for lane-denser
    # MXU columns when C < 128.
    first = True
    for dy in range(3):
        for dx in range(3):
            start = dy * Wp + dx                                    # static offset
            contrib = jnp.dot(pad_ref[pl.ds(start, Mext), :], w_ref[dy, dx],
                              preferred_element_type=jnp.float32)
            if first:
                acc_ref[...] = contrib
                first = False
            else:
                acc_ref[...] += contrib

    # Compact epilogue: only the W valid columns of each image row are stored,
    # so no HBM strip-slice pass is needed downstream.
    for h in range(H):
        row = acc_ref[pl.ds(h * Wp, W), :] + b_ref[...]             # f32 epilogue
        o_ref[0, pl.ds(h * W, W), :] = jnp.maximum(row, 0.0).astype(o_ref.dtype)


def conv3x3_bn_relu(x_img, w, b, *, out_dtype=jnp.bfloat16, t_cout=256):
    """x_img: (B, H, W, C) bf16 -> (B, H*W, Cout) bf16.  w: (3,3,C,Cout) bf16."""
    B, H, W, C = x_img.shape
    Cout = w.shape[3]
    Wp = W + 2
    Mext = H * Wp
    Npad = (H + 2) * Wp + 2
    tco = _pick_tile(Cout, t_cout, 128)
    grid = (B, Cout // tco)
    cost = pl.CostEstimate(
        flops=int(2 * B * Mext * 9 * C * Cout),
        transcendentals=0,
        bytes_accessed=int(B * H * W * C * _isize(x_img.dtype)
                           + 9 * C * Cout * _isize(w.dtype)
                           + B * H * W * Cout * _isize(out_dtype) + Cout * 4))
    return pl.pallas_call(
        functools.partial(_conv3x3_kernel, H=H, W=W),
        out_shape=jax.ShapeDtypeStruct((B, H * W, Cout), out_dtype),
        grid=grid,
        in_specs=[pl.BlockSpec((1, H, W, C), lambda bb, j: (bb, 0, 0, 0)),
                  pl.BlockSpec((3, 3, C, tco), lambda bb, j: (0, 0, 0, j)),
                  pl.BlockSpec((1, tco), lambda bb, j: (0, j))],
        out_specs=pl.BlockSpec((1, H * W, tco), lambda bb, j: (bb, 0, j)),
        scratch_shapes=[pltpu.VMEM((Npad, C), x_img.dtype),
                        pltpu.VMEM((Mext, tco), jnp.float32)],
        compiler_params=pltpu.CompilerParams(
            dimension_semantics=("parallel", "parallel"),
            vmem_limit_bytes=_VMEM_LIMIT),
        cost_estimate=cost,
    )(x_img, w, b)


# ------------------- kernel 3a: PSAP gate computation (per batch) ------------

def _psap_context_kernel(x_ref, wr_ref, wup_ref, wl_ref, ctx_s_ref, ctx_c_ref):
    ch = wup_ref.shape[0]
    x_bf = x_ref[0]                                                   # (HW, C) bf16

    # ---- spatial_pool gate ----  packed matmul: [conv_v_right | conv_q_right]
    xw = jnp.dot(x_bf, wr_ref[...], preferred_element_type=jnp.float32)  # (HW, ch+1)
    input_x = xw[:, :ch]
    mask = xw[:, ch:ch + 1]
    mask = mask - jnp.max(mask, axis=0, keepdims=True)
    e = jnp.exp(mask)
    p = e * pl.reciprocal(jnp.sum(e, axis=0, keepdims=True), approx=True)  # softmax(HW)
    # TODO(synk): compute this as a (1,HW)@(HW,ch) MXU matmul if XLU pressure shows.
    context = jnp.sum(input_x * p, axis=0, keepdims=True)                  # (1, ch)
    up = jnp.dot(context.astype(jnp.bfloat16), wup_ref[...],
                 preferred_element_type=jnp.float32)                       # (1, C)
    ctx_s = 1.0 / (1.0 + jnp.exp(-up))                                     # exact sigmoid
    ctx_s_ref[0] = ctx_s

    # ---- channel_pool gate ----  runs on the mutated x1 (torch in-place aliasing)
    x1 = x_bf.astype(jnp.float32) * ctx_s
    gt = jnp.dot(x1.astype(jnp.bfloat16), wl_ref[...],
                 preferred_element_type=jnp.float32)                       # (HW, 2ch)
    g = gt[:, :ch]
    theta = gt[:, ch:]
    avg = jnp.mean(g, axis=0, keepdims=True)                               # (1, ch)
    s = jnp.sum(theta * avg, axis=1, keepdims=True)                        # (HW, 1)
    s = s - jnp.max(s, axis=0, keepdims=True)
    es = jnp.exp(s)
    ps = es * pl.reciprocal(jnp.sum(es, axis=0, keepdims=True), approx=True)
    ctx_c_ref[0] = 1.0 / (1.0 + jnp.exp(-ps))                              # exact sigmoid


def psap_contexts(x, w_right, w_up, w_left):
    """x: (B, HW, C) bf16 -> (ctx_s (B,1,C) f32, ctx_c (B,HW,1) f32)."""
    # TODO(synk): for very large HW, switch to a two-pass / online-softmax HW-tiled
    # variant; at typical shapes the live temporaries here are only a few MiB.
    B, HW, C = x.shape
    ch = w_up.shape[0]
    return pl.pallas_call(
        _psap_context_kernel,
        out_shape=(jax.ShapeDtypeStruct((B, 1, C), jnp.float32),
                   jax.ShapeDtypeStruct((B, HW, 1), jnp.float32)),
        grid=(B,),
        in_specs=[pl.BlockSpec((1, HW, C), lambda bb: (bb, 0, 0)),
                  pl.BlockSpec((C, ch + 1), lambda bb: (0, 0)),
                  pl.BlockSpec((ch, C), lambda bb: (0, 0)),
                  pl.BlockSpec((C, 2 * ch), lambda bb: (0, 0))],
        out_specs=(pl.BlockSpec((1, 1, C), lambda bb: (bb, 0, 0)),
                   pl.BlockSpec((1, HW, 1), lambda bb: (bb, 0, 0))),
        compiler_params=pltpu.CompilerParams(
            dimension_semantics=("parallel",),
            vmem_limit_bytes=_VMEM_LIMIT),
    )(x, w_right, w_up, w_left)


# ----------- kernel 3b: psap scale + conv3 + bn3 + residual + ReLU -----------

def _scale_conv3_residual_kernel(x_ref, cs_ref, cc_ref, w3_ref, b3_ref, res_ref,
                                 o_ref):
    # psap = spatial_pool(x) + channel_pool(x) = 2 * x * ctx_s * ctx_c (aliasing).
    psap = (2.0 * x_ref[0].astype(jnp.float32)) * cs_ref[0] * cc_ref[0]   # (tm, C)
    y = jnp.dot(psap.astype(jnp.bfloat16), w3_ref[...],
                preferred_element_type=jnp.float32)
    y = y + b3_ref[...] + res_ref[0]                                       # f32 epilogue
    o_ref[0] = jnp.maximum(y, 0.0).astype(o_ref.dtype)


def scale_conv3_residual(x, ctx_s, ctx_c, w3, b3, res, *, out_dtype=jnp.bfloat16,
                         tm=256, tn=512):
    """out = relu(2*x*ctx_s*ctx_c @ w3 + b3 + res), tiled over (B, HW, C3)."""
    B, HW, C = x.shape
    C3 = w3.shape[1]
    tm = _pick_tile(HW, tm, 8)
    tn = _pick_tile(C3, tn, 128)
    grid = (B, HW // tm, C3 // tn)
    cost = pl.CostEstimate(
        flops=int(2 * B * HW * C * C3),
        transcendentals=0,
        bytes_accessed=int(B * HW * (C * _isize(x.dtype) + 4
                                     + C3 * _isize(res.dtype)
                                     + C3 * _isize(out_dtype))
                           + C * C3 * 2 + B * C * 4 + C3 * 4))
    return pl.pallas_call(
        _scale_conv3_residual_kernel,
        out_shape=jax.ShapeDtypeStruct((B, HW, C3), out_dtype),
        grid=grid,
        in_specs=[pl.BlockSpec((1, tm, C), lambda bb, i, j: (bb, i, 0)),
                  pl.BlockSpec((1, 1, C), lambda bb, i, j: (bb, 0, 0)),
                  pl.BlockSpec((1, tm, 1), lambda bb, i, j: (bb, i, 0)),
                  pl.BlockSpec((C, tn), lambda bb, i, j: (0, j)),
                  pl.BlockSpec((1, tn), lambda bb, i, j: (0, j)),
                  pl.BlockSpec((1, tm, tn), lambda bb, i, j: (bb, i, j))],
        out_specs=pl.BlockSpec((1, tm, tn), lambda bb, i, j: (bb, i, j)),
        compiler_params=pltpu.CompilerParams(
            dimension_semantics=("parallel", "parallel", "parallel"),
            vmem_limit_bytes=_VMEM_LIMIT),
        cost_estimate=cost,
    )(x, ctx_s, ctx_c, w3, b3, res)


# ------------------------------ weight prep ----------------------------------

def prepare_weights(params):
    """Fold eval-mode BN scales into the conv weights, pack PSAP projections, cast bf16.

    Called ONCE outside the jitted forward (hoisted per the perf feedback)."""
    bf16 = jnp.bfloat16
    return dict(
        w1=(params["w1"] * params["s1"]).astype(bf16),                 # (c1, c2)
        b1=params["b1"],
        w2=(params["w2"] * params["s2"]).astype(bf16),                 # (3,3,c2,c2)
        b2=params["b2"],
        w3=(params["w3"] * params["s3"]).astype(bf16),                 # (c2, 4c2)
        b3=params["b3"],
        w_right=jnp.concatenate([params["wvr"], params["wqr"]], axis=1).astype(bf16),
        w_up=params["wup"].astype(bf16),
        w_left=jnp.concatenate([params["wql"], params["wvl"]], axis=1).astype(bf16),
    )


# ------------------------------ forward pass ---------------------------------

@jax.jit
def bottleneck_forward(x, prep):
    """x: (B, H, W, c1) NHWC f32 with c1 == 4*c2 (downsample=None, stride=1)."""
    B, H, W, c1 = x.shape
    c2 = prep["w1"].shape[1]
    HW = H * W

    # conv1 (1x1) + bn1 + ReLU  (f32 in, cast in-kernel, f32 acc, bf16 out)
    a1 = matmul_bias_relu(x.reshape(B * HW, c1), prep["w1"], prep["b1"])

    # conv2 (3x3, s=1, p=1) + bn2 + ReLU  (in-VMEM zero pad, 9 MXU matmuls,
    # compact bf16 output — no XLA pad / strip passes)
    a2 = conv3x3_bn_relu(a1.reshape(B, H, W, c2), prep["w2"], prep["b2"])

    # PSAP gates (small per-batch kernel) ...
    ctx_s, ctx_c = psap_contexts(a2, prep["w_right"], prep["w_up"], prep["w_left"])
    # ... then gated conv3 (1x1) + bn3 + residual + ReLU, tiled over (B, HW, C3).
    # Residual stays f32 (the module input is f32; reading it directly is cheaper
    # than an extra cast pass).  Output is bf16 to halve the writeback.
    out = scale_conv3_residual(a2, ctx_s, ctx_c, prep["w3"], prep["b3"],
                               x.reshape(B, HW, c1))
    return out.reshape(B, H, W, c1)


# --------------------------- pure-JAX reference ------------------------------

@jax.jit
def reference_forward(x, prep):
    """Non-Pallas reference with the same bf16/f32 mixed-precision choices."""
    bf16, f32 = jnp.bfloat16, jnp.float32
    B, H, W, c1 = x.shape
    c2 = prep["w1"].shape[1]
    ch = prep["w_up"].shape[0]
    HW = H * W

    a1 = jnp.maximum(jnp.dot(x.reshape(B * HW, c1).astype(bf16), prep["w1"],
                             preferred_element_type=f32) + prep["b1"], 0.0).astype(bf16)

    xp = jnp.pad(a1.reshape(B, H, W, c2), ((0, 0), (1, 1), (1, 1), (0, 0)))
    acc = jnp.zeros((B, H, W, c2), f32)
    for dy in range(3):
        for dx in range(3):
            win = xp[:, dy:dy + H, dx:dx + W, :]
            acc = acc + jnp.einsum("bhwc,cd->bhwd", win, prep["w2"][dy, dx],
                                   preferred_element_type=f32)
    a2 = jnp.maximum(acc.reshape(B, HW, c2) + prep["b2"], 0.0).astype(bf16)

    x_f = a2.astype(f32)
    xw = jnp.einsum("bnc,ck->bnk", a2, prep["w_right"], preferred_element_type=f32)
    input_x, mask = xw[..., :ch], xw[..., ch:ch + 1]
    mask = mask - jnp.max(mask, axis=1, keepdims=True)
    e = jnp.exp(mask)
    p = e / jnp.sum(e, axis=1, keepdims=True)
    context = jnp.sum(input_x * p, axis=1, keepdims=True)
    ctx_s = jax.nn.sigmoid(jnp.einsum("bxc,cd->bxd", context.astype(bf16),
                                      prep["w_up"], preferred_element_type=f32))
    x1 = x_f * ctx_s
    gt = jnp.einsum("bnc,ck->bnk", x1.astype(bf16), prep["w_left"],
                    preferred_element_type=f32)
    g, theta = gt[..., :ch], gt[..., ch:]
    avg = jnp.mean(g, axis=1, keepdims=True)
    s = jnp.sum(theta * avg, axis=2, keepdims=True)
    s = s - jnp.max(s, axis=1, keepdims=True)
    es = jnp.exp(s)
    ps = es / jnp.sum(es, axis=1, keepdims=True)
    ctx_c = jax.nn.sigmoid(ps)
    psap = 2.0 * (x1 * ctx_c)

    y = jnp.einsum("bnc,cd->bnd", psap.astype(bf16), prep["w3"],
                   preferred_element_type=f32)
    out = jnp.maximum(y + prep["b3"] + x.reshape(B, HW, c1), 0.0)
    return out.reshape(B, H, W, c1)


# --------------------------------- params ------------------------------------

def make_params(key, c1, c2):
    ch = c2 // 2
    c3 = 4 * c2
    ks = jax.random.split(key, 16)
    n = lambda k, shp, sc=0.1: sc * jax.random.normal(k, shp, jnp.float32)

    def bn(kg, kb, nchan):
        gamma = 1.0 + n(kg, (1, nchan))
        beta = n(kb, (1, nchan))
        # eval-mode BN with fresh running stats (mean=0, var=1), eps=1e-5
        return gamma / jnp.sqrt(1.0 + 1e-5), beta

    s1, b1 = bn(ks[0], ks[1], c2)
    s2, b2 = bn(ks[2], ks[3], c2)
    s3, b3 = bn(ks[4], ks[5], c3)
    return dict(
        w1=n(ks[6], (c1, c2)),            # conv1 1x1
        w2=n(ks[7], (3, 3, c2, c2)),      # conv2 3x3 (ky, kx, cin, cout)
        w3=n(ks[8], (c2, c3)),            # conv3 1x1
        wqr=n(ks[9], (c2, 1)),            # PSAP conv_q_right
        wvr=n(ks[10], (c2, ch)),          # PSAP conv_v_right
        wup=n(ks[11], (ch, c2)),          # PSAP conv_up
        wql=n(ks[12], (c2, ch)),          # PSAP conv_q_left
        wvl=n(ks[13], (c2, ch)),          # PSAP conv_v_left
        s1=s1, b1=b1, s2=s2, b2=b2, s3=s3, b3=b3,
    )


# ---------------------------------- main --------------------------------------

if __name__ == "__main__":
    B, H, W = 2, 8, 8
    c2 = 16
    c1 = 4 * c2   # residual path requires c1 == expansion*c2 (downsample=None, s=1)

    key = jax.random.PRNGKey(0)
    kx, kp = jax.random.split(key)
    x = jax.random.normal(kx, (B, H, W, c1), jnp.float32)
    params = make_params(kp, c1, c2)
    prep = prepare_weights(params)     # folded / packed / bf16 weights, built once

    out = jax.block_until_ready(bottleneck_forward(x, prep))
    ref = jax.block_until_ready(reference_forward(x, prep))

    assert out.shape == (B, H, W, 4 * c2)
    out_f = out.astype(jnp.float32)
    assert bool(jnp.all(jnp.isfinite(out_f)))
    max_err = float(jnp.max(jnp.abs(out_f - ref)))
    # bf16 output quantization (~2^-9 relative) + approx-reciprocal softmax denoms.
    assert bool(jnp.allclose(out_f, ref, atol=1e-2, rtol=1e-2)), (
        "mismatch vs reference: max |diff| = %e" % max_err)

    print("KERNEL_OK")
</pallas_src>

<mosaic_0001>
module attributes {stable_mosaic.version = 11 : i64} {
  func.func @_matmul_bias_relu_kernel(%arg0: i32, %arg1: i32, %arg2: i32, %arg3: memref<128x64xf32, #tpu.memory_space<vmem>>, %arg4: memref<64x16xbf16, #tpu.memory_space<vmem>>, %arg5: memref<1x16xf32, #tpu.memory_space<vmem>>, %arg6: memref<128x16xbf16, #tpu.memory_space<vmem>>, %arg7: memref<128x16xf32, #tpu.memory_space<vmem>>) attributes {dimension_semantics = [#tpu.dimension_semantics<parallel>, #tpu.dimension_semantics<parallel>, #tpu.dimension_semantics<arbitrary>], iteration_bounds = array<i64: 1, 1, 1>, scalar_prefetch = 0 : i64, scratch_operands = 1 : i64, tpu.core_type = #tpu.core_type<tc>, window_params = [{transform_indices = @transform_0, window_bounds = array<i64: 128, 64>}, {transform_indices = @transform_1, window_bounds = array<i64: 64, 16>}, {transform_indices = @transform_2, window_bounds = array<i64: 1, 16>}, {transform_indices = @transform_3, window_bounds = array<i64: 128, 16>}]} {
    %c0_i32 = arith.constant 0 : i32
    %0 = arith.cmpi eq, %arg2, %c0_i32 : i32
    %1 = arith.extui %0 : i1 to i32
    %c0_i32_0 = arith.constant 0 : i32
    %2 = arith.cmpi ne, %1, %c0_i32_0 : i32
    scf.if %2 {
      %cst_10 = arith.constant 0.000000e+00 : f32
      %13 = vector.broadcast %cst_10 : f32 to vector<128x16xf32>
      %c0_11 = arith.constant 0 : index
      %c0_12 = arith.constant 0 : index
      %14 = vector.load %arg7[%c0_11, %c0_12] : memref<128x16xf32, #tpu.memory_space<vmem>>, vector<128x16xf32>
      tpu.vector_store %arg7[%c0_11, %c0_12], %13 {strides = array<i32>} : memref<128x16xf32, #tpu.memory_space<vmem>>, vector<128x16xf32>,
    } else {
    }
    %c0 = arith.constant 0 : index
    %c0_1 = arith.constant 0 : index
    %3 = vector.load %arg7[%c0, %c0_1] : memref<128x16xf32, #tpu.memory_space<vmem>>, vector<128x16xf32>
    %c0_2 = arith.constant 0 : index
    %c0_3 = arith.constant 0 : index
    %4 = vector.load %arg3[%c0_2, %c0_3] : memref<128x64xf32, #tpu.memory_space<vmem>>, vector<128x64xf32>
    %5 = arith.truncf %4 : vector<128x64xf32> to vector<128x64xbf16>
    %c0_4 = arith.constant 0 : index
    %c0_5 = arith.constant 0 : index
    %6 = vector.load %arg4[%c0_4, %c0_5] : memref<64x16xbf16, #tpu.memory_space<vmem>>, vector<64x16xbf16>
    %cst = arith.constant dense<0.000000e+00> : vector<128x16xf32>
    %7 = tpu.matmul %5, %6, %cst {dimension_numbers = #tpu.dot_dimension_numbers<[1], [0], [0], [1], [0, 0, 1, 1], [], []>} : vector<128x64xbf16>, vector<64x16xbf16>, vector<128x16xf32> -> vector<128x16xf32>
    %8 = arith.addf %3, %7 : vector<128x16xf32>
    %c0_6 = arith.constant 0 : index
    %c0_7 = arith.constant 0 : index
    %9 = vector.load %arg7[%c0_6, %c0_7] : memref<128x16xf32, #tpu.memory_space<vmem>>, vector<128x16xf32>
    tpu.vector_store %arg7[%c0_6, %c0_7], %8 {strides = array<i32>} : memref<128x16xf32, #tpu.memory_space<vmem>>, vector<128x16xf32>,
    %c0_i32_8 = arith.constant 0 : i32
    %10 = arith.cmpi eq, %arg2, %c0_i32_8 : i32
    %11 = arith.extui %10 : i1 to i32
    %c0_i32_9 = arith.constant 0 : i32
    %12 = arith.cmpi ne, %11, %c0_i32_9 : i32
    scf.if %12 {
      %c0_10 = arith.constant 0 : index
      %c0_11 = arith.constant 0 : index
      %13 = vector.load %arg7[%c0_10, %c0_11] : memref<128x16xf32, #tpu.memory_space<vmem>>, vector<128x16xf32>
      %c0_12 = arith.constant 0 : index
      %c0_13 = arith.constant 0 : index
      %14 = vector.load %arg5[%c0_12, %c0_13] : memref<1x16xf32, #tpu.memory_space<vmem>>, vector<1x16xf32>
      %15 = vector.broadcast %14 : vector<1x16xf32> to vector<128x16xf32>
      %16 = arith.addf %13, %15 : vector<128x16xf32>
      %cst_14 = arith.constant 0.000000e+00 : f32
      %17 = vector.broadcast %cst_14 : f32 to vector<128x16xf32>
      %18 = arith.maximumf %16, %17 : vector<128x16xf32>
      %19 = arith.truncf %18 : vector<128x16xf32> to vector<128x16xbf16>
      %c0_15 = arith.constant 0 : index
      %c0_16 = arith.constant 0 : index
      %20 = vector.load %arg6[%c0_15, %c0_16] : memref<128x16xbf16, #tpu.memory_space<vmem>>, vector<128x16xbf16>
      tpu.vector_store %arg6[%c0_15, %c0_16], %19 {strides = array<i32>} : memref<128x16xbf16, #tpu.memory_space<vmem>>, vector<128x16xbf16>,
    } else {
    }
    return
  }
  func.func @transform_0(%arg0: i32, %arg1: i32, %arg2: i32) -> (i32, i32) {
    %c0_i32 = arith.constant 0 : i32
    return %arg0, %arg2 : i32, i32
  }
  func.func @transform_1(%arg0: i32, %arg1: i32, %arg2: i32) -> (i32, i32) {
    %c0_i32 = arith.constant 0 : i32
    return %arg2, %arg1 : i32, i32
  }
  func.func @transform_2(%arg0: i32, %arg1: i32, %arg2: i32) -> (i32, i32) {
    %c0_i32 = arith.constant 0 : i32
    %c0_i32_0 = arith.constant 0 : i32
    return %c0_i32, %arg1 : i32, i32
  }
  func.func @transform_3(%arg0: i32, %arg1: i32, %arg2: i32) -> (i32, i32) {
    %c0_i32 = arith.constant 0 : i32
    return %arg0, %arg1 : i32, i32
  }
}

module attributes {stable_mosaic.version = 11 : i64} {
  func.func @_psap_context_kernel(%arg0: i32, %arg1: memref<1x64x16xbf16, #tpu.memory_space<vmem>>, %arg2: memref<16x9xbf16, #tpu.memory_space<vmem>>, %arg3: memref<8x16xbf16, #tpu.memory_space<vmem>>, %arg4: memref<16x16xbf16, #tpu.memory_space<vmem>>, %arg5: memref<1x1x16xf32, #tpu.memory_space<vmem>>, %arg6: memref<1x64x1xf32, #tpu.memory_space<vmem>>) attributes {dimension_semantics = [#tpu.dimension_semantics<parallel>], iteration_bounds = array<i64: 2>, scalar_prefetch = 0 : i64, scratch_operands = 0 : i64, tpu.core_type = #tpu.core_type<tc>, window_params = [{transform_indices = @transform_0, window_bounds = array<i64: 1, 64, 16>}, {pipeline_mode = #tpu.pipeline_mode<synchronous>, transform_indices = @transform_1, window_bounds = array<i64: 16, 9>}, {pipeline_mode = #tpu.pipeline_mode<synchronous>, transform_indices = @transform_2, window_bounds = array<i64: 8, 16>}, {pipeline_mode = #tpu.pipeline_mode<synchronous>, transform_indices = @transform_3, window_bounds = array<i64: 16, 16>}, {transform_indices = @transform_4, window_bounds = array<i64: 1, 1, 16>}, {transform_indices = @transform_5, window_bounds = array<i64: 1, 64, 1>}]} {
    %c0 = arith.constant 0 : index
    %c0_0 = arith.constant 0 : index
    %c0_1 = arith.constant 0 : index
    %0 = vector.load %arg1[%c0, %c0_0, %c0_1] : memref<1x64x16xbf16, #tpu.memory_space<vmem>>, vector<1x64x16xbf16>
    %1 = vector.shape_cast %0 : vector<1x64x16xbf16> to vector<64x16xbf16>
    %c0_2 = arith.constant 0 : index
    %c0_3 = arith.constant 0 : index
    %2 = vector.load %arg2[%c0_2, %c0_3] : memref<16x9xbf16, #tpu.memory_space<vmem>>, vector<16x9xbf16>
    %cst = arith.constant dense<0.000000e+00> : vector<64x9xf32>
    %3 = tpu.matmul %1, %2, %cst {dimension_numbers = #tpu.dot_dimension_numbers<[1], [0], [0], [1], [0, 0, 1, 1], [], []>} : vector<64x16xbf16>, vector<16x9xbf16>, vector<64x9xf32> -> vector<64x9xf32>
    %4 = vector.extract_strided_slice %3 {offsets = [0, 0], sizes = [64, 8], strides = [1, 1]} : vector<64x9xf32> to vector<64x8xf32>
    %5 = vector.extract_strided_slice %3 {offsets = [0, 8], sizes = [64, 1], strides = [1, 1]} : vector<64x9xf32> to vector<64x1xf32>
    %cst_4 = arith.constant dense<0xFF800000> : vector<1xf32>
    %6 = vector.multi_reduction <maximumf>, %5, %cst_4 [0] : vector<64x1xf32> to vector<1xf32>
    %7 = vector.shape_cast %6 : vector<1xf32> to vector<1x1xf32>
    %8 = vector.broadcast %7 : vector<1x1xf32> to vector<64x1xf32>
    %9 = arith.subf %5, %8 : vector<64x1xf32>
    %10 = math.exp %9 : vector<64x1xf32>
    %cst_5 = arith.constant dense<0.000000e+00> : vector<1xf32>
    %11 = vector.multi_reduction <add>, %10, %cst_5 [0] : vector<64x1xf32> to vector<1xf32>
    %12 = vector.shape_cast %11 : vector<1xf32> to vector<1x1xf32>
    %13 = tpu.reciprocal %12 {approx = true} : vector<1x1xf32> -> vector<1x1xf32>
    %14 = vector.broadcast %13 : vector<1x1xf32> to vector<64x1xf32>
    %15 = arith.mulf %10, %14 : vector<64x1xf32>
    %16 = vector.broadcast %15 : vector<64x1xf32> to vector<64x8xf32>
    %17 = arith.mulf %4, %16 : vector<64x8xf32>
    %cst_6 = arith.constant dense<0.000000e+00> : vector<8xf32>
    %18 = vector.multi_reduction <add>, %17, %cst_6 [0] : vector<64x8xf32> to vector<8xf32>
    %19 = vector.shape_cast %18 : vector<8xf32> to vector<1x8xf32>
    %20 = arith.truncf %19 : vector<1x8xf32> to vector<1x8xbf16>
    %c0_7 = arith.constant 0 : index
    %c0_8 = arith.constant 0 : index
    %21 = vector.load %arg3[%c0_7, %c0_8] : memref<8x16xbf16, #tpu.memory_space<vmem>>, vector<8x16xbf16>
    %cst_9 = arith.constant dense<0.000000e+00> : vector<1x16xf32>
    %22 = tpu.matmul %20, %21, %cst_9 {dimension_numbers = #tpu.dot_dimension_numbers<[1], [0], [0], [1], [0, 0, 1, 1], [], []>} : vector<1x8xbf16>, vector<8x16xbf16>, vector<1x16xf32> -> vector<1x16xf32>
    %cst_10 = arith.constant 0.000000e+00 : f32
    %23 = vector.broadcast %cst_10 : f32 to vector<1x16xf32>
    %24 = arith.subf %23, %22 : vector<1x16xf32>
    %25 = math.exp %24 : vector<1x16xf32>
    %cst_11 = arith.constant 1.000000e+00 : f32
    %26 = vector.broadcast %cst_11 : f32 to vector<1x16xf32>
    %27 = arith.addf %26, %25 : vector<1x16xf32>
    %cst_12 = arith.constant 1.000000e+00 : f32
    %28 = vector.broadcast %cst_12 : f32 to vector<1x16xf32>
    %29 = arith.divf %28, %27 : vector<1x16xf32>
    %c0_13 = arith.constant 0 : index
    %c0_14 = arith.constant 0 : index
    %c0_15 = arith.constant 0 : index
    %30 = vector.load %arg5[%c0_13, %c0_14, %c0_15] : memref<1x1x16xf32, #tpu.memory_space<vmem>>, vector<1x1x16xf32>
    %31 = vector.shape_cast %30 : vector<1x1x16xf32> to vector<1x16xf32>
    %32 = vector.shape_cast %29 : vector<1x16xf32> to vector<1x1x16xf32>
    tpu.vector_store %arg5[%c0_13, %c0_14, %c0_15], %32 {strides = array<i32>} : memref<1x1x16xf32, #tpu.memory_space<vmem>>, vector<1x1x16xf32>,
    %33 = arith.extf %1 : vector<64x16xbf16> to vector<64x16xf32>
    %34 = vector.broadcast %29 : vector<1x16xf32> to vector<64x16xf32>
    %35 = arith.mulf %33, %34 : vector<64x16xf32>
    %36 = arith.truncf %35 : vector<64x16xf32> to vector<64x16xbf16>
    %c0_16 = arith.constant 0 : index
    %c0_17 = arith.constant 0 : index
    %37 = vector.load %arg4[%c0_16, %c0_17] : memref<16x16xbf16, #tpu.memory_space<vmem>>, vector<16x16xbf16>
    %cst_18 = arith.constant dense<0.000000e+00> : vector<64x16xf32>
    %38 = tpu.matmul %36, %37, %cst_18 {dimension_numbers = #tpu.dot_dimension_numbers<[1], [0], [0], [1], [0, 0, 1, 1], [], []>} : vector<64x16xbf16>, vector<16x16xbf16>, vector<64x16xf32> -> vector<64x16xf32>
    %39 = vector.extract_strided_slice %38 {offsets = [0, 0], sizes = [64, 8], strides = [1, 1]} : vector<64x16xf32> to vector<64x8xf32>
    %40 = vector.extract_strided_slice %38 {offsets = [0, 8], sizes = [64, 8], strides = [1, 1]} : vector<64x16xf32> to vector<64x8xf32>
    %cst_19 = arith.constant dense<0.000000e+00> : vector<8xf32>
    %41 = vector.multi_reduction <add>, %39, %cst_19 [0] : vector<64x8xf32> to vector<8xf32>
    %42 = vector.shape_cast %41 : vector<8xf32> to vector<1x8xf32>
    %cst_20 = arith.constant 6.400000e+01 : f32
    %43 = vector.broadcast %cst_20 : f32 to vector<1x8xf32>
    %44 = arith.divf %42, %43 : vector<1x8xf32>
    %45 = vector.broadcast %44 : vector<1x8xf32> to vector<64x8xf32>
    %46 = arith.mulf %40, %45 : vector<64x8xf32>
    %cst_21 = arith.constant dense<0.000000e+00> : vector<64xf32>
    %47 = vector.multi_reduction <add>, %46, %cst_21 [1] : vector<64x8xf32> to vector<64xf32>
    %48 = vector.shape_cast %47 : vector<64xf32> to vector<64x1xf32>
    %cst_22 = arith.constant dense<0xFF800000> : vector<1xf32>
    %49 = vector.multi_reduction <maximumf>, %48, %cst_22 [0] : vector<64x1xf32> to vector<1xf32>
    %50 = vector.shape_cast %49 : vector<1xf32> to vector<1x1xf32>
    %51 = vector.broadcast %50 : vector<1x1xf32> to vector<64x1xf32>
    %52 = arith.subf %48, %51 : vector<64x1xf32>
    %53 = math.exp %52 : vector<64x1xf32>
    %cst_23 = arith.constant dense<0.000000e+00> : vector<1xf32>
    %54 = vector.multi_reduction <add>, %53, %cst_23 [0] : vector<64x1xf32> to vector<1xf32>
    %55 = vector.shape_cast %54 : vector<1xf32> to vector<1x1xf32>
    %56 = tpu.reciprocal %55 {approx = true} : vector<1x1xf32> -> vector<1x1xf32>
    %57 = vector.broadcast %56 : vector<1x1xf32> to vector<64x1xf32>
    %58 = arith.mulf %53, %57 : vector<64x1xf32>
    %cst_24 = arith.constant 0.000000e+00 : f32
    %59 = vector.broadcast %cst_24 : f32 to vector<64x1xf32>
    %60 = arith.subf %59, %58 : vector<64x1xf32>
    %61 = math.exp %60 : vector<64x1xf32>
    %cst_25 = arith.constant 1.000000e+00 : f32
    %62 = vector.broadcast %cst_25 : f32 to vector<64x1xf32>
    %63 = arith.addf %62, %61 : vector<64x1xf32>
    %cst_26 = arith.constant 1.000000e+00 : f32
    %64 = vector.broadcast %cst_26 : f32 to vector<64x1xf32>
    %65 = arith.divf %64, %63 : vector<64x1xf32>
    %c0_27 = arith.constant 0 : index
    %c0_28 = arith.constant 0 : index
    %c0_29 = arith.constant 0 : index
    %66 = vector.load %arg6[%c0_27, %c0_28, %c0_29] : memref<1x64x1xf32, #tpu.memory_space<vmem>>, vector<1x64x1xf32>
    %67 = vector.shape_cast %66 : vector<1x64x1xf32> to vector<64x1xf32>
    %68 = vector.shape_cast %65 : vector<64x1xf32> to vector<1x64x1xf32>
    tpu.vector_store %arg6[%c0_27, %c0_28, %c0_29], %68 {strides = array<i32>} : memref<1x64x1xf32, #tpu.memory_space<vmem>>, vector<1x64x1xf32>,
    return
  }
  func.func @transform_0(%arg0: i32) -> (i32, i32, i32) {
    %c0_i32 = arith.constant 0 : i32
    %c0_i32_0 = arith.constant 0 : i32
    %c0_i32_1 = arith.constant 0 : i32
    return %arg0, %c0_i32, %c0_i32_0 : i32, i32, i32
  }
  func.func @transform_1(%arg0: i32) -> (i32, i32) {
    %c0_i32 = arith.constant 0 : i32
    %c0_i32_0 = arith.constant 0 : i32
    %c0_i32_1 = arith.constant 0 : i32
    return %c0_i32, %c0_i32_0 : i32, i32
  }
  func.func @transform_2(%arg0: i32) -> (i32, i32) {
    %c0_i32 = arith.constant 0 : i32
    %c0_i32_0 = arith.constant 0 : i32
    %c0_i32_1 = arith.constant 0 : i32
    return %c0_i32, %c0_i32_0 : i32, i32
  }
  func.func @transform_3(%arg0: i32) -> (i32, i32) {
    %c0_i32 = arith.constant 0 : i32
    %c0_i32_0 = arith.constant 0 : i32
    %c0_i32_1 = arith.constant 0 : i32
    return %c0_i32, %c0_i32_0 : i32, i32
  }
  func.func @transform_4(%arg0: i32) -> (i32, i32, i32) {
    %c0_i32 = arith.constant 0 : i32
    %c0_i32_0 = arith.constant 0 : i32
    %c0_i32_1 = arith.constant 0 : i32
    return %arg0, %c0_i32, %c0_i32_0 : i32, i32, i32
  }
  func.func @transform_5(%arg0: i32) -> (i32, i32, i32) {
    %c0_i32 = arith.constant 0 : i32
    %c0_i32_0 = arith.constant 0 : i32
    %c0_i32_1 = arith.constant 0 : i32
    return %arg0, %c0_i32, %c0_i32_0 : i32, i32, i32
  }
}

module attributes {stable_mosaic.version = 11 : i64} {
  func.func @_conv3x3_kernel(%arg0: i32, %arg1: i32, %arg2: memref<1x8x8x16xbf16, #tpu.memory_space<vmem>>, %arg3: memref<3x3x16x16xbf16, #tpu.memory_space<vmem>>, %arg4: memref<1x16xf32, #tpu.memory_space<vmem>>, %arg5: memref<1x64x16xbf16, #tpu.memory_space<vmem>>, %arg6: memref<102x16xbf16, #tpu.memory_space<vmem>>, %arg7: memref<80x16xf32, #tpu.memory_space<vmem>>) attributes {dimension_semantics = [#tpu.dimension_semantics<parallel>, #tpu.dimension_semantics<parallel>], iteration_bounds = array<i64: 2, 1>, scalar_prefetch = 0 : i64, scratch_operands = 2 : i64, tpu.core_type = #tpu.core_type<tc>, window_params = [{transform_indices = @transform_0, window_bounds = array<i64: 1, 8, 8, 16>}, {transform_indices = @transform_1, window_bounds = array<i64: 3, 3, 16, 16>}, {transform_indices = @transform_2, window_bounds = array<i64: 1, 16>}, {transform_indices = @transform_3, window_bounds = array<i64: 1, 64, 16>}]} {
    %cst = arith.constant 0.000000e+00 : bf16
    %0 = vector.broadcast %cst : bf16 to vector<102x16xbf16>
    %c0 = arith.constant 0 : index
    %c0_0 = arith.constant 0 : index
    %1 = vector.load %arg6[%c0, %c0_0] : memref<102x16xbf16, #tpu.memory_space<vmem>>, vector<102x16xbf16>
    tpu.vector_store %arg6[%c0, %c0_0], %0 {strides = array<i32>} : memref<102x16xbf16, #tpu.memory_space<vmem>>, vector<102x16xbf16>,
    %c0_1 = arith.constant 0 : index
    %c0_2 = arith.constant 0 : index
    %c0_3 = arith.constant 0 : index
    %c0_4 = arith.constant 0 : index
    %2 = vector.load %arg2[%c0_1, %c0_2, %c0_3, %c0_4] : memref<1x8x8x16xbf16, #tpu.memory_space<vmem>>, vector<1x1x8x16xbf16>
    %3 = vector.shape_cast %2 : vector<1x1x8x16xbf16> to vector<8x16xbf16>
    %c11 = arith.constant 11 : index
    %c0_5 = arith.constant 0 : index
    %4 = vector.load %arg6[%c11, %c0_5] : memref<102x16xbf16, #tpu.memory_space<vmem>>, vector<8x16xbf16>
    tpu.vector_store %arg6[%c11, %c0_5], %3 {strides = array<i32>} : memref<102x16xbf16, #tpu.memory_space<vmem>>, vector<8x16xbf16>,
    %c0_6 = arith.constant 0 : index
    %c1 = arith.constant 1 : index
    %c0_7 = arith.constant 0 : index
    %c0_8 = arith.constant 0 : index
    %5 = vector.load %arg2[%c0_6, %c1, %c0_7, %c0_8] : memref<1x8x8x16xbf16, #tpu.memory_space<vmem>>, vector<1x1x8x16xbf16>
    %6 = vector.shape_cast %5 : vector<1x1x8x16xbf16> to vector<8x16xbf16>
    %c21 = arith.constant 21 : index
    %c0_9 = arith.constant 0 : index
    %7 = vector.load %arg6[%c21, %c0_9] : memref<102x16xbf16, #tpu.memory_space<vmem>>, vector<8x16xbf16>
    tpu.vector_store %arg6[%c21, %c0_9], %6 {strides = array<i32>} : memref<102x16xbf16, #tpu.memory_space<vmem>>, vector<8x16xbf16>,
    %c0_10 = arith.constant 0 : index
    %c2 = arith.constant 2 : index
    %c0_11 = arith.constant 0 : index
    %c0_12 = arith.constant 0 : index
    %8 = vector.load %arg2[%c0_10, %c2, %c0_11, %c0_12] : memref<1x8x8x16xbf16, #tpu.memory_space<vmem>>, vector<1x1x8x16xbf16>
    %9 = vector.shape_cast %8 : vector<1x1x8x16xbf16> to vector<8x16xbf16>
    %c31 = arith.constant 31 : index
    %c0_13 = arith.constant 0 : index
    %10 = vector.load %arg6[%c31, %c0_13] : memref<102x16xbf16, #tpu.memory_space<vmem>>, vector<8x16xbf16>
    tpu.vector_store %arg6[%c31, %c0_13], %9 {strides = array<i32>} : memref<102x16xbf16, #tpu.memory_space<vmem>>, vector<8x16xbf16>,
    %c0_14 = arith.constant 0 : index
    %c3 = arith.constant 3 : index
    %c0_15 = arith.constant 0 : index
    %c0_16 = arith.constant 0 : index
    %11 = vector.load %arg2[%c0_14, %c3, %c0_15, %c0_16] : memref<1x8x8x16xbf16, #tpu.memory_space<vmem>>, vector<1x1x8x16xbf16>
    %12 = vector.shape_cast %11 : vector<1x1x8x16xbf16> to vector<8x16xbf16>
    %c41 = arith.constant 41 : index
    %c0_17 = arith.constant 0 : index
    %13 = vector.load %arg6[%c41, %c0_17] : memref<102x16xbf16, #tpu.memory_space<vmem>>, vector<8x16xbf16>
    tpu.vector_store %arg6[%c41, %c0_17], %12 {strides = array<i32>} : memref<102x16xbf16, #tpu.memory_space<vmem>>, vector<8x16xbf16>,
    %c0_18 = arith.constant 0 : index
    %c4 = arith.constant 4 : index
    %c0_19 = arith.constant 0 : index
    %c0_20 = arith.constant 0 : index
    %14 = vector.load %arg2[%c0_18, %c4, %c0_19, %c0_20] : memref<1x8x8x16xbf16, #tpu.memory_space<vmem>>, vector<1x1x8x16xbf16>
    %15 = vector.shape_cast %14 : vector<1x1x8x16xbf16> to vector<8x16xbf16>
    %c51 = arith.constant 51 : index
    %c0_21 = arith.constant 0 : index
    %16 = vector.load %arg6[%c51, %c0_21] : memref<102x16xbf16, #tpu.memory_space<vmem>>, vector<8x16xbf16>
    tpu.vector_store %arg6[%c51, %c0_21], %15 {strides = array<i32>} : memref<102x16xbf16, #tpu.memory_space<vmem>>, vector<8x16xbf16>,
    %c0_22 = arith.constant 0 : index
    %c5 = arith.constant 5 : index
    %c0_23 = arith.constant 0 : index
    %c0_24 = arith.constant 0 : index
    %17 = vector.load %arg2[%c0_22, %c5, %c0_23, %c0_24] : memref<1x8x8x16xbf16, #tpu.memory_space<vmem>>, vector<1x1x8x16xbf16>
    %18 = vector.shape_cast %17 : vector<1x1x8x16xbf16> to vector<8x16xbf16>
    %c61 = arith.constant 61 : index
    %c0_25 = arith.constant 0 : index
    %19 = vector.load %arg6[%c61, %c0_25] : memref<102x16xbf16, #tpu.memory_space<vmem>>, vector<8x16xbf16>
    tpu.vector_store %arg6[%c61, %c0_25], %18 {strides = array<i32>} : memref<102x16xbf16, #tpu.memory_space<vmem>>, vector<8x16xbf16>,
    %c0_26 = arith.constant 0 : index
    %c6 = arith.constant 6 : index
    %c0_27 = arith.constant 0 : index
    %c0_28 = arith.constant 0 : index
    %20 = vector.load %arg2[%c0_26, %c6, %c0_27, %c0_28] : memref<1x8x8x16xbf16, #tpu.memory_space<vmem>>, vector<1x1x8x16xbf16>
    %21 = vector.shape_cast %20 : vector<1x1x8x16xbf16> to vector<8x16xbf16>
    %c71 = arith.constant 71 : index
    %c0_29 = arith.constant 0 : index
    %22 = vector.load %arg6[%c71, %c0_29] : memref<102x16xbf16, #tpu.memory_space<vmem>>, vector<8x16xbf16>
    tpu.vector_store %arg6[%c71, %c0_29], %21 {strides = array<i32>} : memref<102x16xbf16, #tpu.memory_space<vmem>>, vector<8x16xbf16>,
    %c0_30 = arith.constant 0 : index
    %c7 = arith.constant 7 : index
    %c0_31 = arith.constant 0 : index
    %c0_32 = arith.constant 0 : index
    %23 = vector.load %arg2[%c0_30, %c7, %c0_31, %c0_32] : memref<1x8x8x16xbf16, #tpu.memory_space<vmem>>, vector<1x1x8x16xbf16>
    %24 = vector.shape_cast %23 : vector<1x1x8x16xbf16> to vector<8x16xbf16>
    %c81 = arith.constant 81 : index
    %c0_33 = arith.constant 0 : index
    %25 = vector.load %arg6[%c81, %c0_33] : memref<102x16xbf16, #tpu.memory_space<vmem>>, vector<8x16xbf16>
    tpu.vector_store %arg6[%c81, %c0_33], %24 {strides = array<i32>} : memref<102x16xbf16, #tpu.memory_space<vmem>>, vector<8x16xbf16>,
    %c0_34 = arith.constant 0 : index
    %c0_35 = arith.constant 0 : index
    %26 = vector.load %arg6[%c0_34, %c0_35] : memref<102x16xbf16, #tpu.memory_space<vmem>>, vector<80x16xbf16>
    %c0_36 = arith.constant 0 : index
    %c0_37 = arith.constant 0 : index
    %c0_38 = arith.constant 0 : index
    %c0_39 = arith.constant 0 : index
    %27 = vector.load %arg3[%c0_36, %c0_37, %c0_38, %c0_39] : memref<3x3x16x16xbf16, #tpu.memory_space<vmem>>, vector<1x1x16x16xbf16>
    %28 = vector.shape_cast %27 : vector<1x1x16x16xbf16> to vector<16x16xbf16>
    %cst_40 = arith.constant dense<0.000000e+00> : vector<80x16xf32>
    %29 = tpu.matmul %26, %28, %cst_40 {dimension_numbers = #tpu.dot_dimension_numbers<[1], [0], [0], [1], [0, 0, 1, 1], [], []>} : vector<80x16xbf16>, vector<16x16xbf16>, vector<80x16xf32> -> vector<80x16xf32>
    %c0_41 = arith.constant 0 : index
    %c0_42 = arith.constant 0 : index
    %30 = vector.load %arg7[%c0_41, %c0_42] : memref<80x16xf32, #tpu.memory_space<vmem>>, vector<80x16xf32>
    tpu.vector_store %arg7[%c0_41, %c0_42], %29 {strides = array<i32>} : memref<80x16xf32, #tpu.memory_space<vmem>>, vector<80x16xf32>,
    %c1_43 = arith.constant 1 : index
    %c0_44 = arith.constant 0 : index
    %31 = vector.load %arg6[%c1_43, %c0_44] : memref<102x16xbf16, #tpu.memory_space<vmem>>, vector<80x16xbf16>
    %c0_45 = arith.constant 0 : index
    %c1_46 = arith.constant 1 : index
    %c0_47 = arith.constant 0 : index
    %c0_48 = arith.constant 0 : index
    %32 = vector.load %arg3[%c0_45, %c1_46, %c0_47, %c0_48] : memref<3x3x16x16xbf16, #tpu.memory_space<vmem>>, vector<1x1x16x16xbf16>
    %33 = vector.shape_cast %32 : vector<1x1x16x16xbf16> to vector<16x16xbf16>
    %cst_49 = arith.constant dense<0.000000e+00> : vector<80x16xf32>
    %34 = tpu.matmul %31, %33, %cst_49 {dimension_numbers = #tpu.dot_dimension_numbers<[1], [0], [0], [1], [0, 0, 1, 1], [], []>} : vector<80x16xbf16>, vector<16x16xbf16>, vector<80x16xf32> -> vector<80x16xf32>
    %c0_50 = arith.constant 0 : index
    %c0_51 = arith.constant 0 : index
    %35 = vector.load %arg7[%c0_50, %c0_51] : memref<80x16xf32, #tpu.memory_space<vmem>>, vector<80x16xf32>
    %36 = arith.addf %35, %34 : vector<80x16xf32>
    %c0_52 = arith.constant 0 : index
    %c0_53 = arith.constant 0 : index
    %37 = vector.load %arg7[%c0_52, %c0_53] : memref<80x16xf32, #tpu.memory_space<vmem>>, vector<80x16xf32>
    tpu.vector_store %arg7[%c0_52, %c0_53], %36 {strides = array<i32>} : memref<80x16xf32, #tpu.memory_space<vmem>>, vector<80x16xf32>,
    %c2_54 = arith.constant 2 : index
    %c0_55 = arith.constant 0 : index
    %38 = vector.load %arg6[%c2_54, %c0_55] : memref<102x16xbf16, #tpu.memory_space<vmem>>, vector<80x16xbf16>
    %c0_56 = arith.constant 0 : index
    %c2_57 = arith.constant 2 : index
    %c0_58 = arith.constant 0 : index
    %c0_59 = arith.constant 0 : index
    %39 = vector.load %arg3[%c0_56, %c2_57, %c0_58, %c0_59] : memref<3x3x16x16xbf16, #tpu.memory_space<vmem>>, vector<1x1x16x16xbf16>
    %40 = vector.shape_cast %39 : vector<1x1x16x16xbf16> to vector<16x16xbf16>
    %cst_60 = arith.constant dense<0.000000e+00> : vector<80x16xf32>
    %41 = tpu.matmul %38, %40, %cst_60 {dimension_numbers = #tpu.dot_dimension_numbers<[1], [0], [0], [1], [0, 0, 1, 1], [], []>} : vector<80x16xbf16>, vector<16x16xbf16>, vector<80x16xf32> -> vector<80x16xf32>
    %c0_61 = arith.constant 0 : index
    %c0_62 = arith.constant 0 : index
    %42 = vector.load %arg7[%c0_61, %c0_62] : memref<80x16xf32, #tpu.memory_space<vmem>>, vector<80x16xf32>
    %43 = arith.addf %42, %41 : vector<80x16xf32>
    %c0_63 = arith.constant 0 : index
    %c0_64 = arith.constant 0 : index
    %44 = vector.load %arg7[%c0_63, %c0_64] : memref<80x16xf32, #tpu.memory_space<vmem>>, vector<80x16xf32>
    tpu.vector_store %arg7[%c0_63, %c0_64], %43 {strides = array<i32>} : memref<80x16xf32, #tpu.memory_space<vmem>>, vector<80x16xf32>,
    %c10 = arith.constant 10 : index
    %c0_65 = arith.constant 0 : index
    %45 = vector.load %arg6[%c10, %c0_65] : memref<102x16xbf16, #tpu.memory_space<vmem>>, vector<80x16xbf16>
    %c1_66 = arith.constant 1 : index
    %c0_67 = arith.constant 0 : index
    %c0_68 = arith.constant 0 : index
    %c0_69 = arith.constant 0 : index
    %46 = vector.load %arg3[%c1_66, %c0_67, %c0_68, %c0_69] : memref<3x3x16x16xbf16, #tpu.memory_space<vmem>>, vector<1x1x16x16xbf16>
    %47 = vector.shape_cast %46 : vector<1x1x16x16xbf16> to vector<16x16xbf16>
    %cst_70 = arith.constant dense<0.000000e+00> : vector<80x16xf32>
    %48 = tpu.matmul %45, %47, %cst_70 {dimension_numbers = #tpu.dot_dimension_numbers<[1], [0], [0], [1], [0, 0, 1, 1], [], []>} : vector<80x16xbf16>, vector<16x16xbf16>, vector<80x16xf32> -> vector<80x16xf32>
    %c0_71 = arith.constant 0 : index
    %c0_72 = arith.constant 0 : index
    %49 = vector.load %arg7[%c0_71, %c0_72] : memref<80x16xf32, #tpu.memory_space<vmem>>, vector<80x16xf32>
    %50 = arith.addf %49, %48 : vector<80x16xf32>
    %c0_73 = arith.constant 0 : index
    %c0_74 = arith.constant 0 : index
    %51 = vector.load %arg7[%c0_73, %c0_74] : memref<80x16xf32, #tpu.memory_space<vmem>>, vector<80x16xf32>
    tpu.vector_store %arg7[%c0_73, %c0_74], %50 {strides = array<i32>} : memref<80x16xf32, #tpu.memory_space<vmem>>, vector<80x16xf32>,
    %c11_75 = arith.constant 11 : index
    %c0_76 = arith.constant 0 : index
    %52 = vector.load %arg6[%c11_75, %c0_76] : memref<102x16xbf16, #tpu.memory_space<vmem>>, vector<80x16xbf16>
    %c1_77 = arith.constant 1 : index
    %c1_78 = arith.constant 1 : index
    %c0_79 = arith.constant 0 : index
    %c0_80 = arith.constant 0 : index
    %53 = vector.load %arg3[%c1_77, %c1_78, %c0_79, %c0_80] : memref<3x3x16x16xbf16, #tpu.memory_space<vmem>>, vector<1x1x16x16xbf16>
    %54 = vector.shape_cast %53 : vector<1x1x16x16xbf16> to vector<16x16xbf16>
    %cst_81 = arith.constant dense<0.000000e+00> : vector<80x16xf32>
    %55 = tpu.matmul %52, %54, %cst_81 {dimension_numbers = #tpu.dot_dimension_numbers<[1], [0], [0], [1], [0, 0, 1, 1], [], []>} : vector<80x16xbf16>, vector<16x16xbf16>, vector<80x16xf32> -> vector<80x16xf32>
    %c0_82 = arith.constant 0 : index
    %c0_83 = arith.constant 0 : index
    %56 = vector.load %arg7[%c0_82, %c0_83] : memref<80x16xf32, #tpu.memory_space<vmem>>, vector<80x16xf32>
    %57 = arith.addf %56, %55 : vector<80x16xf32>
    %c0_84 = arith.constant 0 : index
    %c0_85 = arith.constant 0 : index
    %58 = vector.load %arg7[%c0_84, %c0_85] : memref<80x16xf32, #tpu.memory_space<vmem>>, vector<80x16xf32>
    tpu.vector_store %arg7[%c0_84, %c0_85], %57 {strides = array<i32>} : memref<80x16xf32, #tpu.memory_space<vmem>>, vector<80x16xf32>,
    %c12 = arith.constant 12 : index
    %c0_86 = arith.constant 0 : index
    %59 = vector.load %arg6[%c12, %c0_86] : memref<102x16xbf16, #tpu.memory_space<vmem>>, vector<80x16xbf16>
    %c1_87 = arith.constant 1 : index
    %c2_88 = arith.constant 2 : index
    %c0_89 = arith.constant 0 : index
    %c0_90 = arith.constant 0 : index
    %60 = vector.load %arg3[%c1_87, %c2_88, %c0_89, %c0_90] : memref<3x3x16x16xbf16, #tpu.memory_space<vmem>>, vector<1x1x16x16xbf16>
    %61 = vector.shape_cast %60 : vector<1x1x16x16xbf16> to vector<16x16xbf16>
    %cst_91 = arith.constant dense<0.000000e+00> : vector<80x16xf32>
    %62 = tpu.matmul %59, %61, %cst_91 {dimension_numbers = #tpu.dot_dimension_numbers<[1], [0], [0], [1], [0, 0, 1, 1], [], []>} : vector<80x16xbf16>, vector<16x16xbf16>, vector<80x16xf32> -> vector<80x16xf32>
    %c0_92 = arith.constant 0 : index
    %c0_93 = arith.constant 0 : index
    %63 = vector.load %arg7[%c0_92, %c0_93] : memref<80x16xf32, #tpu.memory_space<vmem>>, vector<80x16xf32>
    %64 = arith.addf %63, %62 : vector<80x16xf32>
    %c0_94 = arith.constant 0 : index
    %c0_95 = arith.constant 0 : index
    %65 = vector.load %arg7[%c0_94, %c0_95] : memref<80x16xf32, #tpu.memory_space<vmem>>, vector<80x16xf32>
    tpu.vector_store %arg7[%c0_94, %c0_95], %64 {strides = array<i32>} : memref<80x16xf32, #tpu.memory_space<vmem>>, vector<80x16xf32>,
    %c20 = arith.constant 20 : index
    %c0_96 = arith.constant 0 : index
    %66 = vector.load %arg6[%c20, %c0_96] : memref<102x16xbf16, #tpu.memory_space<vmem>>, vector<80x16xbf16>
    %c2_97 = arith.constant 2 : index
    %c0_98 = arith.constant 0 : index
    %c0_99 = arith.constant 0 : index
    %c0_100 = arith.constant 0 : index
    %67 = vector.load %arg3[%c2_97, %c0_98, %c0_99, %c0_100] : memref<3x3x16x16xbf16, #tpu.memory_space<vmem>>, vector<1x1x16x16xbf16>
    %68 = vector.shape_cast %67 : vector<1x1x16x16xbf16> to vector<16x16xbf16>
    %cst_101 = arith.constant dense<0.000000e+00> : vector<80x16xf32>
    %69 = tpu.matmul %66, %68, %cst_101 {dimension_numbers = #tpu.dot_dimension_numbers<[1], [0], [0], [1], [0, 0, 1, 1], [], []>} : vector<80x16xbf16>, vector<16x16xbf16>, vector<80x16xf32> -> vector<80x16xf32>
    %c0_102 = arith.constant 0 : index
    %c0_103 = arith.constant 0 : index
    %70 = vector.load %arg7[%c0_102, %c0_103] : memref<80x16xf32, #tpu.memory_space<vmem>>, vector<80x16xf32>
    %71 = arith.addf %70, %69 : vector<80x16xf32>
    %c0_104 = arith.constant 0 : index
    %c0_105 = arith.constant 0 : index
    %72 = vector.load %arg7[%c0_104, %c0_105] : memref<80x16xf32, #tpu.memory_space<vmem>>, vector<80x16xf32>
    tpu.vector_store %arg7[%c0_104, %c0_105], %71 {strides = array<i32>} : memref<80x16xf32, #tpu.memory_space<vmem>>, vector<80x16xf32>,
    %c21_106 = arith.constant 21 : index
    %c0_107 = arith.constant 0 : index
    %73 = vector.load %arg6[%c21_106, %c0_107] : memref<102x16xbf16, #tpu.memory_space<vmem>>, vector<80x16xbf16>
    %c2_108 = arith.constant 2 : index
    %c1_109 = arith.constant 1 : index
    %c0_110 = arith.constant 0 : index
    %c0_111 = arith.constant 0 : index
    %74 = vector.load %arg3[%c2_108, %c1_109, %c0_110, %c0_111] : memref<3x3x16x16xbf16, #tpu.memory_space<vmem>>, vector<1x1x16x16xbf16>
    %75 = vector.shape_cast %74 : vector<1x1x16x16xbf16> to vector<16x16xbf16>
    %cst_112 = arith.constant dense<0.000000e+00> : vector<80x16xf32>
    %76 = tpu.matmul %73, %75, %cst_112 {dimension_numbers = #tpu.dot_dimension_numbers<[1], [0], [0], [1], [0, 0, 1, 1], [], []>} : vector<80x16xbf16>, vector<16x16xbf16>, vector<80x16xf32> -> vector<80x16xf32>
    %c0_113 = arith.constant 0 : index
    %c0_114 = arith.constant 0 : index
    %77 = vector.load %arg7[%c0_113, %c0_114] : memref<80x16xf32, #tpu.memory_space<vmem>>, vector<80x16xf32>
    %78 = arith.addf %77, %76 : vector<80x16xf32>
    %c0_115 = arith.constant 0 : index
    %c0_116 = arith.constant 0 : index
    %79 = vector.load %arg7[%c0_115, %c0_116] : memref<80x16xf32, #tpu.memory_space<vmem>>, vector<80x16xf32>
    tpu.vector_store %arg7[%c0_115, %c0_116], %78 {strides = array<i32>} : memref<80x16xf32, #tpu.memory_space<vmem>>, vector<80x16xf32>,
    %c22 = arith.constant 22 : index
    %c0_117 = arith.constant 0 : index
    %80 = vector.load %arg6[%c22, %c0_117] : memref<102x16xbf16, #tpu.memory_space<vmem>>, vector<80x16xbf16>
    %c2_118 = arith.constant 2 : index
    %c2_119 = arith.constant 2 : index
    %c0_120 = arith.constant 0 : index
    %c0_121 = arith.constant 0 : index
    %81 = vector.load %arg3[%c2_118, %c2_119, %c0_120, %c0_121] : memref<3x3x16x16xbf16, #tpu.memory_space<vmem>>, vector<1x1x16x16xbf16>
    %82 = vector.shape_cast %81 : vector<1x1x16x16xbf16> to vector<16x16xbf16>
    %cst_122 = arith.constant dense<0.000000e+00> : vector<80x16xf32>
    %83 = tpu.matmul %80, %82, %cst_122 {dimension_numbers = #tpu.dot_dimension_numbers<[1], [0], [0], [1], [0, 0, 1, 1], [], []>} : vector<80x16xbf16>, vector<16x16xbf16>, vector<80x16xf32> -> vector<80x16xf32>
    %c0_123 = arith.constant 0 : index
    %c0_124 = arith.constant 0 : index
    %84 = vector.load %arg7[%c0_123, %c0_124] : memref<80x16xf32, #tpu.memory_space<vmem>>, vector<80x16xf32>
    %85 = arith.addf %84, %83 : vector<80x16xf32>
    %c0_125 = arith.constant 0 : index
    %c0_126 = arith.constant 0 : index
    %86 = vector.load %arg7[%c0_125, %c0_126] : memref<80x16xf32, #tpu.memory_space<vmem>>, vector<80x16xf32>
    tpu.vector_store %arg7[%c0_125, %c0_126], %85 {strides = array<i32>} : memref<80x16xf32, #tpu.memory_space<vmem>>, vector<80x16xf32>,
    %c0_127 = arith.constant 0 : index
    %c0_128 = arith.constant 0 : index
    %87 = vector.load %arg7[%c0_127, %c0_128] : memref<80x16xf32, #tpu.memory_space<vmem>>, vector<8x16xf32>
    %c0_129 = arith.constant 0 : index
    %c0_130 = arith.constant 0 : index
    %88 = vector.load %arg4[%c0_129, %c0_130] : memref<1x16xf32, #tpu.memory_space<vmem>>, vector<1x16xf32>
    %89 = vector.broadcast %88 : vector<1x16xf32> to vector<8x16xf32>
    %90 = arith.addf %87, %89 : vector<8x16xf32>
    %cst_131 = arith.constant 0.000000e+00 : f32
    %91 = vector.broadcast %cst_131 : f32 to vector<8x16xf32>
    %92 = arith.maximumf %90, %91 : vector<8x16xf32>
    %93 = arith.truncf %92 : vector<8x16xf32> to vector<8x16xbf16>
    %c0_132 = arith.constant 0 : index
    %c0_133 = arith.constant 0 : index
    %c0_134 = arith.constant 0 : index
    %94 = vector.load %arg5[%c0_132, %c0_133, %c0_134] : memref<1x64x16xbf16, #tpu.memory_space<vmem>>, vector<1x8x16xbf16>
    %95 = vector.shape_cast %94 : vector<1x8x16xbf16> to vector<8x16xbf16>
    %96 = vector.shape_cast %93 : vector<8x16xbf16> to vector<1x8x16xbf16>
    tpu.vector_store %arg5[%c0_132, %c0_133, %c0_134], %96 {strides = array<i32>} : memref<1x64x16xbf16, #tpu.memory_space<vmem>>, vector<1x8x16xbf16>,
    %c10_135 = arith.constant 10 : index
    %c0_136 = arith.constant 0 : index
    %97 = vector.load %arg7[%c10_135, %c0_136] : memref<80x16xf32, #tpu.memory_space<vmem>>, vector<8x16xf32>
    %c0_137 = arith.constant 0 : index
    %c0_138 = arith.constant 0 : index
    %98 = vector.load %arg4[%c0_137, %c0_138] : memref<1x16xf32, #tpu.memory_space<vmem>>, vector<1x16xf32>
    %99 = vector.broadcast %98 : vector<1x16xf32> to vector<8x16xf32>
    %100 = arith.addf %97, %99 : vector<8x16xf32>
    %cst_139 = arith.constant 0.000000e+00 : f32
    %101 = vector.broadcast %cst_139 : f32 to vector<8x16xf32>
    %102 = arith.maximumf %100, %101 : vector<8x16xf32>
    %103 = arith.truncf %102 : vector<8x16xf32> to vector<8x16xbf16>
    %c0_140 = arith.constant 0 : index
    %c8 = arith.constant 8 : index
    %c0_141 = arith.constant 0 : index
    %104 = vector.load %arg5[%c0_140, %c8, %c0_141] : memref<1x64x16xbf16, #tpu.memory_space<vmem>>, vector<1x8x16xbf16>
    %105 = vector.shape_cast %104 : vector<1x8x16xbf16> to vector<8x16xbf16>
    %106 = vector.shape_cast %103 : vector<8x16xbf16> to vector<1x8x16xbf16>
    tpu.vector_store %arg5[%c0_140, %c8, %c0_141], %106 {strides = array<i32>} : memref<1x64x16xbf16, #tpu.memory_space<vmem>>, vector<1x8x16xbf16>,
    %c20_142 = arith.constant 20 : index
    %c0_143 = arith.constant 0 : index
    %107 = vector.load %arg7[%c20_142, %c0_143] : memref<80x16xf32, #tpu.memory_space<vmem>>, vector<8x16xf32>
    %c0_144 = arith.constant 0 : index
    %c0_145 = arith.constant 0 : index
    %108 = vector.load %arg4[%c0_144, %c0_145] : memref<1x16xf32, #tpu.memory_space<vmem>>, vector<1x16xf32>
    %109 = vector.broadcast %108 : vector<1x16xf32> to vector<8x16xf32>
    %110 = arith.addf %107, %109 : vector<8x16xf32>
    %cst_146 = arith.constant 0.000000e+00 : f32
    %111 = vector.broadcast %cst_146 : f32 to vector<8x16xf32>
    %112 = arith.maximumf %110, %111 : vector<8x16xf32>
    %113 = arith.truncf %112 : vector<8x16xf32> to vector<8x16xbf16>
    %c0_147 = arith.constant 0 : index
    %c16 = arith.constant 16 : index
    %c0_148 = arith.constant 0 : index
    %114 = vector.load %arg5[%c0_147, %c16, %c0_148] : memref<1x64x16xbf16, #tpu.memory_space<vmem>>, vector<1x8x16xbf16>
    %115 = vector.shape_cast %114 : vector<1x8x16xbf16> to vector<8x16xbf16>
    %116 = vector.shape_cast %113 : vector<8x16xbf16> to vector<1x8x16xbf16>
    tpu.vector_store %arg5[%c0_147, %c16, %c0_148], %116 {strides = array<i32>} : memref<1x64x16xbf16, #tpu.memory_space<vmem>>, vector<1x8x16xbf16>,
    %c30 = arith.constant 30 : index
    %c0_149 = arith.constant 0 : index
    %117 = vector.load %arg7[%c30, %c0_149] : memref<80x16xf32, #tpu.memory_space<vmem>>, vector<8x16xf32>
    %c0_150 = arith.constant 0 : index
    %c0_151 = arith.constant 0 : index
    %118 = vector.load %arg4[%c0_150, %c0_151] : memref<1x16xf32, #tpu.memory_space<vmem>>, vector<1x16xf32>
    %119 = vector.broadcast %118 : vector<1x16xf32> to vector<8x16xf32>
    %120 = arith.addf %117, %119 : vector<8x16xf32>
    %cst_152 = arith.constant 0.000000e+00 : f32
    %121 = vector.broadcast %cst_152 : f32 to vector<8x16xf32>
    %122 = arith.maximumf %120, %121 : vector<8x16xf32>
    %123 = arith.truncf %122 : vector<8x16xf32> to vector<8x16xbf16>
    %c0_153 = arith.constant 0 : index
    %c24 = arith.constant 24 : index
    %c0_154 = arith.constant 0 : index
    %124 = vector.load %arg5[%c0_153, %c24, %c0_154] : memref<1x64x16xbf16, #tpu.memory_space<vmem>>, vector<1x8x16xbf16>
    %125 = vector.shape_cast %124 : vector<1x8x16xbf16> to vector<8x16xbf16>
    %126 = vector.shape_cast %123 : vector<8x16xbf16> to vector<1x8x16xbf16>
    tpu.vector_store %arg5[%c0_153, %c24, %c0_154], %126 {strides = array<i32>} : memref<1x64x16xbf16, #tpu.memory_space<vmem>>, vector<1x8x16xbf16>,
    %c40 = arith.constant 40 : index
    %c0_155 = arith.constant 0 : index
    %127 = vector.load %arg7[%c40, %c0_155] : memref<80x16xf32, #tpu.memory_space<vmem>>, vector<8x16xf32>
    %c0_156 = arith.constant 0 : index
    %c0_157 = arith.constant 0 : index
    %128 = vector.load %arg4[%c0_156, %c0_157] : memref<1x16xf32, #tpu.memory_space<vmem>>, vector<1x16xf32>
    %129 = vector.broadcast %128 : vector<1x16xf32> to vector<8x16xf32>
    %130 = arith.addf %127, %129 : vector<8x16xf32>
    %cst_158 = arith.constant 0.000000e+00 : f32
    %131 = vector.broadcast %cst_158 : f32 to vector<8x16xf32>
    %132 = arith.maximumf %130, %131 : vector<8x16xf32>
    %133 = arith.truncf %132 : vector<8x16xf32> to vector<8x16xbf16>
    %c0_159 = arith.constant 0 : index
    %c32 = arith.constant 32 : index
    %c0_160 = arith.constant 0 : index
    %134 = vector.load %arg5[%c0_159, %c32, %c0_160] : memref<1x64x16xbf16, #tpu.memory_space<vmem>>, vector<1x8x16xbf16>
    %135 = vector.shape_cast %134 : vector<1x8x16xbf16> to vector<8x16xbf16>
    %136 = vector.shape_cast %133 : vector<8x16xbf16> to vector<1x8x16xbf16>
    tpu.vector_store %arg5[%c0_159, %c32, %c0_160], %136 {strides = array<i32>} : memref<1x64x16xbf16, #tpu.memory_space<vmem>>, vector<1x8x16xbf16>,
    %c50 = arith.constant 50 : index
    %c0_161 = arith.constant 0 : index
    %137 = vector.load %arg7[%c50, %c0_161] : memref<80x16xf32, #tpu.memory_space<vmem>>, vector<8x16xf32>
    %c0_162 = arith.constant 0 : index
    %c0_163 = arith.constant 0 : index
    %138 = vector.load %arg4[%c0_162, %c0_163] : memref<1x16xf32, #tpu.memory_space<vmem>>, vector<1x16xf32>
    %139 = vector.broadcast %138 : vector<1x16xf32> to vector<8x16xf32>
    %140 = arith.addf %137, %139 : vector<8x16xf32>
    %cst_164 = arith.constant 0.000000e+00 : f32
    %141 = vector.broadcast %cst_164 : f32 to vector<8x16xf32>
    %142 = arith.maximumf %140, %141 : vector<8x16xf32>
    %143 = arith.truncf %142 : vector<8x16xf32> to vector<8x16xbf16>
    %c0_165 = arith.constant 0 : index
    %c40_166 = arith.constant 40 : index
    %c0_167 = arith.constant 0 : index
    %144 = vector.load %arg5[%c0_165, %c40_166, %c0_167] : memref<1x64x16xbf16, #tpu.memory_space<vmem>>, vector<1x8x16xbf16>
    %145 = vector.shape_cast %144 : vector<1x8x16xbf16> to vector<8x16xbf16>
    %146 = vector.shape_cast %143 : vector<8x16xbf16> to vector<1x8x16xbf16>
    tpu.vector_store %arg5[%c0_165, %c40_166, %c0_167], %146 {strides = array<i32>} : memref<1x64x16xbf16, #tpu.memory_space<vmem>>, vector<1x8x16xbf16>,
    %c60 = arith.constant 60 : index
    %c0_168 = arith.constant 0 : index
    %147 = vector.load %arg7[%c60, %c0_168] : memref<80x16xf32, #tpu.memory_space<vmem>>, vector<8x16xf32>
    %c0_169 = arith.constant 0 : index
    %c0_170 = arith.constant 0 : index
    %148 = vector.load %arg4[%c0_169, %c0_170] : memref<1x16xf32, #tpu.memory_space<vmem>>, vector<1x16xf32>
    %149 = vector.broadcast %148 : vector<1x16xf32> to vector<8x16xf32>
    %150 = arith.addf %147, %149 : vector<8x16xf32>
    %cst_171 = arith.constant 0.000000e+00 : f32
    %151 = vector.broadcast %cst_171 : f32 to vector<8x16xf32>
    %152 = arith.maximumf %150, %151 : vector<8x16xf32>
    %153 = arith.truncf %152 : vector<8x16xf32> to vector<8x16xbf16>
    %c0_172 = arith.constant 0 : index
    %c48 = arith.constant 48 : index
    %c0_173 = arith.constant 0 : index
    %154 = vector.load %arg5[%c0_172, %c48, %c0_173] : memref<1x64x16xbf16, #tpu.memory_space<vmem>>, vector<1x8x16xbf16>
    %155 = vector.shape_cast %154 : vector<1x8x16xbf16> to vector<8x16xbf16>
    %156 = vector.shape_cast %153 : vector<8x16xbf16> to vector<1x8x16xbf16>
    tpu.vector_store %arg5[%c0_172, %c48, %c0_173], %156 {strides = array<i32>} : memref<1x64x16xbf16, #tpu.memory_space<vmem>>, vector<1x8x16xbf16>,
    %c70 = arith.constant 70 : index
    %c0_174 = arith.constant 0 : index
    %157 = vector.load %arg7[%c70, %c0_174] : memref<80x16xf32, #tpu.memory_space<vmem>>, vector<8x16xf32>
    %c0_175 = arith.constant 0 : index
    %c0_176 = arith.constant 0 : index
    %158 = vector.load %arg4[%c0_175, %c0_176] : memref<1x16xf32, #tpu.memory_space<vmem>>, vector<1x16xf32>
    %159 = vector.broadcast %158 : vector<1x16xf32> to vector<8x16xf32>
    %160 = arith.addf %157, %159 : vector<8x16xf32>
    %cst_177 = arith.constant 0.000000e+00 : f32
    %161 = vector.broadcast %cst_177 : f32 to vector<8x16xf32>
    %162 = arith.maximumf %160, %161 : vector<8x16xf32>
    %163 = arith.truncf %162 : vector<8x16xf32> to vector<8x16xbf16>
    %c0_178 = arith.constant 0 : index
    %c56 = arith.constant 56 : index
    %c0_179 = arith.constant 0 : index
    %164 = vector.load %arg5[%c0_178, %c56, %c0_179] : memref<1x64x16xbf16, #tpu.memory_space<vmem>>, vector<1x8x16xbf16>
    %165 = vector.shape_cast %164 : vector<1x8x16xbf16> to vector<8x16xbf16>
    %166 = vector.shape_cast %163 : vector<8x16xbf16> to vector<1x8x16xbf16>
    tpu.vector_store %arg5[%c0_178, %c56, %c0_179], %166 {strides = array<i32>} : memref<1x64x16xbf16, #tpu.memory_space<vmem>>, vector<1x8x16xbf16>,
    return
  }
  func.func @transform_0(%arg0: i32, %arg1: i32) -> (i32, i32, i32, i32) {
    %c0_i32 = arith.constant 0 : i32
    %c0_i32_0 = arith.constant 0 : i32
    %c0_i32_1 = arith.constant 0 : i32
    %c0_i32_2 = arith.constant 0 : i32
    return %arg0, %c0_i32, %c0_i32_0, %c0_i32_1 : i32, i32, i32, i32
  }
  func.func @transform_1(%arg0: i32, %arg1: i32) -> (i32, i32, i32, i32) {
    %c0_i32 = arith.constant 0 : i32
    %c0_i32_0 = arith.constant 0 : i32
    %c0_i32_1 = arith.constant 0 : i32
    %c0_i32_2 = arith.constant 0 : i32
    return %c0_i32, %c0_i32_0, %c0_i32_1, %arg1 : i32, i32, i32, i32
  }
  func.func @transform_2(%arg0: i32, %arg1: i32) -> (i32, i32) {
    %c0_i32 = arith.constant 0 : i32
    %c0_i32_0 = arith.constant 0 : i32
    return %c0_i32, %arg1 : i32, i32
  }
  func.func @transform_3(%arg0: i32, %arg1: i32) -> (i32, i32, i32) {
    %c0_i32 = arith.constant 0 : i32
    %c0_i32_0 = arith.constant 0 : i32
    return %arg0, %c0_i32, %arg1 : i32, i32, i32
  }
}

module attributes {stable_mosaic.version = 11 : i64} {
  func.func @_scale_conv3_residual_kernel(%arg0: i32, %arg1: i32, %arg2: i32, %arg3: memref<1x64x16xbf16, #tpu.memory_space<vmem>>, %arg4: memref<1x1x16xf32, #tpu.memory_space<vmem>>, %arg5: memref<1x64x1xf32, #tpu.memory_space<vmem>>, %arg6: memref<16x64xbf16, #tpu.memory_space<vmem>>, %arg7: memref<1x64xf32, #tpu.memory_space<vmem>>, %arg8: memref<1x64x64xf32, #tpu.memory_space<vmem>>, %arg9: memref<1x64x64xbf16, #tpu.memory_space<vmem>>) attributes {dimension_semantics = [#tpu.dimension_semantics<parallel>, #tpu.dimension_semantics<parallel>, #tpu.dimension_semantics<parallel>], iteration_bounds = array<i64: 2, 1, 1>, scalar_prefetch = 0 : i64, scratch_operands = 0 : i64, tpu.core_type = #tpu.core_type<tc>, window_params = [{transform_indices = @transform_0, window_bounds = array<i64: 1, 64, 16>}, {transform_indices = @transform_1, window_bounds = array<i64: 1, 1, 16>}, {transform_indices = @transform_2, window_bounds = array<i64: 1, 64, 1>}, {transform_indices = @transform_3, window_bounds = array<i64: 16, 64>}, {transform_indices = @transform_4, window_bounds = array<i64: 1, 64>}, {transform_indices = @transform_5, window_bounds = array<i64: 1, 64, 64>}, {transform_indices = @transform_6, window_bounds = array<i64: 1, 64, 64>}]} {
    %c0 = arith.constant 0 : index
    %c0_0 = arith.constant 0 : index
    %c0_1 = arith.constant 0 : index
    %0 = vector.load %arg3[%c0, %c0_0, %c0_1] : memref<1x64x16xbf16, #tpu.memory_space<vmem>>, vector<1x64x16xbf16>
    %1 = vector.shape_cast %0 : vector<1x64x16xbf16> to vector<64x16xbf16>
    %2 = arith.extf %1 : vector<64x16xbf16> to vector<64x16xf32>
    %cst = arith.constant 2.000000e+00 : f32
    %3 = vector.broadcast %cst : f32 to vector<64x16xf32>
    %4 = arith.mulf %3, %2 : vector<64x16xf32>
    %c0_2 = arith.constant 0 : index
    %c0_3 = arith.constant 0 : index
    %c0_4 = arith.constant 0 : index
    %5 = vector.load %arg4[%c0_2, %c0_3, %c0_4] : memref<1x1x16xf32, #tpu.memory_space<vmem>>, vector<1x1x16xf32>
    %6 = vector.shape_cast %5 : vector<1x1x16xf32> to vector<1x16xf32>
    %7 = vector.broadcast %6 : vector<1x16xf32> to vector<64x16xf32>
    %8 = arith.mulf %4, %7 : vector<64x16xf32>
    %c0_5 = arith.constant 0 : index
    %c0_6 = arith.constant 0 : index
    %c0_7 = arith.constant 0 : index
    %9 = vector.load %arg5[%c0_5, %c0_6, %c0_7] : memref<1x64x1xf32, #tpu.memory_space<vmem>>, vector<1x64x1xf32>
    %10 = vector.shape_cast %9 : vector<1x64x1xf32> to vector<64x1xf32>
    %11 = vector.broadcast %10 : vector<64x1xf32> to vector<64x16xf32>
    %12 = arith.mulf %8, %11 : vector<64x16xf32>
    %13 = arith.truncf %12 : vector<64x16xf32> to vector<64x16xbf16>
    %c0_8 = arith.constant 0 : index
    %c0_9 = arith.constant 0 : index
    %14 = vector.load %arg6[%c0_8, %c0_9] : memref<16x64xbf16, #tpu.memory_space<vmem>>, vector<16x64xbf16>
    %cst_10 = arith.constant dense<0.000000e+00> : vector<64x64xf32>
    %15 = tpu.matmul %13, %14, %cst_10 {dimension_numbers = #tpu.dot_dimension_numbers<[1], [0], [0], [1], [0, 0, 1, 1], [], []>} : vector<64x16xbf16>, vector<16x64xbf16>, vector<64x64xf32> -> vector<64x64xf32>
    %c0_11 = arith.constant 0 : index
    %c0_12 = arith.constant 0 : index
    %16 = vector.load %arg7[%c0_11, %c0_12] : memref<1x64xf32, #tpu.memory_space<vmem>>, vector<1x64xf32>
    %17 = vector.broadcast %16 : vector<1x64xf32> to vector<64x64xf32>
    %18 = arith.addf %15, %17 : vector<64x64xf32>
    %c0_13 = arith.constant 0 : index
    %c0_14 = arith.constant 0 : index
    %c0_15 = arith.constant 0 : index
    %19 = vector.load %arg8[%c0_13, %c0_14, %c0_15] : memref<1x64x64xf32, #tpu.memory_space<vmem>>, vector<1x64x64xf32>
    %20 = vector.shape_cast %19 : vector<1x64x64xf32> to vector<64x64xf32>
    %21 = arith.addf %18, %20 : vector<64x64xf32>
    %cst_16 = arith.constant 0.000000e+00 : f32
    %22 = vector.broadcast %cst_16 : f32 to vector<64x64xf32>
    %23 = arith.maximumf %21, %22 : vector<64x64xf32>
    %24 = arith.truncf %23 : vector<64x64xf32> to vector<64x64xbf16>
    %c0_17 = arith.constant 0 : index
    %c0_18 = arith.constant 0 : index
    %c0_19 = arith.constant 0 : index
    %25 = vector.load %arg9[%c0_17, %c0_18, %c0_19] : memref<1x64x64xbf16, #tpu.memory_space<vmem>>, vector<1x64x64xbf16>
    %26 = vector.shape_cast %25 : vector<1x64x64xbf16> to vector<64x64xbf16>
    %27 = vector.shape_cast %24 : vector<64x64xbf16> to vector<1x64x64xbf16>
    tpu.vector_store %arg9[%c0_17, %c0_18, %c0_19], %27 {strides = array<i32>} : memref<1x64x64xbf16, #tpu.memory_space<vmem>>, vector<1x64x64xbf16>,
    return
  }
  func.func @transform_0(%arg0: i32, %arg1: i32, %arg2: i32) -> (i32, i32, i32) {
    %c0_i32 = arith.constant 0 : i32
    %c0_i32_0 = arith.constant 0 : i32
    return %arg0, %arg1, %c0_i32 : i32, i32, i32
  }
  func.func @transform_1(%arg0: i32, %arg1: i32, %arg2: i32) -> (i32, i32, i32) {
    %c0_i32 = arith.constant 0 : i32
    %c0_i32_0 = arith.constant 0 : i32
    %c0_i32_1 = arith.constant 0 : i32
    return %arg0, %c0_i32, %c0_i32_0 : i32, i32, i32
  }
  func.func @transform_2(%arg0: i32, %arg1: i32, %arg2: i32) -> (i32, i32, i32) {
    %c0_i32 = arith.constant 0 : i32
    %c0_i32_0 = arith.constant 0 : i32
    return %arg0, %arg1, %c0_i32 : i32, i32, i32
  }
  func.func @transform_3(%arg0: i32, %arg1: i32, %arg2: i32) -> (i32, i32) {
    %c0_i32 = arith.constant 0 : i32
    %c0_i32_0 = arith.constant 0 : i32
    return %c0_i32, %arg2 : i32, i32
  }
  func.func @transform_4(%arg0: i32, %arg1: i32, %arg2: i32) -> (i32, i32) {
    %c0_i32 = arith.constant 0 : i32
    %c0_i32_0 = arith.constant 0 : i32
    return %c0_i32, %arg2 : i32, i32
  }
  func.func @transform_5(%arg0: i32, %arg1: i32, %arg2: i32) -> (i32, i32, i32) {
    %c0_i32 = arith.constant 0 : i32
    return %arg0, %arg1, %arg2 : i32, i32, i32
  }
  func.func @transform_6(%arg0: i32, %arg1: i32, %arg2: i32) -> (i32, i32, i32) {
    %c0_i32 = arith.constant 0 : i32
    return %arg0, %arg1, %arg2 : i32, i32, i32
  }
}

</mosaic_0001>

<bundles_post_ra>
// kernel: bottleneck_forward.4
= control target key start
LH: loop header
LB: loop body
LE: loop exit
PB: predicated region body
PF: predicated region fallthrough
CT: control target
= control target key end

     0   :  { %8 = vsyncpa [#allocation4], 0  ;;  %s602_s0 = inlined_call_operand.hbm [shape: f32[128,64], index: 0, kind: input, shape index: {}]   ;;  %s603_s1 = inlined_call_operand.vmem [shape: bf16[64,16], index: 1, kind: input, shape index: {}]   ;;  %s604_s2 = inlined_call_operand.hbm [shape: f32[1,16], index: 2, kind: input, shape index: {}]   ;;  %s605_s3 = inlined_call_operand.vmem [shape: bf16[128,16], index: 3, kind: output, shape index: {}]  }
   0x1   :  { %s14_s14 = sshll.u32 %s602_s0, 4  ;;  %s15_s14 = int_to_ptr.hbm [resolvable:$true] %s14_s14 }
   0x2   :  { %9 = vsyncpa [#allocation6], 0  ;;  %s437_s15 = smov [#allocation3]   ;;  %s30_s19 = sshll.u32 %s604_s2, 4  ;;  %s31_s19 = int_to_ptr.hbm [resolvable:$true] %s30_s19 }
   0x3   :  { %s16_s16 = sshll.u32 %s437_s15, 4  ;;  %s438_s20 = smov 128   ;;  %s17_s16 = int_to_ptr.vmem [resolvable:$true] %s16_s16 }
   0x4   :  { %s439_s21 = smov 8   ;;  %s440_s22 = smov [#allocation5]  }
   0x5   :  { %22 = dma.hbm_to_vmem [thread:$0]  %s15_s14, 2048, %s17_s16, [#allocation4], %s438_s20, %s438_s20, %s439_s21  }
   0x6   :  { %s32_s23 = sshll.u32 %s440_s22, 4  ;;  %s33_s23 = int_to_ptr.vmem [resolvable:$true] %s32_s23 }
   0x7   :  { %35 = dma.hbm_to_vmem [thread:$0]  %s31_s19, 16, %s33_s23, [#allocation6]  }
   0x8   :  { %433 = dma.done.wait [#allocation4], 2048  }
   0x9   :  { %434 = vsyncadd [#allocation4], 4294965248 }
   0xa   :  { %435 = dma.done.wait [#allocation6], 16  }
   0xb   :  { %436 = vsyncadd [#allocation6], 4294967280  ;;  %v366_v0 = vld [vmem:[%s603_s1 + $0x18] sm:$0xff]  ;;  %v365_v1 = vld [vmem:[%s603_s1 + $0x10] sm:$0xff]  ;;  %vm49_vm0 = vcmask 130048   ;;  %v441_v2 = vmov 0.0  }
   0xc   :  { %167 = vmatpush.bf16.msra.mxu0 %v366_v0  ;;  %367 = vmatpush.bf16.msra.mxu1 %v366_v0  ;;  %50 = vst.msk [vmem:[#allocation2] sm:$0xff] %vm49_vm0, %v441_v2  ;;  %v364_v3 = vld [vmem:[%s603_s1 + $0x8] sm:$0xff]  ;;  %v363_v4 = vld [vmem:[%s603_s1] sm:$0xff]  ;;  %vm138_vm1 = vcmask 523264   ;;  %v84_v17 = vld [vmem:[#allocation3 + $0x10] sm:$0xff]  ;;  %vm316_vm2 = vcmask 125952  }
   0xd   :  { %368 = vmatpush.bf16.msra.mxu2 %v366_v0  ;;  %369 = vmatpush.bf16.msra.mxu3 %v366_v0  ;;  %51 = vst.msk [vmem:[#allocation2 + $0x8] sm:$0xff] %vm49_vm0, %v441_v2  ;;  %v82_v5 = vld [vmem:[#allocation3] sm:$0xff]  ;;  %v83_v6 = vld [vmem:[#allocation3 + $0x8] sm:$0xff]  ;;  %v85_v18 = vld [vmem:[#allocation3 + $0x18] sm:$0xff] }
   0xe   :  { %52 = vst.msk [vmem:[#allocation2 + $0x10] sm:$0xff] %vm49_vm0, %v441_v2  ;;  %v86_v7 = vld [vmem:[#allocation3 + $0x20] sm:$0xff]  ;;  %v87_v8 = vld [vmem:[#allocation3 + $0x28] sm:$0xff]  ;;  %v98_v13 = vpack.c.bf16 %v83_v6, %v82_v5  ;;  %v88_v19 = vld [vmem:[#allocation3 + $0x30] sm:$0xff]  ;;  %v99_v25 = vpack.c.bf16 %v85_v18, %v84_v17 }
   0xf   :  { %53 = vst.msk [vmem:[#allocation2 + $0x18] sm:$0xff] %vm49_vm0, %v441_v2  ;;  %v90_v9 = vld [vmem:[#allocation3 + $0x40] sm:$0xff]  ;;  %v91_v10 = vld [vmem:[#allocation3 + $0x48] sm:$0xff]  ;;  %v100_v14 = vpack.c.bf16 %v87_v8, %v86_v7  ;;  %v89_v20 = vld [vmem:[#allocation3 + $0x38] sm:$0xff] }
  0x10   :  { %168 = vmatpush.bf16.msra.mxu0 %v365_v1  ;;  %370 = vmatpush.bf16.msra.mxu1 %v365_v1  ;;  %54 = vst.msk [vmem:[#allocation2 + $0x20] sm:$0xff] %vm49_vm0, %v441_v2  ;;  %v94_v11 = vld [vmem:[#allocation3 + $0x60] sm:$0xff]  ;;  %v95_v12 = vld [vmem:[#allocation3 + $0x68] sm:$0xff]  ;;  %v102_v15 = vpack.c.bf16 %v91_v10, %v90_v9  ;;  %v92_v21 = vld [vmem:[#allocation3 + $0x50] sm:$0xff]  ;;  %v101_v26 = vpack.c.bf16 %v89_v20, %v88_v19 }
  0x11   :  { %371 = vmatpush.bf16.msra.mxu2 %v365_v1  ;;  %372 = vmatpush.bf16.msra.mxu3 %v365_v1  ;;  %55 = vst.msk [vmem:[#allocation2 + $0x28] sm:$0xff] %vm49_vm0, %v441_v2  ;;  %v104_v16 = vpack.c.bf16 %v95_v12, %v94_v11  ;;  %v93_v22 = vld [vmem:[#allocation3 + $0x58] sm:$0xff]  ;;  %v96_v23 = vld [vmem:[#allocation3 + $0x70] sm:$0xff]  ;;  %v506_v39 = vld [vmem:[#allocation5] ss:$0 sm:$0xff] }
  0x12   :  { %56 = vst.msk [vmem:[#allocation2 + $0x30] sm:$0xff] %vm49_vm0, %v441_v2  ;;  %v97_v24 = vld [vmem:[#allocation3 + $0x78] sm:$0xff]  ;;  %v103_v27 = vpack.c.bf16 %v93_v22, %v92_v21 }
  0x13   :  { %57 = vst.msk [vmem:[#allocation2 + $0x38] sm:$0xff] %vm49_vm0, %v441_v2  ;;  %v105_v28 = vpack.c.bf16 %v97_v24, %v96_v23  ;;  %v66_v29 = vld [vmem:[#allocation2] sm:$0xff] }
  0x14   :  { %169 = vmatpush.bf16.msra.mxu0 %v364_v3  ;;  %373 = vmatpush.bf16.msra.mxu1 %v364_v3  ;;  %58 = vst.msk [vmem:[#allocation2 + $0x40] sm:$0xff] %vm49_vm0, %v441_v2  ;;  %v67_v37 = vld [vmem:[#allocation2 + $0x8] sm:$0xff] }
  0x15   :  { %374 = vmatpush.bf16.msra.mxu2 %v364_v3  ;;  %375 = vmatpush.bf16.msra.mxu3 %v364_v3  ;;  %59 = vst.msk [vmem:[#allocation2 + $0x48] sm:$0xff] %vm49_vm0, %v441_v2  ;;  %v68_v56 = vld [vmem:[#allocation2 + $0x10] sm:$0xff] }
  0x16   :  { %60 = vst.msk [vmem:[#allocation2 + $0x50] sm:$0xff] %vm49_vm0, %v441_v2  ;;  %v69_v22 = vld [vmem:[#allocation2 + $0x18] sm:$0xff] }
  0x17   :  { %61 = vst.msk [vmem:[#allocation2 + $0x58] sm:$0xff] %vm49_vm0, %v441_v2  ;;  %v70_v30 = vld [vmem:[#allocation2 + $0x20] sm:$0xff] }
  0x18   :  { %170 = vmatpush.bf16.msra.mxu0 %v363_v4  ;;  %376 = vmatpush.bf16.msra.mxu1 %v363_v4  ;;  %62 = vst.msk [vmem:[#allocation2 + $0x60] sm:$0xff] %vm49_vm0, %v441_v2  ;;  %v71_v38 = vld [vmem:[#allocation2 + $0x28] sm:$0xff] }
  0x19   :  { %377 = vmatpush.bf16.msra.mxu2 %v363_v4  ;;  %378 = vmatpush.bf16.msra.mxu3 %v363_v4  ;;  %63 = vst.msk [vmem:[#allocation2 + $0x68] sm:$0xff] %vm49_vm0, %v441_v2  ;;  %v72_v60 = vld [vmem:[#allocation2 + $0x30] sm:$0xff] }
  0x1a   :  { %64 = vst.msk [vmem:[#allocation2 + $0x70] sm:$0xff] %vm49_vm0, %v441_v2 }
  0x1b   :  { %355 = vmatmul.msk.bf16.vlgmr.msra.gmra.mxu0 %vm138_vm1, %v98_v13  ;;  %357 = vmatmul.msk.bf16.vlgmr.msra.gmra.mxu1 %vm138_vm1, %v100_v14  ;;  %65 = vst.msk [vmem:[#allocation2 + $0x78] sm:$0xff] %vm49_vm0, %v441_v2  ;;  %v74_v35 = vld [vmem:[#allocation2 + $0x40] sm:$0xff] }
  0x1c   :  { %359 = vmatmul.msk.bf16.vlgmr.msra.gmra.mxu2 %vm138_vm1, %v102_v15  ;;  %361 = vmatmul.msk.bf16.vlgmr.msra.gmra.mxu3 %vm138_vm1, %v104_v16  ;;  %v75_v53 = vld [vmem:[#allocation2 + $0x48] sm:$0xff] }
  0x1d   :  { %v76_v14 = vld [vmem:[#allocation2 + $0x50] sm:$0xff] }
  0x1f   :  { %v78_v36 = vld [vmem:[#allocation2 + $0x60] sm:$0xff] }
  0x20   :  { %v79_v54 = vld [vmem:[#allocation2 + $0x68] sm:$0xff] }
  0x21   :  { %v80_v17 = vld [vmem:[#allocation2 + $0x70] sm:$0xff] }
  0x2b   :  { %356 = vmatmul.msk.bf16.gmra.mxu0 %vm138_vm1, %v99_v25  ;;  %358 = vmatmul.msk.bf16.gmra.mxu1 %vm138_vm1, %v101_v26  ;;  %v73_v26 = vld [vmem:[#allocation2 + $0x38] sm:$0xff] }
  0x2c   :  { %360 = vmatmul.msk.bf16.gmra.mxu2 %vm138_vm1, %v103_v27  ;;  %362 = vmatmul.msk.bf16.gmra.mxu3 %vm138_vm1, %v105_v28 }
  0x98   :  { %v172_v31 = vpop.f32.mrf.mxu0  ;;  %v182_v32 = vpop.f32.mrf.mxu1 }
  0x99   :  { %v212_v33 = vadd.f32 %v172_v31, %v66_v29  ;;  %v216_v34 = vadd.f32 %v182_v32, %v70_v30 }
  0x9b   :  { %229 = vst.msk [vmem:[#allocation2] sm:$0xff] %vm49_vm0, %v212_v33 }
  0x9c   :  { %233 = vst.msk [vmem:[#allocation2 + $0x20] sm:$0xff] %vm49_vm0, %v216_v34 }
  0x9f   :  { %v192_v40 = vpop.f32.mrf.mxu2  ;;  %v202_v41 = vpop.f32.mrf.mxu3 }
  0xa0   :  { %v220_v42 = vadd.f32 %v192_v40, %v74_v35  ;;  %v224_v43 = vadd.f32 %v202_v41, %v78_v36  ;;  %v174_v44 = vpop.f32.mrf.mxu0  ;;  %v184_v45 = vpop.f32.mrf.mxu1 }
  0xa1   :  { %v213_v46 = vadd.f32 %v174_v44, %v67_v37  ;;  %v217_v47 = vadd.f32 %v184_v45, %v71_v38 }
  0xa2   :  { %v248_v48 = vld [vmem:[#allocation2] sm:$0xff]  ;;  %237 = vst.msk [vmem:[#allocation2 + $0x40] sm:$0xff] %vm49_vm0, %v220_v42 }
  0xa3   :  { %v268_v49 = vadd.f32 %v506_v39, %v248_v48  ;;  %v252_v50 = vld [vmem:[#allocation2 + $0x20] sm:$0xff]  ;;  %241 = vst.msk [vmem:[#allocation2 + $0x60] sm:$0xff] %vm49_vm0, %v224_v43  ;;  %v77_v43 = vld [vmem:[#allocation2 + $0x58] sm:$0xff] }
  0xa4   :  { %v272_v51 = vadd.f32 %v506_v39, %v252_v50  ;;  %230 = vst.msk [vmem:[#allocation2 + $0x8] sm:$0xff] %vm49_vm0, %v213_v46 }
  0xa5   :  { %v284_v52 = vmax.f32 %v268_v49, 0.0  ;;  %234 = vst.msk [vmem:[#allocation2 + $0x28] sm:$0xff] %vm49_vm0, %v217_v47  ;;  %v81_v47 = vld [vmem:[#allocation2 + $0x78] sm:$0xff] }
  0xa6   :  { %v288_v55 = vmax.f32 %v272_v51, 0.0 }
  0xa7   :  { %v300_v57 = vpack.c.bf16 %v284_v52, %v284_v52  ;;  %v194_v58 = vpop.f32.mrf.mxu2  ;;  %v204_v59 = vpop.f32.mrf.mxu3 }
  0xa8   :  { %v304_v61 = vpack.c.bf16 %v288_v55, %v288_v55  ;;  %v221_v62 = vadd.f32 %v194_v58, %v75_v53  ;;  %v225_v63 = vadd.f32 %v204_v59, %v79_v54  ;;  %v177_v0 = vpop.f32.mrf.mxu0  ;;  %v187_v1 = vpop.f32.mrf.mxu1 }
  0xa9   :  { %317 = vst.msk [vmem:[%s605_s3] sm:$0xf] %vm316_vm2, %v300_v57  ;;  %v256_v2 = vld [vmem:[#allocation2 + $0x40] sm:$0xff]  ;;  %v214_v3 = vadd.f32 %v177_v0, %v68_v56  ;;  %v218_v6 = vadd.f32 %v187_v1, %v72_v60 }
  0xaa   :  { %321 = vst.msk [vmem:[%s605_s3 + $0x10] sm:$0xf] %vm316_vm2, %v304_v61  ;;  %v276_v4 = vadd.f32 %v506_v39, %v256_v2  ;;  %v260_v5 = vld [vmem:[#allocation2 + $0x60] sm:$0xff] }
  0xab   :  { %v280_v7 = vadd.f32 %v506_v39, %v260_v5  ;;  %v249_v8 = vld [vmem:[#allocation2 + $0x8] sm:$0xff]  ;;  %238 = vst.msk [vmem:[#allocation2 + $0x48] sm:$0xff] %vm49_vm0, %v221_v62 }
  0xac   :  { %v292_v9 = vmax.f32 %v276_v4, 0.0  ;;  %v269_v10 = vadd.f32 %v506_v39, %v249_v8  ;;  %v253_v11 = vld [vmem:[#allocation2 + $0x28] sm:$0xff]  ;;  %242 = vst.msk [vmem:[#allocation2 + $0x68] sm:$0xff] %vm49_vm0, %v225_v63 }
  0xad   :  { %v296_v12 = vmax.f32 %v280_v7, 0.0  ;;  %v273_v13 = vadd.f32 %v506_v39, %v253_v11  ;;  %231 = vst.msk [vmem:[#allocation2 + $0x10] sm:$0xff] %vm49_vm0, %v214_v3 }
  0xae   :  { %v308_v15 = vpack.c.bf16 %v292_v9, %v292_v9  ;;  %v285_v16 = vmax.f32 %v269_v10, 0.0  ;;  %235 = vst.msk [vmem:[#allocation2 + $0x30] sm:$0xff] %vm49_vm0, %v218_v6 }
  0xaf   :  { %v312_v18 = vpack.c.bf16 %v296_v12, %v296_v12  ;;  %v289_v19 = vmax.f32 %v273_v13, 0.0  ;;  %v197_v20 = vpop.f32.mrf.mxu2  ;;  %v207_v21 = vpop.f32.mrf.mxu3 }
  0xb0   :  { %325 = vst.msk [vmem:[%s605_s3 + $0x20] sm:$0xf] %vm316_vm2, %v308_v15  ;;  %v301_v23 = vpack.c.bf16 %v285_v16, %v285_v16  ;;  %v222_v24 = vadd.f32 %v197_v20, %v76_v14  ;;  %v179_v25 = vpop.f32.mrf.mxu0  ;;  %v189_v27 = vpop.f32.mrf.mxu1  ;;  %v226_v29 = vadd.f32 %v207_v21, %v80_v17 }
  0xb1   :  { %329 = vst.msk [vmem:[%s605_s3 + $0x30] sm:$0xf] %vm316_vm2, %v312_v18  ;;  %v305_v28 = vpack.c.bf16 %v289_v19, %v289_v19  ;;  %v215_v31 = vadd.f32 %v179_v25, %v69_v22  ;;  %v219_v34 = vadd.f32 %v189_v27, %v73_v26 }
  0xb2   :  { %318 = vst.msk [vmem:[%s605_s3 + $0x4] sm:$0xf] %vm316_vm2, %v301_v23  ;;  %v257_v30 = vld [vmem:[#allocation2 + $0x48] sm:$0xff] }
  0xb3   :  { %322 = vst.msk [vmem:[%s605_s3 + $0x14] sm:$0xf] %vm316_vm2, %v305_v28  ;;  %v277_v32 = vadd.f32 %v506_v39, %v257_v30  ;;  %v261_v33 = vld [vmem:[#allocation2 + $0x68] sm:$0xff] }
  0xb4   :  { %v281_v35 = vadd.f32 %v506_v39, %v261_v33  ;;  %v250_v36 = vld [vmem:[#allocation2 + $0x10] sm:$0xff]  ;;  %239 = vst.msk [vmem:[#allocation2 + $0x50] sm:$0xff] %vm49_vm0, %v222_v24 }
  0xb5   :  { %v293_v37 = vmax.f32 %v277_v32, 0.0  ;;  %v270_v38 = vadd.f32 %v506_v39, %v250_v36  ;;  %v254_v40 = vld [vmem:[#allocation2 + $0x30] sm:$0xff]  ;;  %243 = vst.msk [vmem:[#allocation2 + $0x70] sm:$0xff] %vm49_vm0, %v226_v29 }
  0xb6   :  { %v297_v41 = vmax.f32 %v281_v35, 0.0  ;;  %v274_v42 = vadd.f32 %v506_v39, %v254_v40  ;;  %232 = vst.msk [vmem:[#allocation2 + $0x18] sm:$0xff] %vm49_vm0, %v215_v31 }
  0xb7   :  { %v309_v44 = vpack.c.bf16 %v293_v37, %v293_v37  ;;  %v286_v45 = vmax.f32 %v270_v38, 0.0  ;;  %236 = vst.msk [vmem:[#allocation2 + $0x38] sm:$0xff] %vm49_vm0, %v219_v34  ;;  %v199_v46 = vpop.f32.mrf.mxu2  ;;  %v209_v48 = vpop.f32.mrf.mxu3 }
  0xb8   :  { %v313_v49 = vpack.c.bf16 %v297_v41, %v297_v41  ;;  %v290_v50 = vmax.f32 %v274_v42, 0.0  ;;  %v223_v52 = vadd.f32 %v199_v46, %v77_v43  ;;  %v227_v54 = vadd.f32 %v209_v48, %v81_v47 }
  0xb9   :  { %326 = vst.msk [vmem:[%s605_s3 + $0x24] sm:$0xf] %vm316_vm2, %v309_v44  ;;  %v302_v51 = vpack.c.bf16 %v286_v45, %v286_v45 }
  0xba   :  { %330 = vst.msk [vmem:[%s605_s3 + $0x34] sm:$0xf] %vm316_vm2, %v313_v49  ;;  %v306_v53 = vpack.c.bf16 %v290_v50, %v290_v50 }
  0xbb   :  { %319 = vst.msk [vmem:[%s605_s3 + $0x8] sm:$0xf] %vm316_vm2, %v302_v51  ;;  %v258_v55 = vld [vmem:[#allocation2 + $0x50] sm:$0xff] }
  0xbc   :  { %323 = vst.msk [vmem:[%s605_s3 + $0x18] sm:$0xf] %vm316_vm2, %v306_v53  ;;  %v278_v56 = vadd.f32 %v506_v39, %v258_v55  ;;  %v262_v57 = vld [vmem:[#allocation2 + $0x70] sm:$0xff] }
  0xbd   :  { %v282_v58 = vadd.f32 %v506_v39, %v262_v57  ;;  %v251_v59 = vld [vmem:[#allocation2 + $0x18] sm:$0xff]  ;;  %240 = vst.msk [vmem:[#allocation2 + $0x58] sm:$0xff] %vm49_vm0, %v223_v52 }
  0xbe   :  { %v294_v60 = vmax.f32 %v278_v56, 0.0  ;;  %v271_v61 = vadd.f32 %v506_v39, %v251_v59  ;;  %v255_v62 = vld [vmem:[#allocation2 + $0x38] sm:$0xff]  ;;  %244 = vst.msk [vmem:[#allocation2 + $0x78] sm:$0xff] %vm49_vm0, %v227_v54 }
  0xbf   :  { %v298_v63 = vmax.f32 %v282_v58, 0.0  ;;  %v275_v0 = vadd.f32 %v506_v39, %v255_v62 }
  0xc0   :  { %v310_v1 = vpack.c.bf16 %v294_v60, %v294_v60  ;;  %v287_v2 = vmax.f32 %v271_v61, 0.0 }
  0xc1   :  { %v314_v3 = vpack.c.bf16 %v298_v63, %v298_v63  ;;  %v291_v4 = vmax.f32 %v275_v0, 0.0 }
  0xc2   :  { %327 = vst.msk [vmem:[%s605_s3 + $0x28] sm:$0xf] %vm316_vm2, %v310_v1  ;;  %v303_v5 = vpack.c.bf16 %v287_v2, %v287_v2 }
  0xc3   :  { %331 = vst.msk [vmem:[%s605_s3 + $0x38] sm:$0xf] %vm316_vm2, %v314_v3  ;;  %v307_v6 = vpack.c.bf16 %v291_v4, %v291_v4 }
  0xc4   :  { %320 = vst.msk [vmem:[%s605_s3 + $0xc] sm:$0xf] %vm316_vm2, %v303_v5  ;;  %v259_v7 = vld [vmem:[#allocation2 + $0x58] sm:$0xff] }
  0xc5   :  { %324 = vst.msk [vmem:[%s605_s3 + $0x1c] sm:$0xf] %vm316_vm2, %v307_v6  ;;  %v279_v8 = vadd.f32 %v506_v39, %v259_v7  ;;  %v263_v9 = vld [vmem:[#allocation2 + $0x78] sm:$0xff] }
  0xc6   :  { %v283_v10 = vadd.f32 %v506_v39, %v263_v9 }
  0xc7   :  { %v295_v11 = vmax.f32 %v279_v8, 0.0 }
  0xc8   :  { %v299_v12 = vmax.f32 %v283_v10, 0.0 }
  0xc9   :  { %v311_v13 = vpack.c.bf16 %v295_v11, %v295_v11 }
  0xca   :  { %v315_v14 = vpack.c.bf16 %v299_v12, %v299_v12 }
  0xcb   :  { %328 = vst.msk [vmem:[%s605_s3 + $0x2c] sm:$0xf] %vm316_vm2, %v311_v13 }
  0xcc   :  { %332 = vst.msk [vmem:[%s605_s3 + $0x3c] sm:$0xf] %vm316_vm2, %v315_v14 }
  0xcd   :  { %337 = vsyncpa [#allocation4], 1 }
  0xce   :  { %338 = vsyncpa [#allocation6], 1 }

// kernel: bottleneck_forward.6
= control target key start
LH: loop header
LB: loop body
LE: loop exit
PB: predicated region body
PF: predicated region fallthrough
CT: control target
= control target key end

     0   :  { %11 = vsyncpa [#allocation3], 0  ;;  %s1229_s18 = smov 0   ;;  %s1479_s0 = inlined_call_operand.vmem [shape: bf16[2,64,16], index: 0, kind: input, shape index: {}]   ;;  %s1480_s1 = inlined_call_operand.vmem [shape: bf16[16,9], index: 1, kind: input, shape index: {}]   ;;  %s1481_s2 = inlined_call_operand.hbm [shape: bf16[8,16], index: 2, kind: input, shape index: {}]   ;;  %s1482_s3 = inlined_call_operand.vmem [shape: bf16[16,16], index: 3, kind: input, shape index: {}]   ;;  %s1483_s4 = inlined_call_operand.vmem [shape: f32[2,1,16], index: 4, kind: output, shape index: {0}]   ;;  %s1484_s5 = inlined_call_operand.vmem [shape: f32[2,64,1], index: 5, kind: output, shape index: {1}]  }
   0x1 LB: > { %s996_s19 = sadd.s32 4294967295, %s1192_s18   ;;  %p998_p0 = scmp.ge.s32.totalorder %s1192_s18, 1  ;;  %s1192_s18 = sphi %s1229_s18, %s17_s18  }
   0x2   : > { %p163_p1 = scmp.lt.s32.totalorder %s1192_s18, 3  ;;  %s178_s22 = sshll.u32 %s1481_s2, 4  ;;  %s179_s22 = int_to_ptr.hbm [resolvable:$true] %s178_s22 }
   0x3   : > { %p1060_p3 = scmp.eq.s32.totalorder %s996_s19, 0  ;;  %s1194_s23 = smov [#allocation2]  }
   0x4   : > { %p164_p2 = pnand %p998_p0, %p163_p1  ;;  %s180_s24 = sshll.u32 %s1194_s23, 4  ;;  %s181_s24 = int_to_ptr.vmem [resolvable:$true] %s180_s24 }
   0x6   : > { %p1056_p4 = pneg %p164_p2  ;;  %204 = sbr.rel (%p164_p2) target bundleno = 1227 (0x4cb), region = 36 }
   0x8   : > { %p1057_p5 = pnand %p1060_p3, %p1056_p4 }
   0xa   : > { %1059 = dma.hbm_to_vmem [thread:$0]  (!%p1057_p5), %s179_s22, 64, %s181_s24, [#allocation3]  }
   0xb   : > { %1187 = dma.done.wait (%p1060_p3), [#allocation3], 64  }
   0xc   : > { %1189 = vsyncadd (%p1060_p3), [#allocation3], 4294967232  ;;  %p236_p6 = scmp.lt.s32.totalorder %s996_s19, 1  ;;  %v1048_v0 = vld [vmem:[%s1480_s1] sm:$0xff]  ;;  %vm286_vm0 = vcmask 130048   ;;  %vm328_vm1 = vcmask 72768  }
   0xd   : > { %1050 = vmatpush.bf16.msra.mxu3 %v1048_v0  ;;  %306 = vmatpush.bf16.msra.mxu0 %v1048_v0  ;;  %v1195_v19 = vmov 8   ;;  %vm479_vm2 = vcmask 1043456   ;;  %vm452_vm3 = vcmask 64512   ;;  %vm515_vm7 = vcmask 122880   ;;  %s1197_s11 = smov 8   ;;  %s1198_s12 = smov 120  }
   0xe   : > { %s1496_s19 = smov (!%p236_p6, %s996_s19), 1  ;;  %1077 = vset.pattern.permute.xlu2 %v1195_v19  ;;  %1076 = vset.pattern.permute.xlu1 %v1195_v19  ;;  %vm895_vm10 = vcmask 7168  }
   0xf   : > { %s1042_s25 = sshll.u32 %s1496_s19, 5  ;;  %1075 = vset.pattern.permute.xlu0 %v1195_v19  ;;  %s243_s10 = scalar_lea.vmem %s1483_s4, %s1496_s19 }
  0x10   : > { %s1246_s28 = scalar_lea.vmem %s1479_s0, %s1042_s25  ;;  %s1043_s13 = sshll.u32 %s1496_s19, 6 }
  0x11   : > { %v1045_v1 = vld [vmem:[%s1246_s28 + $0x8] sm:$0xff]  ;;  %v1044_v2 = vld [vmem:[%s1246_s28] sm:$0xff]  ;;  %v1046_v3 = vld [vmem:[%s1246_s28 + $0x10] sm:$0xff]  ;;  %s1417_s16 = scalar_lea.vmem %s1484_s5, %s1043_s13 }
  0x12   : > { %1028 = vmatmul.msk.bf16.vlgmr.msra.gmra.mxu3 %vm286_vm0, %v1045_v1  ;;  %1027 = vmatmul.msk.bf16.vlgmr.msra.gmra.mxu0 %vm286_vm0, %v1044_v2  ;;  %v1047_v4 = vld [vmem:[%s1246_s28 + $0x18] sm:$0xff] }
  0x22   : > { %1029 = vmatmul.msk.bf16.gmra.mxu3 %vm286_vm0, %v1046_v3 }
  0x32   : > { %1030 = vmatmul.msk.bf16.gmra.mxu3 %vm286_vm0, %v1047_v4 }
  0x8f   : > { %v1265_v8 = vpop.f32.mrf.mxu0 }
  0x90   : > { %v329_v14 = vsel %vm328_vm1, %v1265_v8, -inf }
  0x95   : > { %v1259_v5 = vpop.f32.mrf.mxu3 }
  0x96   : > { %v331_v20 = vsel %vm328_vm1, %v1259_v5, -inf }
  0x97   : > { %v1271_v11 = vpop.f32.mrf.mxu0 }
  0x98   : > { %v330_v12 = vsel %vm328_vm1, %v1271_v11, -inf }
  0x9d   : > { %v1261_v6 = vpop.f32.mrf.mxu3 }
  0x9e   : > { %v332_v21 = vsel %vm328_vm1, %v1261_v6, -inf }
  0xa5   : > { %v1263_v7 = vpop.f32.mrf.mxu3 }
  0xa6   : > { %v333_v15 = vsel %vm328_vm1, %v1263_v7, -inf }
  0xa7   : > { %v334_v23 = vmax.f32 %v329_v14, %v333_v15 }
  0xad   : > { %v1267_v9 = vpop.f32.mrf.mxu3 }
  0xae   : > { %v335_v13 = vsel %vm328_vm1, %v1267_v9, -inf }
  0xaf   : > { %v336_v17 = vmax.f32 %v330_v12, %v335_v13 }
  0xb1   : > { %v341_v26 = vmax.f32 %v334_v23, %v336_v17 }
  0xb5   : > { %v1269_v10 = vpop.f32.mrf.mxu3 }
  0xb6   : > { %v337_v16 = vsel %vm328_vm1, %v1269_v10, -inf }
  0xb7   : > { %v338_v24 = vmax.f32 %v331_v20, %v337_v16 }
  0xbd   : > { %v1283_v18 = vpop.f32.mrf.mxu3 }
  0xbe   : > { %v339_v22 = vsel %vm328_vm1, %v1283_v18, -inf }
  0xbf   : > { %v340_v25 = vmax.f32 %v332_v21, %v339_v22 }
  0xc1   : > { %v342_v27 = vmax.f32 %v338_v24, %v340_v25 }
  0xc3   : > { %v343_v28 = vmax.f32 %v341_v26, %v342_v27 }
  0xc5   : > { %v344_v29 = vrot.slane %v343_v28, 4 }
  0xc7   : > { %v345_v30 = vmax.f32 %v343_v28, %v344_v29 }
  0xc9   : > { %v346_v31 = vrot.slane %v345_v30, 2 }
  0xcb   : > { %v347_v32 = vmax.f32 %v345_v30, %v346_v31 }
  0xcd   : > { %v348_v33 = vrot.slane %v347_v32, 1 }
  0xcf   : > { %v349_v34 = vmax.f32 %v347_v32, %v348_v33  ;;  %v475_v33 = vld [vmem:[#allocation2] sm:$0xf] }
  0xd1   : > { %v350_v35 = vsub.f32 %v1265_v8, %v349_v34  ;;  %v351_v36 = vsub.f32 %v1271_v11, %v349_v34  ;;  %v352_v37 = vsub.f32 %v1259_v5, %v349_v34  ;;  %v353_v38 = vsub.f32 %v1261_v6, %v349_v34 }
  0xd2   : > { %v354_v39 = vsub.f32 %v1263_v7, %v349_v34  ;;  %v355_v43 = vsub.f32 %v1267_v9, %v349_v34  ;;  %v356_v45 = vsub.f32 %v1269_v10, %v349_v34  ;;  %v357_v47 = vsub.f32 %v1283_v18, %v349_v34 }
  0xd3   : > { %v358_v40 = vmul.f32 1.442695, %v350_v35  ;;  %v360_v41 = vmul.f32 1.442695, %v351_v36  ;;  %v362_v42 = vmul.f32 1.442695, %v352_v37 }
  0xd4   : > { %v364_v44 = vmul.f32 1.442695, %v353_v38  ;;  %v366_v46 = vmul.f32 1.442695, %v354_v39  ;;  %v368_v48 = vmul.f32 1.442695, %v355_v43 }
  0xd5   : > { %1078 = vpow2.f32 %v358_v40  ;;  %v370_v49 = vmul.f32 1.442695, %v356_v45  ;;  %v372_v52 = vmul.f32 1.442695, %v357_v47  ;;  %v481_v34 = vsel %vm479_vm2, %v475_v33, 0 }
  0xd6   : > { %1080 = vpow2.f32 %v360_v41  ;;  %490 = vmatpush.bf16.msra.mxu1 %v481_v34 }
  0xd7   : > { %1082 = vpow2.f32 %v362_v42 }
  0xd8   : > { %1084 = vpow2.f32 %v364_v44 }
  0xd9   : > { %1086 = vpow2.f32 %v366_v46 }
  0xda   : > { %1088 = vpow2.f32 %v368_v48 }
  0xdb   : > { %v1079_v50 = vpop.eup %1078  ;;  %1090 = vpow2.f32 %v370_v49 }
  0xdc   : > { %v1081_v51 = vpop.eup %1080  ;;  %v374_v53 = vsel %vm328_vm1, %v1079_v50, 0.0  ;;  %1092 = vpow2.f32 %v372_v52 }
  0xdd   : > { %v1083_v54 = vpop.eup %1082  ;;  %v375_v55 = vsel %vm328_vm1, %v1081_v51, 0.0 }
  0xde   : > { %v1085_v56 = vpop.eup %1084  ;;  %v376_v57 = vadd.f32 %v375_v55, %v374_v53  ;;  %v377_v58 = vsel %vm328_vm1, %v1083_v54, 0.0 }
  0xdf   : > { %v1087_v59 = vpop.eup %1086  ;;  %v379_v61 = vsel %vm328_vm1, %v1085_v56, 0.0 }
  0xe0   : > { %v378_v60 = vadd.f32 %v377_v58, %v376_v57  ;;  %v1089_v62 = vpop.eup %1088  ;;  %v381_v0 = vsel %vm328_vm1, %v1087_v59, 0.0 }
  0xe1   : > { %v1091_v1 = vpop.eup %1090  ;;  %v383_v3 = vsel %vm328_vm1, %v1089_v62, 0.0 }
  0xe2   : > { %v380_v63 = vadd.f32 %v379_v61, %v378_v60  ;;  %v1093_v4 = vpop.eup %1092  ;;  %v385_v13 = vsel %vm328_vm1, %v1091_v1, 0.0 }
  0xe3   : > { %v387_v15 = vsel %vm328_vm1, %v1093_v4, 0.0 }
  0xe4   : > { %v382_v2 = vadd.f32 %v381_v0, %v380_v63 }
  0xe6   : > { %v384_v12 = vadd.f32 %v383_v3, %v382_v2 }
  0xe8   : > { %v386_v14 = vadd.f32 %v385_v13, %v384_v12 }
  0xea   : > { %v388_v16 = vadd.f32 %v387_v15, %v386_v14 }
  0xec   : > { %v389_v17 = vrot.slane %v388_v16, 4 }
  0xee   : > { %v390_v19 = vadd.f32 %v389_v17, %v388_v16 }
  0xf0   : > { %v391_v20 = vrot.slane %v390_v19, 2 }
  0xf2   : > { %v392_v21 = vadd.f32 %v391_v20, %v390_v19 }
  0xf4   : > { %v393_v22 = vrot.slane %v392_v21, 1 }
  0xf6   : > { %v394_v23 = vadd.f32 %v393_v22, %v392_v21  ;;  %v250_v22 = vld [vmem:[%s1246_s28] sm:$0xff]  }
  0xf8   : > { %1094 = vrcp.f32 %v394_v23  ;;  %v252_v23 = vld [vmem:[%s1246_s28 + $0x8] sm:$0xff]  }
  0xfe   : > { %v1095_v24 = vpop.eup %1094 }
  0xff   : > { %v400_v25 = vmul.f32 %v1095_v24, %v1087_v59  ;;  %v398_v26 = vmul.f32 %v1095_v24, %v1083_v54  ;;  %v396_v27 = vmul.f32 %v1095_v24, %v1079_v50  ;;  %v401_v28 = vmul.f32 %v1095_v24, %v1089_v62 }
 0x100   : > { %v399_v29 = vmul.f32 %v1095_v24, %v1085_v56  ;;  %v397_v30 = vmul.f32 %v1095_v24, %v1081_v51  ;;  %v403_v31 = vmul.f32 %v1095_v24, %v1093_v4  ;;  %v402_v32 = vmul.f32 %v1095_v24, %v1091_v1 }
 0x101   : > { %426 = vperm.xlu2 %1077, %v400_v25   ;;  %416 = vperm.xlu1 %1076, %v398_v26   ;;  %v517_v26 = vunpack.c.l.bf16 %v250_v22 }
 0x102   : > { %406 = vperm.xlu0 %1075, %v396_v27   ;;  %v518_v27 = vunpack.c.h.bf16 %v250_v22 }
 0x109   : > { %431 = vperm.xlu2 %1077, %v401_v28   ;;  %421 = vperm.xlu1 %1076, %v399_v29   ;;  %v519_v29 = vunpack.c.l.bf16 %v252_v23 }
 0x10a   : > { %411 = vperm.xlu0 %1075, %v397_v30   ;;  %v520_v30 = vunpack.c.h.bf16 %v252_v23 }
 0x111   : > { %441 = vperm.xlu1 %1076, %v403_v31  }
 0x112   : > { %436 = vperm.xlu0 %1075, %v402_v32  }
 0x15b   : > { %v427_v37 = vpop.permute.xlu2 %426 }
 0x15c   : > { %v448_v48 = vmul.f32 %v427_v37, %v1263_v7 }
 0x15e   : > { %v460_v53 = vsel %vm452_vm3, %v448_v48, 0.0 }
 0x163   : > { %v432_v46 = vpop.permute.xlu2 %431 }
 0x164   : > { %v449_v50 = vmul.f32 %v432_v46, %v1267_v9 }
 0x166   : > { %v462_v55 = vsel %vm452_vm3, %v449_v50, 0.0 }
 0x173   : > { %v417_v35 = vpop.permute.xlu1 %416 }
 0x174   : > { %v407_v36 = vpop.permute.xlu0 %406  ;;  %v446_v41 = vmul.f32 %v417_v35, %v1259_v5 }
 0x175   : > { %v444_v38 = vmul.f32 %v407_v36, %v1265_v8 }
 0x176   : > { %v456_v49 = vsel %vm452_vm3, %v446_v41, 0.0 }
 0x177   : > { %v453_v43 = vsel %vm452_vm3, %v444_v38, 0.0 }
 0x17b   : > { %v422_v39 = vpop.permute.xlu1 %421 }
 0x17c   : > { %v412_v40 = vpop.permute.xlu0 %411  ;;  %v447_v44 = vmul.f32 %v422_v39, %v1261_v6  ;;  %v254_v39 = vld [vmem:[%s1246_s28 + $0x10] sm:$0xff]  }
 0x17d   : > { %v445_v42 = vmul.f32 %v412_v40, %v1271_v11  ;;  %v521_v40 = vunpack.c.l.bf16 %v254_v39  ;;  %v522_v41 = vunpack.c.h.bf16 %v254_v39 }
 0x17e   : > { %v458_v5 = vsel %vm452_vm3, %v447_v44, 0.0 }
 0x17f   : > { %v454_v45 = vsel %vm452_vm3, %v445_v42, 0.0 }
 0x180   : > { %v455_v47 = vadd.f32 %v454_v45, %v453_v43  ;;  %v256_v45 = vld [vmem:[%s1246_s28 + $0x18] sm:$0xff]  }
 0x181   : > { %v523_v46 = vunpack.c.l.bf16 %v256_v45 }
 0x182   : > { %v457_v8 = vadd.f32 %v456_v49, %v455_v47  ;;  %v524_v47 = vunpack.c.h.bf16 %v256_v45 }
 0x183   : > { %v442_v11 = vpop.permute.xlu1 %441 }
 0x184   : > { %v459_v51 = vadd.f32 %v458_v5, %v457_v8  ;;  %v437_v52 = vpop.permute.xlu0 %436  ;;  %v451_v56 = vmul.f32 %v442_v11, %v1283_v18 }
 0x185   : > { %v450_v6 = vmul.f32 %v437_v52, %v1269_v10  ;;  %v1049_v10 = vld [vmem:[%s1482_s3] sm:$0xff] }
 0x186   : > { %v461_v54 = vadd.f32 %v460_v53, %v459_v51  ;;  %v466_v9 = vsel %vm452_vm3, %v451_v56, 0.0  ;;  %565 = vmatpush.bf16.msrb.mxu0 %v1049_v10  ;;  %1051 = vmatpush.bf16.msra.mxu2 %v1049_v10  ;;  %v1196_v56 = vmov 64.0  }
 0x187   : > { %v464_v57 = vsel %vm452_vm3, %v450_v6, 0.0 }
 0x188   : > { %v463_v7 = vadd.f32 %v462_v55, %v461_v54 }
 0x18a   : > { %v465_v58 = vadd.f32 %v464_v57, %v463_v7 }
 0x18c   : > { %v467_v59 = vadd.f32 %v466_v9, %v465_v58 }
 0x18e   : > { %v468_v60 = vrot.slane %v467_v59, 4 }
 0x190   : > { %v469_v61 = vadd.f32 %v468_v60, %v467_v59 }
 0x192   : > { %v470_v62 = vrot.slane %v469_v61, 2 }
 0x194   : > { %v471_v63 = vadd.f32 %v470_v62, %v469_v61 }
 0x196   : > { %v472_v0 = vrot.slane %v471_v63, 1 }
 0x198   : > { %v473_v1 = vadd.f32 %v472_v0, %v471_v63 }
 0x19a   : > { %v474_v2 = vpack.c.bf16 %v473_v1, %v473_v1 }
 0x19c   : > { %1031 = vmatmul.msk.bf16.vlgmr.msra.gmra.mxu1 %vm452_vm3, %v474_v2 }
 0x219   : > { %v492_v18 = vpop.f32.mrf.mxu1 }
 0x21a   : > { %v496_v3 = vsub.f32 0.0, %v492_v18 }
 0x21c   : > { %v497_v4 = vmul.f32 1.442695, %v496_v3 }
 0x21e   : > { %1096 = vpow2.f32 %v497_v4 }
 0x221   : > { %v494_v12 = vpop.f32.mrf.mxu1 }
 0x224   : > { %v1097_v13 = vpop.eup %1096 }
 0x225   : > { %v499_v14 = vadd.f32 1.0, %v1097_v13 }
 0x227   : > { %1098 = vrcp.f32 %v499_v14  ;;  %v511_v19 = vand.u32 2147483648, %v499_v14  ;;  %v509_v21 = vand.u32 2147483647, %v499_v14  ;;  %vm505_vm5 = vweird.f32 %v499_v14 }
 0x228   : > { %1100 = vrcp.f32 %v1196_v56 }
 0x229   : > { %v512_v25 = vor.u32 1.1754944e-38, %v511_v19  ;;  %vm510_vm8 = vcmp.eq.f32.partialorder %v509_v21, 8.507059e+37 }
 0x22d   : > { %v1099_v15 = vpop.eup %1098 }
 0x22e   : > { %v501_v16 = vmul.f32 %v1099_v15, %v499_v14  ;;  %vm506_vm4 = vweird.f32 %v1099_v15  ;;  %v1101_v60 = vpop.eup %1100 }
 0x22f   : > { %vm507_vm6 = vmor %vm505_vm5, %vm506_vm4  ;;  %v609_v1 = vmul.f32 64.0, %v1101_v60  ;;  %vm613_vm9 = vweird.f32 %v1101_v60 }
 0x230   : > { %v502_v17 = vsub.f32 1.0, %v501_v16 }
 0x231   : > { %v610_v4 = vsub.f32 1.0, %v609_v1 }
 0x232   : > { %v503_v20 = vmul.f32 %v1099_v15, %v502_v17 }
 0x233   : > { %v611_v14 = vmul.f32 %v1101_v60, %v610_v4 }
 0x234   : > { %v504_v24 = vadd.f32 %v1099_v15, %v503_v20 }
 0x235   : > { %v612_v17 = vadd.f32 %v1101_v60, %v611_v14 }
 0x236   : > { %v508_v28 = vsel %vm507_vm6, %v1099_v15, %v504_v24 }
 0x237   : > { %v513_v31 = vsel %vm510_vm8, %v512_v25, %v508_v28  ;;  %v614_v21 = vsel %vm613_vm9, %v1101_v60, %v612_v17 }
 0x238   : > { %516 = vst.msk [vmem:[%s243_s10] sm:$0x1] %vm515_vm7, %v513_v31  ;;  %v525_v32 = vperm.slane %v513_v31, 0 }
 0x23a   : > { %v526_v33 = vmul.f32 %v525_v32, %v517_v26  ;;  %v527_v34 = vmul.f32 %v525_v32, %v518_v27  ;;  %v528_v35 = vmul.f32 %v525_v32, %v519_v29  ;;  %v529_v36 = vmul.f32 %v525_v32, %v520_v30 }
 0x23b   : > { %v530_v42 = vmul.f32 %v525_v32, %v521_v40  ;;  %v531_v43 = vmul.f32 %v525_v32, %v522_v41  ;;  %v532_v48 = vmul.f32 %v525_v32, %v523_v46  ;;  %v533_v49 = vmul.f32 %v525_v32, %v524_v47 }
 0x23c   : > { %v534_v37 = vpack.c.bf16 %v527_v34, %v526_v33  ;;  %v535_v38 = vpack.c.bf16 %v529_v36, %v528_v35 }
 0x23d   : > { %v536_v44 = vpack.c.bf16 %v531_v43, %v530_v42  ;;  %v537_v8 = vpack.c.bf16 %v533_v49, %v532_v48 }
 0x23e   : > { %1036 = vmatmul.msk.bf16.vlgmr.msrb.gmra.mxu0 %vm286_vm0, %v534_v37  ;;  %1037 = vmatmul.msk.bf16.vlgmr.msra.gmra.mxu2 %vm286_vm0, %v535_v38 }
 0x24e   : > { %1038 = vmatmul.msk.bf16.gmra.mxu2 %vm286_vm0, %v536_v44 }
 0x25e   : > { %1039 = vmatmul.msk.bf16.gmra.mxu2 %vm286_vm0, %v537_v8 }
 0x2bb   : > { %v567_v51 = vpop.f32.mrf.mxu0 }
 0x2bc   : > { %v587_v54 = vsel %vm452_vm3, %v567_v51, 0.0 }
 0x2c1   : > { %v572_v50 = vpop.f32.mrf.mxu2 }
 0x2c2   : > { %v590_v7 = vsel %vm452_vm3, %v572_v50, 0.0 }
 0x2c3   : > { %v569_v52 = vpop.f32.mrf.mxu0 }
 0x2c4   : > { %v588_v6 = vsel %vm452_vm3, %v569_v52, 0.0 }
 0x2c5   : > { %v589_v55 = vadd.f32 %v588_v6, %v587_v54 }
 0x2c7   : > { %v591_v58 = vadd.f32 %v590_v7, %v589_v55 }
 0x2c9   : > { %v574_v5 = vpop.f32.mrf.mxu2 }
 0x2ca   : > { %v592_v57 = vsel %vm452_vm3, %v574_v5, 0.0 }
 0x2cb   : > { %v593_v61 = vadd.f32 %v592_v57, %v591_v58 }
 0x2d1   : > { %v577_v11 = vpop.f32.mrf.mxu2 }
 0x2d2   : > { %v594_v59 = vsel %vm452_vm3, %v577_v11, 0.0 }
 0x2d3   : > { %v595_v63 = vadd.f32 %v594_v59, %v593_v61 }
 0x2d9   : > { %v579_v53 = vpop.f32.mrf.mxu2 }
 0x2da   : > { %v596_v62 = vsel %vm452_vm3, %v579_v53, 0.0 }
 0x2db   : > { %v597_v2 = vadd.f32 %v596_v62, %v595_v63 }
 0x2e1   : > { %v582_v9 = vpop.f32.mrf.mxu2 }
 0x2e2   : > { %v598_v0 = vsel %vm452_vm3, %v582_v9, 0.0 }
 0x2e3   : > { %v599_v10 = vadd.f32 %v598_v0, %v597_v2 }
 0x2e9   : > { %v584_v18 = vpop.f32.mrf.mxu2 }
 0x2ea   : > { %v600_v3 = vsel %vm452_vm3, %v584_v18, 0.0 }
 0x2eb   : > { %v601_v12 = vadd.f32 %v600_v3, %v599_v10 }
 0x2ed   : > { %v602_v13 = vrot.slane %v601_v12, 4 }
 0x2ef   : > { %v603_v15 = vadd.f32 %v602_v13, %v601_v12 }
 0x2f1   : > { %v604_v16 = vrot.slane %v603_v15, 2 }
 0x2f3   : > { %v605_v19 = vadd.f32 %v604_v16, %v603_v15 }
 0x2f5   : > { %v606_v20 = vrot.slane %v605_v19, 1 }
 0x2f7   : > { %v607_v22 = vadd.f32 %v606_v20, %v605_v19 }
 0x2f9   : > { %v615_v23 = vmul.f32 %v614_v21, %v607_v22 }
 0x2fb   : > { %617 = vrot.lane.b32.xlu2 %v615_v23, %s1197_s11 }
 0x355   : > { %v618_v24 = vpop.permute.xlu2 %617 }
 0x356   : > { %v622_v25 = vmul.f32 %v618_v24, %v572_v50  ;;  %v621_v26 = vmul.f32 %v618_v24, %v569_v52  ;;  %v620_v27 = vmul.f32 %v618_v24, %v567_v51  ;;  %v625_v28 = vmul.f32 %v618_v24, %v579_v53 }
 0x357   : > { %v624_v29 = vmul.f32 %v618_v24, %v577_v11  ;;  %v623_v30 = vmul.f32 %v618_v24, %v574_v5  ;;  %v627_v31 = vmul.f32 %v618_v24, %v584_v18  ;;  %v626_v32 = vmul.f32 %v618_v24, %v582_v9 }
 0x358   : > { %640 = vrot.lane.b32.xlu2 %v622_v25, %s1198_s12  ;;  %638 = vrot.lane.b32.xlu1 %v621_v26, %s1198_s12 }
 0x359   : > { %636 = vrot.lane.b32.xlu0 %v620_v27, %s1198_s12 }
 0x360   : > { %646 = vrot.lane.b32.xlu2 %v625_v28, %s1198_s12  ;;  %644 = vrot.lane.b32.xlu1 %v624_v29, %s1198_s12 }
 0x361   : > { %642 = vrot.lane.b32.xlu0 %v623_v30, %s1198_s12 }
 0x368   : > { %650 = vrot.lane.b32.xlu1 %v627_v31, %s1198_s12 }
 0x369   : > { %648 = vrot.lane.b32.xlu0 %v626_v32, %s1198_s12 }
 0x3b2   : > { %v641_v33 = vpop.permute.xlu2 %640 }
 0x3b3   : > { %v666_v34 = vsel %vm452_vm3, %v641_v33, 0.0 }
 0x3b4   : > { %667 = vadd.xlane.f32.xlu1 %v666_v34 }
 0x3ba   : > { %v647_v39 = vpop.permute.xlu2 %646 }
 0x3bb   : > { %v675_v41 = vsel %vm452_vm3, %v647_v39, 0.0 }
 0x3ca   : > { %v639_v35 = vpop.permute.xlu1 %638 }
 0x3cb   : > { %v637_v36 = vpop.permute.xlu0 %636  ;;  %v663_v37 = vsel %vm452_vm3, %v639_v35, 0.0 }
 0x3cc   : > { %664 = vadd.xlane.f32.xlu0 %v663_v37  ;;  %v660_v38 = vsel %vm452_vm3, %v637_v36, 0.0 }
 0x3cd   : > { %661 = vadd.xlane.f32.xlu2 %v660_v38 }
 0x3d2   : > { %v645_v43 = vpop.permute.xlu1 %644 }
 0x3d3   : > { %v643_v40 = vpop.permute.xlu0 %642  ;;  %v672_v45 = vsel %vm452_vm3, %v645_v43, 0.0 }
 0x3d4   : > { %676 = vadd.xlane.f32.xlu0 %v675_v41  ;;  %v669_v42 = vsel %vm452_vm3, %v643_v40, 0.0 }
 0x3d5   : > { %670 = vadd.xlane.f32.xlu2 %v669_v42 }
 0x3da   : > { %v651_v47 = vpop.permute.xlu1 %650 }
 0x3db   : > { %v649_v44 = vpop.permute.xlu0 %648  ;;  %v681_v48 = vsel %vm452_vm3, %v651_v47, 0.0 }
 0x3dc   : > { %v678_v46 = vsel %vm452_vm3, %v649_v44, 0.0 }
 0x3dd   : > { %673 = vadd.xlane.f32.xlu2 %v672_v45  ;;  %679 = vadd.xlane.f32.xlu1 %v678_v46 }
 0x3e5   : > { %682 = vadd.xlane.f32.xlu2 %v681_v48 }
 0x427   : > { %v668_v5 = vpop.xlane.xlu1 %667 }
 0x43f   : > { %v665_v50 = vpop.xlane.xlu0 %664 }
 0x440   : > { %v662_v49 = vpop.xlane.xlu2 %661 }
 0x447   : > { %v677_v11 = vpop.xlane.xlu0 %676 }
 0x448   : > { %v671_v8 = vpop.xlane.xlu2 %670  ;;  %v685_v54 = vmax.f32 %v665_v50, %v677_v11 }
 0x450   : > { %v674_v51 = vpop.xlane.xlu2 %673  ;;  %v680_v52 = vpop.xlane.xlu1 %679 }
 0x451   : > { %v684_v53 = vmax.f32 %v662_v49, %v674_v51  ;;  %v686_v55 = vmax.f32 %v668_v5, %v680_v52 }
 0x453   : > { %v688_v7 = vmax.f32 %v684_v53, %v685_v54 }
 0x458   : > { %v683_v6 = vpop.xlane.xlu2 %682 }
 0x459   : > { %v687_v56 = vmax.f32 %v671_v8, %v683_v6 }
 0x45b   : > { %v689_v57 = vmax.f32 %v686_v55, %v687_v56 }
 0x45d   : > { %v690_v58 = vmax.f32 %v688_v7, %v689_v57 }
 0x45f   : > { %v691_v9 = vrot.slane %v690_v58, 4 }
 0x461   : > { %v692_v59 = vmax.f32 %v690_v58, %v691_v9 }
 0x463   : > { %v693_v60 = vrot.slane %v692_v59, 2 }
 0x465   : > { %v694_v61 = vmax.f32 %v692_v59, %v693_v60 }
 0x467   : > { %v695_v62 = vrot.slane %v694_v61, 1 }
 0x469   : > { %v696_v63 = vmax.f32 %v694_v61, %v695_v62 }
 0x46b   : > { %v697_v0 = vsub.f32 %v662_v49, %v696_v63  ;;  %v698_v1 = vsub.f32 %v665_v50, %v696_v63  ;;  %v699_v2 = vsub.f32 %v668_v5, %v696_v63  ;;  %v700_v10 = vsub.f32 %v671_v8, %v696_v63 }
 0x46c   : > { %v701_v4 = vsub.f32 %v674_v51, %v696_v63  ;;  %v702_v13 = vsub.f32 %v677_v11, %v696_v63  ;;  %v703_v15 = vsub.f32 %v680_v52, %v696_v63  ;;  %v704_v17 = vsub.f32 %v683_v6, %v696_v63 }
 0x46d   : > { %v705_v18 = vmul.f32 1.442695, %v697_v0  ;;  %v707_v3 = vmul.f32 1.442695, %v698_v1  ;;  %v709_v12 = vmul.f32 1.442695, %v699_v2 }
 0x46e   : > { %v711_v14 = vmul.f32 1.442695, %v700_v10  ;;  %v713_v16 = vmul.f32 1.442695, %v701_v4  ;;  %v715_v19 = vmul.f32 1.442695, %v702_v13 }
 0x46f   : > { %1102 = vpow2.f32 %v705_v18  ;;  %v717_v22 = vmul.f32 1.442695, %v703_v15  ;;  %v719_v25 = vmul.f32 1.442695, %v704_v17 }
 0x470   : > { %1104 = vpow2.f32 %v707_v3 }
 0x471   : > { %1106 = vpow2.f32 %v709_v12 }
 0x472   : > { %1108 = vpow2.f32 %v711_v14 }
 0x473   : > { %1110 = vpow2.f32 %v713_v16 }
 0x474   : > { %1112 = vpow2.f32 %v715_v19 }
 0x475   : > { %v1103_v20 = vpop.eup %1102  ;;  %1114 = vpow2.f32 %v717_v22 }
 0x476   : > { %v1105_v21 = vpop.eup %1104  ;;  %1116 = vpow2.f32 %v719_v25 }
 0x477   : > { %v721_v23 = vadd.f32 %v1105_v21, %v1103_v20  ;;  %v1107_v24 = vpop.eup %1106 }
 0x478   : > { %v1109_v27 = vpop.eup %1108 }
 0x479   : > { %v722_v26 = vadd.f32 %v1107_v24, %v721_v23  ;;  %v1111_v29 = vpop.eup %1110 }
 0x47a   : > { %v1113_v31 = vpop.eup %1112 }
 0x47b   : > { %v723_v28 = vadd.f32 %v1109_v27, %v722_v26  ;;  %v1115_v33 = vpop.eup %1114 }
 0x47c   : > { %v1117_v35 = vpop.eup %1116 }
 0x47d   : > { %v724_v30 = vadd.f32 %v1111_v29, %v723_v28 }
 0x47f   : > { %v725_v32 = vadd.f32 %v1113_v31, %v724_v30 }
 0x481   : > { %v726_v34 = vadd.f32 %v1115_v33, %v725_v32 }
 0x483   : > { %v727_v36 = vadd.f32 %v1117_v35, %v726_v34 }
 0x485   : > { %v728_v37 = vrot.slane %v727_v36, 4 }
 0x487   : > { %v729_v38 = vadd.f32 %v728_v37, %v727_v36 }
 0x489   : > { %v730_v39 = vrot.slane %v729_v38, 2 }
 0x48b   : > { %v731_v40 = vadd.f32 %v730_v39, %v729_v38 }
 0x48d   : > { %v732_v41 = vrot.slane %v731_v40, 1 }
 0x48f   : > { %v733_v42 = vadd.f32 %v732_v41, %v731_v40 }
 0x491   : > { %1118 = vrcp.f32 %v733_v42 }
 0x497   : > { %v1119_v43 = vpop.eup %1118 }
 0x498   : > { %v735_v44 = vmul.f32 %v1119_v43, %v1103_v20  ;;  %v736_v45 = vmul.f32 %v1119_v43, %v1105_v21  ;;  %v737_v46 = vmul.f32 %v1119_v43, %v1107_v24  ;;  %v738_v47 = vmul.f32 %v1119_v43, %v1109_v27 }
 0x499   : > { %v739_v48 = vmul.f32 %v1119_v43, %v1111_v29  ;;  %v740_v49 = vmul.f32 %v1119_v43, %v1113_v31  ;;  %v741_v8 = vmul.f32 %v1119_v43, %v1115_v33  ;;  %v742_v50 = vmul.f32 %v1119_v43, %v1117_v35 }
 0x49a   : > { %v743_v5 = vsub.f32 0.0, %v735_v44  ;;  %v744_v51 = vsub.f32 0.0, %v736_v45  ;;  %v745_v11 = vsub.f32 0.0, %v737_v46  ;;  %v746_v52 = vsub.f32 0.0, %v738_v47 }
 0x49b   : > { %v747_v53 = vsub.f32 0.0, %v739_v48  ;;  %v748_v6 = vsub.f32 0.0, %v740_v49  ;;  %v749_v7 = vsub.f32 0.0, %v741_v8  ;;  %v750_v58 = vsub.f32 0.0, %v742_v50 }
 0x49c   : > { %v751_v54 = vmul.f32 1.442695, %v743_v5  ;;  %v753_v55 = vmul.f32 1.442695, %v744_v51  ;;  %v755_v56 = vmul.f32 1.442695, %v745_v11 }
 0x49d   : > { %v757_v57 = vmul.f32 1.442695, %v746_v52  ;;  %v759_v9 = vmul.f32 1.442695, %v747_v53  ;;  %v761_v59 = vmul.f32 1.442695, %v748_v6 }
 0x49e   : > { %1120 = vpow2.f32 %v751_v54  ;;  %v763_v60 = vmul.f32 1.442695, %v749_v7  ;;  %v765_v61 = vmul.f32 1.442695, %v750_v58 }
 0x49f   : > { %1122 = vpow2.f32 %v753_v55 }
 0x4a0   : > { %1124 = vpow2.f32 %v755_v56 }
 0x4a1   : > { %1126 = vpow2.f32 %v757_v57 }
 0x4a2   : > { %1128 = vpow2.f32 %v759_v9 }
 0x4a3   : > { %1130 = vpow2.f32 %v761_v59 }
 0x4a4   : > { %v1121_v62 = vpop.eup %1120  ;;  %1132 = vpow2.f32 %v763_v60 }
 0x4a5   : > { %v1123_v63 = vpop.eup %1122  ;;  %v1355_v0 = vadd.f32 1.0, %v1121_v62  ;;  %1134 = vpow2.f32 %v765_v61 }
 0x4a6   : > { %v1125_v1 = vpop.eup %1124  ;;  %v1357_v2 = vadd.f32 1.0, %v1123_v63 }
 0x4a7   : > { %v1127_v10 = vpop.eup %1126  ;;  %v1359_v18 = vadd.f32 1.0, %v1125_v1  ;;  %1136 = vrcp.f32 %v1355_v0  ;;  %v784_v14 = vand.u32 2147483647, %v1355_v0  ;;  %v786_v15 = vand.u32 2147483648, %v1355_v0 }
 0x4a8   : > { %v1129_v3 = vpop.eup %1128  ;;  %v1362_v4 = vadd.f32 1.0, %v1127_v10  ;;  %1138 = vrcp.f32 %v1357_v2  ;;  %v799_v17 = vand.u32 2147483647, %v1357_v2  ;;  %v801_v21 = vand.u32 2147483648, %v1357_v2 }
 0x4a9   : > { %v1131_v12 = vpop.eup %1130  ;;  %v1365_v13 = vadd.f32 1.0, %v1129_v3  ;;  %1140 = vrcp.f32 %v1359_v18  ;;  %vm780_vm11 = vweird.f32 %v1355_v0  ;;  %vm795_vm12 = vweird.f32 %v1357_v2 }
 0x4aa   : > { %v1133_v16 = vpop.eup %1132  ;;  %v1371_v20 = vadd.f32 1.0, %v1131_v12  ;;  %1142 = vrcp.f32 %v1362_v4  ;;  %v814_v23 = vand.u32 2147483647, %v1359_v18  ;;  %vm1380_vm13 = vcmp.eq.f32.partialorder %v784_v14, 8.507059e+37 }
 0x4ab   : > { %v1135_v19 = vpop.eup %1134  ;;  %1144 = vrcp.f32 %v1365_v13  ;;  %v787_v27 = vor.u32 1.1754944e-38, %v786_v15  ;;  %v816_v28 = vand.u32 2147483648, %v1359_v18  ;;  %v1385_v29 = vadd.f32 1.0, %v1133_v16 }
 0x4ac   : > { %vm1388_vm14 = vcmp.eq.f32.partialorder %v799_v17, 8.507059e+37  ;;  %vm810_vm15 = vweird.f32 %v1359_v18  ;;  %v829_v32 = vand.u32 2147483647, %v1362_v4  ;;  %v1394_v34 = vadd.f32 1.0, %v1135_v19 }
 0x4ad   : > { %v1137_v22 = vpop.eup %1136  ;;  %v802_v36 = vor.u32 1.1754944e-38, %v801_v21  ;;  %1146 = vrcp.f32 %v1371_v20  ;;  %vm1398_vm1 = vcmp.eq.f32.partialorder %v814_v23, 8.507059e+37  ;;  %vm825_vm2 = vweird.f32 %v1362_v4 }
 0x4ae   : > { %v1139_v24 = vpop.eup %1138  ;;  %v776_v25 = vmul.f32 %v1137_v22, %v1355_v0  ;;  %vm781_vm0 = vweird.f32 %v1137_v22  ;;  %v831_v40 = vand.u32 2147483648, %v1362_v4  ;;  %v817_v43 = vor.u32 1.1754944e-38, %v816_v28 }
 0x4af   : > { %v791_v30 = vmul.f32 %v1139_v24, %v1357_v2  ;;  %v1141_v33 = vpop.eup %1140  ;;  %vm796_vm3 = vweird.f32 %v1139_v24  ;;  %vm840_vm4 = vweird.f32 %v1365_v13  ;;  %vm1407_vm5 = vcmp.eq.f32.partialorder %v829_v32, 8.507059e+37  ;;  %vm782_vm6 = vmor %vm780_vm11, %vm781_vm0 }
 0x4b0   : > { %v777_v35 = vsub.f32 1.0, %v776_v25  ;;  %v806_v38 = vmul.f32 %v1141_v33, %v1359_v18  ;;  %v1143_v41 = vpop.eup %1142  ;;  %v844_v50 = vand.u32 2147483647, %v1365_v13  ;;  %v846_v5 = vand.u32 2147483648, %v1365_v13  ;;  %vm797_vm8 = vmor %vm795_vm12, %vm796_vm3 }
 0x4b1   : > { %v792_v37 = vsub.f32 1.0, %v791_v30  ;;  %v1145_v44 = vpop.eup %1144  ;;  %v821_v47 = vmul.f32 %v1143_v41, %v1362_v4  ;;  %vm811_vm7 = vweird.f32 %v1141_v33  ;;  %vm826_vm9 = vweird.f32 %v1143_v41 }
 0x4b2   : > { %v778_v42 = vmul.f32 %v1137_v22, %v777_v35  ;;  %v807_v46 = vsub.f32 1.0, %v806_v38  ;;  %v836_v8 = vmul.f32 %v1145_v44, %v1365_v13  ;;  %1148 = vrcp.f32 %v1385_v29  ;;  %vm812_vm11 = vmor %vm810_vm15, %vm811_vm7 }
 0x4b3   : > { %v793_v45 = vmul.f32 %v1139_v24, %v792_v37  ;;  %v822_v52 = vsub.f32 1.0, %v821_v47  ;;  %v1147_v53 = vpop.eup %1146  ;;  %vm841_vm0 = vweird.f32 %v1145_v44  ;;  %v832_v62 = vor.u32 1.1754944e-38, %v831_v40 }
 0x4b4   : > { %v779_v49 = vadd.f32 %v1137_v22, %v778_v42  ;;  %v808_v11 = vmul.f32 %v1141_v33, %v807_v46  ;;  %v837_v54 = vsub.f32 1.0, %v836_v8  ;;  %v851_v59 = vmul.f32 %v1147_v53, %v1371_v20 }
 0x4b5   : > { %v794_v51 = vadd.f32 %v1139_v24, %v793_v45  ;;  %v823_v57 = vmul.f32 %v1143_v41, %v822_v52  ;;  %vm1435_vm12 = vcmp.eq.f32.partialorder %v844_v50, 8.507059e+37  ;;  %v847_v2 = vor.u32 1.1754944e-38, %v846_v5 }
 0x4b6   : > { %v783_v6 = vsel %vm782_vm6, %v1137_v22, %v779_v49  ;;  %v809_v7 = vadd.f32 %v1141_v33, %v808_v11  ;;  %v838_v9 = vmul.f32 %v1145_v44, %v837_v54  ;;  %v852_v10 = vsub.f32 1.0, %v851_v59 }
 0x4b7   : > { %v788_v55 = vsel %vm1380_vm13, %v787_v27, %v783_v6  ;;  %v798_v56 = vsel %vm797_vm8, %v1139_v24, %v794_v51  ;;  %v824_v61 = vadd.f32 %v1143_v41, %v823_v57  ;;  %vm827_vm13 = vmor %vm825_vm2, %vm826_vm9  ;;  %v859_v3 = vand.u32 2147483647, %v1371_v20 }
 0x4b8   : > { %v803_v58 = vsel %vm1388_vm14, %v802_v36, %v798_v56  ;;  %896 = vst.msk [vmem:[%s1417_s16] sm:$0xff] %vm895_vm10, %v788_v55  ;;  %v813_v60 = vsel %vm812_vm11, %v1141_v33, %v809_v7  ;;  %v839_v1 = vadd.f32 %v1145_v44, %v838_v9  ;;  %vm842_vm14 = vmor %vm840_vm4, %vm841_vm0  ;;  %v861_v12 = vand.u32 2147483648, %v1371_v20  ;;  %v1149_v14 = vpop.eup %1148 }
 0x4b9   : > { %897 = vst.msk [vmem:[%s1417_s16 + $0x8] sm:$0xff] %vm895_vm10, %v803_v58  ;;  %v818_v0 = vsel %vm1398_vm1, %v817_v43, %v813_v60  ;;  %v828_v18 = vsel %vm827_vm13, %v1143_v41, %v824_v61  ;;  %1150 = vrcp.f32 %v1394_v34  ;;  %v853_v16 = vmul.f32 %v1147_v53, %v852_v10 }
 0x4ba   : > { %898 = vst.msk [vmem:[%s1417_s16 + $0x10] sm:$0xff] %vm895_vm10, %v818_v0  ;;  %v833_v4 = vsel %vm1407_vm5, %v832_v62, %v828_v18  ;;  %v843_v15 = vsel %vm842_vm14, %v1145_v44, %v839_v1  ;;  %vm856_vm15 = vweird.f32 %v1147_v53  ;;  %v866_v17 = vmul.f32 %v1149_v14, %v1385_v29 }
 0x4bb   : > { %v848_v13 = vsel %vm1435_vm12, %v847_v2, %v843_v15  ;;  %899 = vst.msk [vmem:[%s1417_s16 + $0x18] sm:$0xff] %vm895_vm10, %v833_v4  ;;  %v854_v19 = vadd.f32 %v1147_v53, %v853_v16  ;;  %vm855_vm1 = vweird.f32 %v1371_v20  ;;  %v862_v21 = vor.u32 1.1754944e-38, %v861_v12 }
 0x4bc   : > { %900 = vst.msk [vmem:[%s1417_s16 + $0x20] sm:$0xff] %vm895_vm10, %v848_v13  ;;  %vm857_vm2 = vmor %vm855_vm1, %vm856_vm15  ;;  %v867_v22 = vsub.f32 1.0, %v866_v17  ;;  %vm860_vm3 = vcmp.eq.f32.partialorder %v859_v3, 8.507059e+37  ;;  %v876_v24 = vand.u32 2147483648, %v1385_v29  ;;  %vm871_vm4 = vweird.f32 %v1149_v14 }
 0x4bd   : > { %v858_v23 = vsel %vm857_vm2, %v1147_v53, %v854_v19  ;;  %v874_v28 = vand.u32 2147483647, %v1385_v29  ;;  %vm870_vm5 = vweird.f32 %v1385_v29  ;;  %v891_v35 = vand.u32 2147483648, %v1394_v34 }
 0x4be   : > { %v863_v26 = vsel %vm860_vm3, %v862_v21, %v858_v23  ;;  %v868_v27 = vmul.f32 %v1149_v14, %v867_v22  ;;  %vm872_vm6 = vmor %vm870_vm5, %vm871_vm4  ;;  %v877_v31 = vor.u32 1.1754944e-38, %v876_v24  ;;  %v889_v38 = vand.u32 2147483647, %v1394_v34 }
 0x4bf   : > { %v1151_v25 = vpop.eup %1150  ;;  %901 = vst.msk [vmem:[%s1417_s16 + $0x28] sm:$0xff] %vm895_vm10, %v863_v26  ;;  %vm875_vm7 = vcmp.eq.f32.partialorder %v874_v28, 8.507059e+37  ;;  %vm885_vm9 = vweird.f32 %v1394_v34  ;;  %v892_v29 = vor.u32 1.1754944e-38, %v891_v35 }
 0x4c0   : > { %v881_v30 = vmul.f32 %v1151_v25, %v1394_v34  ;;  %v869_v20 = vadd.f32 %v1149_v14, %v868_v27  ;;  %vm886_vm8 = vweird.f32 %v1151_v25  ;;  %vm890_vm0 = vcmp.eq.f32.partialorder %v889_v38, 8.507059e+37 }
 0x4c1   : > { %vm887_vm11 = vmor %vm885_vm9, %vm886_vm8 }
 0x4c2   : > { %v882_v32 = vsub.f32 1.0, %v881_v30  ;;  %v873_v33 = vsel %vm872_vm6, %v1149_v14, %v869_v20 }
 0x4c3   : > { %v878_v36 = vsel %vm875_vm7, %v877_v31, %v873_v33 }
 0x4c4   : > { %v883_v37 = vmul.f32 %v1151_v25, %v882_v32  ;;  %902 = vst.msk [vmem:[%s1417_s16 + $0x30] sm:$0xff] %vm895_vm10, %v878_v36 }
 0x4c6   : > { %v884_v39 = vadd.f32 %v1151_v25, %v883_v37 }
 0x4c8   : > { %v888_v40 = vsel %vm887_vm11, %v1151_v25, %v884_v39 }
 0x4c9   : > { %v893_v41 = vsel %vm890_vm0, %v892_v29, %v888_v40 }
 0x4ca   : > { %903 = vst.msk [vmem:[%s1417_s16 + $0x38] sm:$0xff] %vm895_vm10, %v893_v41 }
 0x4cb PF: > { %s17_s18 = sadd.s32 1, %s1192_s18  }
 0x4cc   : > { %p14_p7 = scmp.ge.s32.totalorder %s17_s18, 4  }
 0x4ce   :  { %16 = sbr.rel (!%p14_p7) target bundleno = 1 (0x1), region = 83 }
 0x4d3   :  { %937 = vsyncpa [#allocation3], 1 }
 0x4d4   :  { %939 = vsyncpa [#allocation3 + $0x1], 1 }

// kernel: bottleneck_forward.7
= control target key start
LH: loop header
LB: loop body
LE: loop exit
PB: predicated region body
PF: predicated region fallthrough
CT: control target
= control target key end

     0   :  { %11 = vsyncpa [#allocation3], 0  ;;  %s1180_s0 = inlined_call_operand.vmem [shape: bf16[2,64,16], index: 0, kind: input, shape index: {}]   ;;  %s1181_s1 = inlined_call_operand.vmem [shape: f32[2,1,16], index: 1, kind: input, shape index: {}]   ;;  %s1182_s2 = inlined_call_operand.vmem [shape: f32[2,64,1], index: 2, kind: input, shape index: {}]   ;;  %s1183_s3 = inlined_call_operand.vmem [shape: bf16[16,64], index: 3, kind: input, shape index: {}]   ;;  %s1184_s4 = inlined_call_operand.vmem [shape: f32[1,64], index: 4, kind: input, shape index: {}]   ;;  %s1185_s5 = inlined_call_operand.vmem [shape: f32[2,64,64], index: 5, kind: input, shape index: {}]   ;;  %s1186_s6 = inlined_call_operand.hbm [shape: bf16[2,64,64], index: 6, kind: output, shape index: {}]  }
   0x1   :  { %13 = vsyncpa [#allocation3 + $0x1], 0  ;;  %s1022_s21 = smov 0   ;;  %s1024_s22 = smov 0  }
   0x2   :  { %s1026_s23 = smov 0   ;;  %s1028_s24 = smov 0  }
   0x3   :  { %s1030_s25 = smov 0   ;;  %s1032_s26 = smov 0  }
   0x4 LB: > { %s787_s27 = sadd.s32 4294967295, %s982_s26   ;;  %s788_s28 = sadd.s32 4294967294, %s982_s26   ;;  %s982_s26 = sphi %s1032_s26, %s19_s26   ;;  %s978_s25 = sphi %s1030_s25, %s1193_s25   ;;  %s974_s24 = sphi %s1028_s24, %s1192_s24   ;;  %s970_s23 = sphi %s1026_s23, %s1191_s23   ;;  %s966_s22 = sphi %s1024_s22, %s1190_s22   ;;  %s962_s21 = sphi %s1022_s21, %s1189_s21  }
   0x5   : > { %s38_s29 = sadd.s32 1, %s978_s25  ;;  %s213_s30 = sadd.s32 1, %s970_s23 }
   0x6   : > { %p40_p0 = scmp.ge.s32.totalorder %s38_s29, 2  ;;  %p223_p1 = scmp.ne.s32.totalorder %s970_s23, %s966_s22 }
   0x7   : > { %p224_p2 = scmp.eq.s32.totalorder %s787_s27, 1  ;;  %p229_p3 = scmp.ne.s32.totalorder %s966_s22, %s962_s21 }
   0x8   : > { %s1195_s29 = smov (%p40_p0, %s38_s29), 0  ;;  %p230_p5 = scmp.eq.s32.totalorder %s788_s28, 1 }
   0x9   : > { %p1062_p4 = por %p224_p2, %p223_p1  ;;  %s206_s8 = ssub.s32 %s978_s25, %s1195_s29 }
   0xa   : > { %p793_p6 = scmp.ge.s32.totalorder %s982_s26, 1  ;;  %p211_p7 = scmp.eq.s32.totalorder %s206_s8, 0 }
   0xb   : > { %p1069_p8 = por %p230_p5, %p229_p3  ;;  %p309_p9 = scmp.lt.s32.totalorder %s982_s26, 3 }
   0xc   : > { %s1075_s10 = scalar_select %p211_p7, %s970_s23, %s213_s30  }
   0xd   : > { %p310_p10 = pnand %p793_p6, %p309_p9 }
   0xe   : > { %p375_p11 = scmp.lt.s32.totalorder (!%p310_p10), %s974_s24, 1  ;;  %s924_s17 = scalar_lea.hbm (!%p310_p10), %s1186_s6, 64 }
   0xf   : > { %313 = sbr.rel (%p310_p10) target bundleno = 306 (0x132), region = 44 }
  0x14   : > { %v984_v0 = vmov 0   ;;  %s1079_s11 = scalar_select %p375_p11, %s974_s24, 1  ;;  %v817_v25 = vld [vmem:[%s1183_s3] sm:$0xff]  ;;  %vm527_vm0 = vcmask 130048   ;;  %vm601_vm1 = vcmask 519168  }
  0x15   : > { %900 = vset.pattern.permute.xlu1 %v984_v0  ;;  %899 = vset.pattern.permute.xlu0 %v984_v0  ;;  %v903_v59 = vld [vmem:[%s1184_s4] ss:$0 sm:$0xff] }
  0x16   : > { %901 = vset.pattern.permute.xlu2 %v984_v0  ;;  %s815_s12 = sshll.u32 %s1079_s11, 6  ;;  %s386_s15 = scalar_lea.vmem %s1181_s1, %s1079_s11  ;;  %547 = vmatpush.bf16.msra.mxu0 %v817_v25 }
  0x17   : > { %s395_s18 = scalar_lea.vmem %s1182_s2, %s815_s12  ;;  %s814_s19 = sshll.u32 %s1079_s11, 5  ;;  %v902_v10 = vld [vmem:[%s386_s15] ss:$0 sm:$0xff]  ;;  %839 = vmatpush.bf16.msra.mxu2 %v817_v25  ;;  %840 = vmatpush.bf16.msra.mxu3 %v817_v25 }
  0x18   : > { %v461_v1 = vld [vmem:[%s395_s18 + $0x30] sm:$0xff]  ;;  %v459_v2 = vld [vmem:[%s395_s18 + $0x20] sm:$0xff]  ;;  %v462_v4 = vld [vmem:[%s395_s18 + $0x38] sm:$0xff]  ;;  %s382_s28 = scalar_lea.vmem %s1180_s0, %s814_s19  ;;  %838 = vmatpush.bf16.msra.mxu1 %v817_v25  ;;  %s1107_s15 = scalar_lea.vmem %s1185_s5, %s815_s12 }
  0x19   : > { %495 = vperm.xlu1 %900, %v461_v1   ;;  %485 = vperm.xlu0 %899, %v459_v2   ;;  %v455_v3 = vld [vmem:[%s395_s18] sm:$0xff]  ;;  %v460_v5 = vld [vmem:[%s395_s18 + $0x28] sm:$0xff]  ;;  %v458_v7 = vld [vmem:[%s395_s18 + $0x18] sm:$0xff]  ;;  %s818_s12 = sshll.u32 %s974_s24, 5 }
  0x1a   : > { %465 = vperm.xlu2 %901, %v455_v3   ;;  %v456_v6 = vld [vmem:[%s395_s18 + $0x8] sm:$0xff]  ;;  %v457_v8 = vld [vmem:[%s395_s18 + $0x10] sm:$0xff]  ;;  %v820_v9 = vld [vmem:[%s382_s28] sm:$0xff]   ;;  %s371_s18 = sand.u32 1, %s966_s22  }
  0x1b   : > { %v821_v11 = vunpack.c.l.bf16 %v820_v9  ;;  %v837_v14 = vld [vmem:[%s382_s28 + $0x18] sm:$0xff]   ;;  %v836_v15 = vld [vmem:[%s382_s28 + $0x10] sm:$0xff]   ;;  %v822_v18 = vunpack.c.h.bf16 %v820_v9  ;;  %v835_v33 = vld [vmem:[%s382_s28 + $0x8] sm:$0xff]   ;;  %s794_s19 = sshll.u32 %s371_s18, 5  ;;  %s625_s28 = scalar_lea.hbm %s1186_s6, %s818_s12 }
  0x1c   : > { %v833_v16 = vunpack.c.l.bf16 %v837_v14  ;;  %v829_v17 = vunpack.c.l.bf16 %v836_v15  ;;  %v834_v26 = vunpack.c.h.bf16 %v837_v14  ;;  %v830_v27 = vunpack.c.h.bf16 %v836_v15  ;;  %v569_v61 = vld [vmem:[%s1107_s15] sm:$0xff]  ;;  %v570_v3 = vld [vmem:[%s1107_s15 + $0x8] sm:$0xff]  ;;  %s1117_s11 = scalar_lea.vmem [#allocation2], %s794_s19  ;;  %v571_v15 = vld [vmem:[%s1107_s15 + $0x10] sm:$0xff]  ;;  %s628_s30 = sshll.u32 %s625_s28, 4  ;;  %s629_s30 = int_to_ptr.hbm [resolvable:$true] %s628_s30 }
  0x1d   : > { %v435_v12 = vmul.f32 2.0, %v821_v11  ;;  %v436_v21 = vmul.f32 2.0, %v822_v18  ;;  %v826_v34 = vunpack.c.h.bf16 %v835_v33  ;;  %v825_v35 = vunpack.c.l.bf16 %v835_v33  ;;  %v573_v9 = vld [vmem:[%s1107_s15 + $0x20] sm:$0xff]  ;;  %v575_v11 = vld [vmem:[%s1107_s15 + $0x30] sm:$0xff]  ;;  %v572_v33 = vld [vmem:[%s1107_s15 + $0x18] sm:$0xff]  ;;  %s626_s24 = sshll.u32 %s1117_s11, 4  ;;  %s627_s24 = int_to_ptr.vmem [resolvable:$true] %s626_s24 }
  0x1e   : > { %v441_v19 = vmul.f32 2.0, %v833_v16  ;;  %v439_v20 = vmul.f32 2.0, %v829_v17  ;;  %v442_v28 = vmul.f32 2.0, %v834_v26  ;;  %v440_v29 = vmul.f32 2.0, %v830_v27  ;;  %v574_v26 = vld [vmem:[%s1107_s15 + $0x28] sm:$0xff]  ;;  %s611_s8 = scalar_lea.sflag [#allocation3], %s371_s18 }
  0x1f   : > { %v447_v13 = vmul.f32 %v902_v10, %v435_v12  ;;  %v448_v24 = vmul.f32 %v902_v10, %v436_v21  ;;  %v438_v36 = vmul.f32 2.0, %v826_v34  ;;  %v437_v37 = vmul.f32 2.0, %v825_v35  ;;  %s918_s13 = sshra.s32 %s629_s30, 4  ;;  %s919_s13 = int_to_ptr.hbm [resolvable:$true] %s918_s13 }
  0x20   : > { %v453_v22 = vmul.f32 %v902_v10, %v441_v19  ;;  %v451_v23 = vmul.f32 %v902_v10, %v439_v20  ;;  %v454_v30 = vmul.f32 %v902_v10, %v442_v28  ;;  %v452_v31 = vmul.f32 %v902_v10, %v440_v29  ;;  %v576_v28 = vld [vmem:[%s1107_s15 + $0x38] sm:$0xff]  ;;  %s920_s14 = scalar_lea.hbm %s919_s13, 32  ;;  %p925_p1 = scmp.lt.s32.totalorder %s919_s13, %s1186_s6 }
  0x21   : > { %500 = vperm.xlu1 %900, %v462_v4   ;;  %490 = vperm.xlu0 %899, %v460_v5   ;;  %v450_v38 = vmul.f32 %v902_v10, %v438_v36  ;;  %v449_v39 = vmul.f32 %v902_v10, %v437_v37  ;;  %p921_p12 = scmp.ne.s32.totalorder %s919_s13, %s920_s14  ;;  %p926_p2 = scmp.lt.s32.totalorder %s924_s17, %s920_s14 }
  0x22   : > { %470 = vperm.xlu2 %901, %v456_v6  }
  0x23   : > { %p922_p13 = pnand %p921_p12, %p1062_p4  ;;  %p927_p3 = por %p926_p2, %p925_p1 }
  0x25   : > { %p923_p0 = pneg %p922_p13 }
  0x27   : > { %p928_p5 = pnand %p927_p3, %p923_p0 }
  0x29   : > { %480 = vperm.xlu1 %900, %v458_v7   ;;  %475 = vperm.xlu0 %899, %v457_v8  }
  0x74   : > { %v466_v32 = vpop.permute.xlu2 %465 }
  0x75   : > { %v503_v40 = vmul.f32 %v466_v32, %v447_v13 }
  0x7c   : > { %v471_v41 = vpop.permute.xlu2 %470 }
  0x7d   : > { %v504_v42 = vmul.f32 %v471_v41, %v448_v24 }
  0x7f   : > { %v511_v43 = vpack.c.bf16 %v504_v42, %v503_v40 }
  0x81   : > { %805 = vmatmul.msk.bf16.vlgmr.msra.gmra.mxu0 %vm527_vm0, %v511_v43 }
  0x8b   : > { %v496_v44 = vpop.permute.xlu1 %495  ;;  %v486_v45 = vpop.permute.xlu0 %485 }
  0x8c   : > { %v509_v48 = vmul.f32 %v496_v44, %v453_v22  ;;  %v507_v49 = vmul.f32 %v486_v45, %v451_v23 }
  0x93   : > { %v501_v46 = vpop.permute.xlu1 %500  ;;  %v491_v47 = vpop.permute.xlu0 %490 }
  0x94   : > { %v510_v50 = vmul.f32 %v501_v46, %v454_v30  ;;  %v508_v51 = vmul.f32 %v491_v47, %v452_v31 }
  0x96   : > { %v514_v52 = vpack.c.bf16 %v510_v50, %v509_v48  ;;  %v513_v53 = vpack.c.bf16 %v508_v51, %v507_v49 }
  0x98   : > { %807 = vmatmul.msk.bf16.vlgmr.msra.gmra.mxu2 %vm527_vm0, %v513_v53  ;;  %808 = vmatmul.msk.bf16.vlgmr.msra.gmra.mxu3 %vm527_vm0, %v514_v52 }
  0x9b   : > { %v481_v54 = vpop.permute.xlu1 %480  ;;  %v476_v55 = vpop.permute.xlu0 %475 }
  0x9c   : > { %v506_v56 = vmul.f32 %v481_v54, %v450_v38  ;;  %v505_v57 = vmul.f32 %v476_v55, %v449_v39 }
  0x9e   : > { %v512_v58 = vpack.c.bf16 %v506_v56, %v505_v57 }
  0xa0   : > { %806 = vmatmul.msk.bf16.vlgmr.msra.gmra.mxu1 %vm527_vm0, %v512_v58 }
  0xfe   : > { %v549_v60 = vpop.f32.mrf.mxu0 }
  0xff   : > { %v550_v62 = vadd.f32 %v903_v59, %v549_v60 }
 0x101   : > { %v577_v63 = vadd.f32 %v569_v61, %v550_v62 }
 0x103   : > { %v585_v0 = vmax.f32 %v577_v63, 0.0 }
 0x105   : > { %v593_v1 = vpack.c.bf16 %v585_v0, %v585_v0 }
 0x106   : > { %v551_v2 = vpop.f32.mrf.mxu0 }
 0x107   : > { %602 = vst.msk [vmem:[%s1117_s11] sm:$0xf] %vm601_vm1, %v593_v1  ;;  %v552_v4 = vadd.f32 %v903_v59, %v551_v2 }
 0x109   : > { %v578_v5 = vadd.f32 %v570_v3, %v552_v4 }
 0x10b   : > { %v586_v6 = vmax.f32 %v578_v5, 0.0 }
 0x10d   : > { %v594_v7 = vpack.c.bf16 %v586_v6, %v586_v6 }
 0x10f   : > { %603 = vst.msk [vmem:[%s1117_s11 + $0x4] sm:$0xf] %vm601_vm1, %v594_v7 }
 0x11b   : > { %v559_v8 = vpop.f32.mrf.mxu2  ;;  %v564_v10 = vpop.f32.mrf.mxu3 }
 0x11c   : > { %v560_v12 = vadd.f32 %v903_v59, %v559_v8  ;;  %v565_v13 = vadd.f32 %v903_v59, %v564_v10 }
 0x11d   : > { %v554_v14 = vpop.f32.mrf.mxu1 }
 0x11e   : > { %v581_v16 = vadd.f32 %v573_v9, %v560_v12  ;;  %v583_v17 = vadd.f32 %v575_v11, %v565_v13  ;;  %v555_v18 = vadd.f32 %v903_v59, %v554_v14 }
 0x120   : > { %v589_v19 = vmax.f32 %v581_v16, 0.0  ;;  %v591_v20 = vmax.f32 %v583_v17, 0.0  ;;  %v579_v21 = vadd.f32 %v571_v15, %v555_v18 }
 0x122   : > { %v597_v22 = vpack.c.bf16 %v589_v19, %v589_v19  ;;  %v599_v23 = vpack.c.bf16 %v591_v20, %v591_v20  ;;  %v587_v24 = vmax.f32 %v579_v21, 0.0 }
 0x123   : > { %v561_v25 = vpop.f32.mrf.mxu2  ;;  %v566_v27 = vpop.f32.mrf.mxu3 }
 0x124   : > { %606 = vst.msk [vmem:[%s1117_s11 + $0x10] sm:$0xf] %vm601_vm1, %v597_v22  ;;  %v595_v29 = vpack.c.bf16 %v587_v24, %v587_v24  ;;  %v562_v30 = vadd.f32 %v903_v59, %v561_v25  ;;  %v567_v31 = vadd.f32 %v903_v59, %v566_v27 }
 0x125   : > { %608 = vst.msk [vmem:[%s1117_s11 + $0x18] sm:$0xf] %vm601_vm1, %v599_v23  ;;  %v556_v32 = vpop.f32.mrf.mxu1 }
 0x126   : > { %604 = vst.msk [vmem:[%s1117_s11 + $0x8] sm:$0xf] %vm601_vm1, %v595_v29  ;;  %v582_v34 = vadd.f32 %v574_v26, %v562_v30  ;;  %v584_v35 = vadd.f32 %v576_v28, %v567_v31  ;;  %v557_v36 = vadd.f32 %v903_v59, %v556_v32 }
 0x128   : > { %v590_v37 = vmax.f32 %v582_v34, 0.0  ;;  %v592_v38 = vmax.f32 %v584_v35, 0.0  ;;  %v580_v39 = vadd.f32 %v572_v33, %v557_v36 }
 0x12a   : > { %v598_v40 = vpack.c.bf16 %v590_v37, %v590_v37  ;;  %v600_v41 = vpack.c.bf16 %v592_v38, %v592_v38  ;;  %v588_v42 = vmax.f32 %v580_v39, 0.0 }
 0x12c   : > { %607 = vst.msk [vmem:[%s1117_s11 + $0x14] sm:$0xf] %vm601_vm1, %v598_v40  ;;  %v596_v43 = vpack.c.bf16 %v588_v42, %v588_v42 }
 0x12d   : > { %609 = vst.msk [vmem:[%s1117_s11 + $0x1c] sm:$0xf] %vm601_vm1, %v600_v41 }
 0x12e   : > { %605 = vst.msk [vmem:[%s1117_s11 + $0xc] sm:$0xf] %vm601_vm1, %v596_v43 }
 0x12f   : > { %931 = shalt.err (!%p928_p5)
}
 0x130   : > { %s985_s18 = smov 64   ;;  %s986_s11 = smov 4  }
 0x131   : > { %841 = dma.vmem_to_hbm [thread:$0]  (%p1062_p4), %s627_s24, 512, %s629_s30, %s611_s8, %s985_s18, %s985_s18, %s986_s11  }
 0x132 PF: > { %p847_p6 = scmp.ge.s32.totalorder %s982_s26, 2  ;;  %s643_s20 = sand.u32 1, %s962_s21  }
 0x133   : > { %s644_s27 = scalar_lea.sflag [#allocation3], %s643_s20 }
 0x134   : > { %p844_p7 = pnand %p847_p6, %p1069_p8 }
 0x136   : > { %p845_p9 = pneg %p844_p7 }
 0x138   : > { %957 = dma.done.wait (%p845_p9), %s644_s27, 512  }
 0x139   : > { %959 = vsyncadd (%p845_p9), %s644_s27, 4294966784  ;;  %s19_s26 = sadd.s32 1, %s982_s26   ;;  %s1189_s21 = smov %s966_s22 }
 0x13a   : > { %p16_p10 = scmp.ge.s32.totalorder %s19_s26, 4   ;;  %s1190_s22 = smov %s970_s23 }
 0x13b   : > { %s1191_s23 = smov %s1075_s10  ;;  %s1192_s24 = smov %s978_s25 }
 0x13c   : > { %s1193_s25 = smov %s1195_s29  ;;  %18 = sbr.rel (!%p16_p10) target bundleno = 4 (0x4), region = 94 }
 0x141   :  { %650 = vsyncpa [#allocation3], 1 }
 0x142   :  { %652 = vsyncpa [#allocation3 + $0x1], 1 }

// kernel: bottleneck_forward.5
= control target key start
LH: loop header
LB: loop body
LE: loop exit
PB: predicated region body
PF: predicated region fallthrough
CT: control target
= control target key end

     0   :  { %8 = vsyncpa [#allocation5], 0  ;;  %s2853_s0 = inlined_call_operand.vmem [shape: bf16[2,8,8,16], index: 0, kind: input, shape index: {}]   ;;  %s2854_s1 = inlined_call_operand.hbm [shape: bf16[3,3,16,16], index: 1, kind: input, shape index: {}]   ;;  %s2855_s2 = inlined_call_operand.hbm [shape: f32[1,16], index: 2, kind: input, shape index: {}]   ;;  %s2856_s3 = inlined_call_operand.vmem [shape: bf16[2,64,16], index: 3, kind: output, shape index: {}]  }
   0x1   :  { %9 = vsyncpa [#allocation7], 0  ;;  %s2444_s12 = smov 0   ;;  %s2446_s13 = smov 0  }
   0x2   :  { %s2448_s14 = smov 0  }
   0x3 LB: > { %s1929_s15 = sadd.s32 4294967295, %s2417_s14   ;;  %s27_s16 = sadd.s32 1, %s2413_s13  ;;  %s2417_s14 = sphi %s2448_s14, %s15_s14   ;;  %s2413_s13 = sphi %s2446_s13, %s2876_s13   ;;  %s2409_s12 = sphi %s2444_s12, %s2875_s12  }
   0x4   : > { %p29_p0 = scmp.ge.s32.totalorder %s27_s16, 2  ;;  %p1931_p1 = scmp.ge.s32.totalorder %s2417_s14, 1 }
   0x5   : > { %p138_p2 = scmp.lt.s32.totalorder %s2417_s14, 3  ;;  %p2469_p4 = scmp.eq.s32.totalorder %s1929_s15, 0 }
   0x6   : > { %s2878_s16 = smov (%p29_p0, %s27_s16), 0  ;;  %s151_s21 = sshll.u32 %s2854_s1, 4  ;;  %s152_s21 = int_to_ptr.hbm [resolvable:$true] %s151_s21 }
   0x7   : > { %p2465_p3 = pnand %p1931_p1, %p138_p2  ;;  %s2419_s22 = smov [#allocation4]  }
   0x8   : > { %s153_s23 = sshll.u32 %s2419_s22, 4  ;;  %s167_s26 = sshll.u32 %s2855_s2, 4  ;;  %s154_s23 = int_to_ptr.vmem [resolvable:$true] %s153_s23  ;;  %s168_s26 = int_to_ptr.hbm [resolvable:$true] %s167_s26 }
   0x9   : > { %p2279_p5 = pneg %p2465_p3  ;;  %s2420_s27 = smov 64  }
   0xa   : > { %s2421_s28 = smov 4   ;;  %s2422_s29 = smov [#allocation6]  }
   0xb   : > { %p2280_p6 = pnand %p2469_p4, %p2279_p5  ;;  %s169_s30 = sshll.u32 %s2422_s29, 4  ;;  %s170_s30 = int_to_ptr.vmem [resolvable:$true] %s169_s30 }
   0xc   : > { %190 = sbr.rel (%p2465_p3) target bundleno = 404 (0x194), region = 32 }
   0xd   : > { %2282 = dma.hbm_to_vmem [thread:$0]  (!%p2280_p6), %s152_s21, 1152, %s154_s23, [#allocation5], %s2420_s27, %s2420_s27, %s2421_s28  }
   0xe   : > { %2285 = dma.hbm_to_vmem [thread:$0]  (!%p2280_p6), %s168_s26, 16, %s170_s30, [#allocation7]  }
  0x11   : > { %2400 = dma.done.wait (%p2469_p4), [#allocation5], 1152  }
  0x12   : > { %2402 = vsyncadd (%p2469_p4), [#allocation5], 4294966144 }
  0x13   : > { %2404 = dma.done.wait (%p2469_p4), [#allocation7], 16  }
  0x14   : > { %2406 = vsyncadd (%p2469_p4), [#allocation7], 4294967280  ;;  %p223_p7 = scmp.lt.s32.totalorder %s2409_s12, 1  ;;  %vm237_vm0 = vcmask 125952   ;;  %v2423_v0 = vmov 0   ;;  %vm250_vm1 = vcmask 124928  }
  0x15   : > { %240 = vst.msk [vmem:[#allocation2 + $0x8] sm:$0xf] %vm237_vm0, %v2423_v0  ;;  %vm270_vm2 = vcmask 123904   ;;  %vm271_vm3 = vsmask.f32 1280  ;;  %vm289_vm4 = vcmask 125954  }
  0x16   : > { %s2880_s12 = smov (!%p223_p7, %s2409_s12), 1  ;;  %241 = vst.msk [vmem:[#allocation2 + $0xc] sm:$0xf] %vm237_vm0, %v2423_v0  ;;  %vm290_vm5 = vsmask.f32 7946  ;;  %v2219_v1 = vld [vmem:[#allocation4] sm:$0xff]  ;;  %vm2520_vm12 = vmand %vm270_vm2, %vm271_vm3 }
  0x17   : > { %s2212_s4 = sshll.u32 %s2880_s12, 5  ;;  %238 = vst.msk [vmem:[#allocation2] sm:$0xf] %vm237_vm0, %v2423_v0  ;;  %vm296_vm6 = vsmask.f32 2304  ;;  %vm314_vm9 = vcmask 125955   ;;  %2268 = vmatpush.bf16.msra.mxu1 %v2219_v1  ;;  %2269 = vmatpush.bf16.msra.mxu2 %v2219_v1  ;;  %vm2526_vm13 = vmand %vm289_vm4, %vm290_vm5 }
  0x18   : > { %s2509_s7 = scalar_lea.vmem %s2853_s0, %s2212_s4  ;;  %239 = vst.msk [vmem:[#allocation2 + $0x4] sm:$0xf] %vm237_vm0, %v2423_v0  ;;  %vm315_vm7 = vsmask.f32 7950  ;;  %vm321_vm8 = vsmask.f32 3328  ;;  %490 = vmatpush.bf16.msra.mxu0 %v2219_v1  ;;  %2270 = vmatpush.bf16.msra.mxu3 %v2219_v1  ;;  %vm2545_vm2 = vmand %vm250_vm1, %vm296_vm6  ;;  %s2803_s10 = scalar_lea.vmem %s2856_s3, %s2212_s4 }
  0x19   : > { %242 = vst.msk [vmem:[#allocation2 + $0x10] sm:$0xf] %vm237_vm0, %v2423_v0  ;;  %v252_v2 = vld [vmem:[%s2509_s7] sm:$0xf]  ;;  %v1942_v3 = vld [vmem:[%s2509_s7 + $0x4] sm:$0xf]  ;;  %vm2537_vm14 = vmand %vm314_vm9, %vm315_vm7 }
  0x1a   : > { %vm338_vm10 = vsmask.f32 7938  ;;  %v254_v4 = vshrl.u32 %v252_v2, 16  ;;  %v257_v5 = vshll.u32 %v252_v2, 16  ;;  %v279_v6 = vshrl.u32 %v1942_v3, 16  ;;  %v2231_v26 = vld [vmem:[#allocation4 + $0x10] sm:$0xff]  ;;  %vm2566_vm5 = vmand %vm237_vm0, %vm321_vm8 }
  0x1b   : > { %v282_v7 = vshll.u32 %v1942_v3, 16  ;;  %v1943_v9 = vld [vmem:[%s2509_s7 + $0x8] sm:$0xf]  ;;  %vm265_vm11 = vsmask.f32 7942  ;;  %vm264_vm15 = vcmask 125953   ;;  %781 = vmatpush.bf16.msrb.mxu2 %v2231_v26  ;;  %vm2572_vm6 = vmand %vm237_vm0, %vm338_vm10 }
  0x1c   : > { %v292_v8 = vld [vmem:[#allocation2 + $0x8] sm:$0xc]  ;;  %v256_v10 = vrot.slane %v254_v4, 6  ;;  %v259_v11 = vrot.slane %v257_v5, 7  ;;  %v281_v13 = vrot.slane %v279_v6, 5  ;;  %v304_v19 = vshll.u32 %v1943_v9, 16  ;;  %vm2581_vm7 = vmand %vm264_vm15, %vm265_vm11 }
  0x1d   : > { %v284_v14 = vrot.slane %v282_v7, 6  ;;  %v317_v15 = vld [vmem:[#allocation2 + $0xc] sm:$0x8]  ;;  %v273_v16 = vld [vmem:[#allocation2 + $0x8] sm:$0x3]  ;;  %v307_v20 = vshrl.u32 %v1943_v9, 16 }
  0x1e   : > { %v298_v18 = vld [vmem:[#allocation2 + $0xc] sm:$0x7]  ;;  %243 = vst.msk [vmem:[#allocation2 + $0x14] sm:$0xf] %vm237_vm0, %v2423_v0  ;;  %v2533_v22 = vor.u32 %v259_v11, %v256_v10  ;;  %v306_v29 = vrot.slane %v304_v19, 5  ;;  %vm343_vm3 = vcmask 122880  }
  0x1f   : > { %v1944_v21 = vld [vmem:[%s2509_s7 + $0xc] sm:$0xf]  ;;  %v285_v23 = vor.u32 %v284_v14, %v281_v13  ;;  %244 = vst.msk [vmem:[#allocation2 + $0x18] sm:$0xf] %vm237_vm0, %v2423_v0  ;;  %v309_v30 = vrot.slane %v307_v20, 4  ;;  %vm467_vm9 = vcmask 130048  }
  0x20   : > { %v329_v25 = vshrl.u32 %v1944_v21, 16  ;;  %v2225_v27 = vld [vmem:[#allocation4 + $0x8] sm:$0xff]  ;;  %245 = vst.msk [vmem:[#allocation2 + $0x1c] sm:$0xf] %vm237_vm0, %v2423_v0  ;;  %v332_v31 = vshll.u32 %v1944_v21, 16  ;;  %v261_v32 = vrot.slane %v2533_v22, 4  ;;  %v318_v36 = vsel %vm2537_vm14, %v306_v29, %v317_v15 }
  0x21   : > { %v286_v33 = vrot.slane %v285_v23, 4  ;;  %v293_v34 = vsel %vm2526_vm13, %v285_v23, %v292_v8  ;;  %246 = vst.msk [vmem:[#allocation2 + $0x20] sm:$0xf] %vm237_vm0, %v2423_v0  ;;  %642 = vmatpush.bf16.msrb.mxu1 %v2225_v27  ;;  %v310_v37 = vor.u32 %v309_v30, %v306_v29  ;;  %vm344_vm4 = vsmask.f32 256  ;;  %v2237_v14 = vld [vmem:[#allocation4 + $0x18] sm:$0xff] }
  0x22   : > { %v331_v35 = vrot.slane %v329_v25, 7  ;;  %294 = vst [vmem:[#allocation2 + $0x8] sm:$0xc] %v293_v34  ;;  %v1945_v38 = vld [vmem:[%s2509_s7 + $0x10] sm:$0xf]  ;;  %v274_v39 = vsel %vm2520_vm12, %v261_v32, %v273_v16  ;;  %vm2591_vm8 = vmand %vm343_vm3, %vm344_vm4  ;;  %919 = vmatpush.bf16.msrb.mxu3 %v2237_v14  ;;  %vm741_vm11 = vcmask 1046528  }
  0x23   : > { %v299_v40 = vsel %vm2545_vm2, %v286_v33, %v298_v18  ;;  %319 = vst [vmem:[#allocation2 + $0xc] sm:$0x8] %v318_v36  ;;  %v323_v41 = vld [vmem:[#allocation2 + $0x10] sm:$0xf]  ;;  %v1946_v42 = vld [vmem:[%s2509_s7 + $0x14] sm:$0xf] }
  0x24   : > { %275 = vst [vmem:[#allocation2 + $0x8] sm:$0x3] %v274_v39  ;;  %v311_v43 = vrot.slane %v310_v37, 4  ;;  %v334_v45 = vor.u32 %v332_v31, %v331_v35  ;;  %v267_v46 = vld [vmem:[#allocation2 + $0x4] sm:$0xe]  ;;  %v352_v47 = vshrl.u32 %v1945_v38, 16 }
  0x25   : > { %v355_v48 = vshll.u32 %v1945_v38, 16  ;;  %300 = vst [vmem:[#allocation2 + $0xc] sm:$0x7] %v299_v40  ;;  %v340_v50 = vld [vmem:[#allocation2 + $0x14] sm:$0xf]  ;;  %v371_v51 = vshrl.u32 %v1946_v42, 16  ;;  %v268_v4 = vsel %vm2581_vm7, %v2533_v22, %v267_v46 }
  0x26   : > { %v374_v52 = vshll.u32 %v1946_v42, 16  ;;  %v1947_v53 = vld [vmem:[%s2509_s7 + $0x18] sm:$0xf]  ;;  %247 = vst.msk [vmem:[#allocation2 + $0x24] sm:$0xf] %vm237_vm0, %v2423_v0  ;;  %v335_v55 = vrot.slane %v331_v35, 4  ;;  %v324_v58 = vsel %vm2566_vm5, %v311_v43, %v323_v41  ;;  %v341_v62 = vsel %vm2572_vm6, %v334_v45, %v340_v50 }
  0x27   : > { %v354_v56 = vrot.slane %v352_v47, 6  ;;  %v357_v57 = vrot.slane %v355_v48, 7  ;;  %248 = vst.msk [vmem:[#allocation2 + $0x28] sm:$0xf] %vm237_vm0, %v2423_v0  ;;  %v346_v60 = vld [vmem:[#allocation2 + $0x18] sm:$0x1] }
  0x28   : > { %v362_v61 = vld [vmem:[#allocation2 + $0x18] sm:$0xe]  ;;  %249 = vst.msk [vmem:[#allocation2 + $0x2c] sm:$0xf] %vm237_vm0, %v2423_v0  ;;  %v365_v1 = vld [vmem:[#allocation2 + $0x1c] sm:$0x3]  ;;  %v347_v7 = vsel %vm2591_vm8, %v335_v55, %v346_v60 }
  0x29   : > { %v358_v63 = vor.u32 %v357_v57, %v354_v56  ;;  %v373_v2 = vrot.slane %v371_v51, 5  ;;  %v376_v3 = vrot.slane %v374_v52, 6  ;;  %251 = vst.msk [vmem:[#allocation2 + $0x30] sm:$0x7] %vm250_vm1, %v2423_v0  ;;  %v381_v5 = vld [vmem:[#allocation2 + $0x1c] sm:$0xc] }
  0x2a   : > { %v384_v6 = vld [vmem:[#allocation2 + $0x20] sm:$0x7]  ;;  %325 = vst [vmem:[#allocation2 + $0x10] sm:$0xf] %v324_v58  ;;  %v390_v10 = vshll.u32 %v1947_v53, 16  ;;  %v393_v0 = vshrl.u32 %v1947_v53, 16 }
  0x2b   : > { %v359_v8 = vrot.slane %v358_v63, 4  ;;  %v377_v9 = vor.u32 %v376_v3, %v373_v2  ;;  %v400_v11 = vld [vmem:[#allocation2 + $0x20] sm:$0x8]  ;;  %342 = vst [vmem:[#allocation2 + $0x14] sm:$0xf] %v341_v62  ;;  %v363_v13 = vsel %vm2581_vm7, %v358_v63, %v362_v61  ;;  %v2249_v15 = vld [vmem:[#allocation4 + $0x28] sm:$0xff] }
  0x2c   : > { %v2215_v16 = vld [vmem:[#allocation2 + $0x8] sm:$0xff]  ;;  %269 = vst [vmem:[#allocation2 + $0x4] sm:$0xe] %v268_v4  ;;  %v392_v20 = vrot.slane %v390_v10, 5  ;;  %v395_v22 = vrot.slane %v393_v0, 4  ;;  %v2255_v33 = vld [vmem:[#allocation4 + $0x30] sm:$0xff] }
  0x2d   : > { %v366_v18 = vsel %vm2520_vm12, %v359_v8, %v365_v1  ;;  %v378_v19 = vrot.slane %v377_v9, 4  ;;  %348 = vst [vmem:[#allocation2 + $0x18] sm:$0x1] %v347_v7  ;;  %v382_v21 = vsel %vm2526_vm13, %v377_v9, %v381_v5  ;;  %1974 = vmatmul.msk.bf16.vlgmr.msra.gmra.mxu1 %vm467_vm9, %v2215_v16  ;;  %v2615_v25 = vld [vmem:[#allocation2 + $0x8] sm:$0xff]  ;;  %v403_v27 = vld [vmem:[#allocation2 + $0x24] sm:$0xf] }
  0x2e   : > { %364 = vst [vmem:[#allocation2 + $0x18] sm:$0xe] %v363_v13  ;;  %v396_v26 = vor.u32 %v395_v22, %v392_v20  ;;  %v401_v12 = vsel %vm2537_vm14, %v392_v20, %v400_v11  ;;  %1239 = vmatpush.bf16.msra.mxu1 %v2249_v15  ;;  %v578_v32 = vshll.u32 %v2615_v25, 16  ;;  %v2243_v35 = vld [vmem:[#allocation4 + $0x20] sm:$0xff]  ;;  %vm569_vm1 = vsmask.f32 7424 }
  0x2f   : > { %v385_v23 = vsel %vm2545_vm2, %v378_v19, %v384_v6  ;;  %367 = vst [vmem:[#allocation2 + $0x1c] sm:$0x3] %v366_v18  ;;  %1100 = vmatpush.bf16.msrb.mxu0 %v2243_v35  ;;  %v2261_v39 = vld [vmem:[#allocation4 + $0x38] sm:$0xff]  ;;  %v2238_v43 = vld [vmem:[#allocation2 + $0x4] sm:$0xf0]  ;;  %v582_v62 = vshrl.u32 %v2615_v25, 16 }
  0x30   : > { %383 = vst [vmem:[#allocation2 + $0x1c] sm:$0xc] %v382_v21  ;;  %v397_v17 = vrot.slane %v396_v26, 4  ;;  %v580_v37 = vrot.slane %v578_v32, 1  ;;  %v2232_v47 = vld [vmem:[#allocation2 + $0x4] sm:$0xf0] }
  0x31   : > { %386 = vst [vmem:[#allocation2 + $0x20] sm:$0x7] %v385_v23  ;;  %v2239_v44 = vld [vmem:[#allocation2 + $0xc] sm:$0xff]  ;;  %vm1018_vm10 = vsmask.f32 6400  ;;  %v2267_v3 = vld [vmem:[#allocation4 + $0x40] sm:$0xff] }
  0x32   : > { %v2216_v29 = vld [vmem:[#allocation2 + $0x10] sm:$0xff]  ;;  %402 = vst [vmem:[#allocation2 + $0x20] sm:$0x8] %v401_v12  ;;  %v404_v28 = vsel %vm2566_vm5, %v397_v17, %v403_v27  ;;  %v1028_v52 = vshrl.u32 %v2239_v44, 16  ;;  %v1031_v53 = vshll.u32 %v2239_v44, 16  ;;  %v584_v9 = vor.u32 %v582_v62, %v580_v37  ;;  %v2227_v11 = vld [vmem:[#allocation2 + $0x8] sm:$0xff] }
  0x33   : > { %v2214_v30 = vld [vmem:[#allocation2] sm:$0xff]  ;;  %1975 = vmatmul.msk.bf16.vlgmr.msra.gmra.mxu2 %vm467_vm9, %v2216_v29  ;;  %405 = vst [vmem:[#allocation2 + $0x24] sm:$0xf] %v404_v28  ;;  %v2627_v46 = vld [vmem:[#allocation2 + $0x10] sm:$0xff]  ;;  %v1948_v15 = vld [vmem:[%s2509_s7 + $0x1c] sm:$0xf] }
  0x34   : > { %v2220_v31 = vld [vmem:[#allocation2] sm:$0xff]  ;;  %1973 = vmatmul.msk.bf16.vlgmr.msra.gmra.mxu0 %vm467_vm9, %v2214_v30  ;;  %1377 = vmatpush.bf16.msra.mxu2 %v2255_v33  ;;  %v1030_v57 = vrot.slane %v1028_v52, 1  ;;  %v1033_v58 = vrot.slane %v1031_v53, 2  ;;  %v2233_v60 = vld [vmem:[#allocation2 + $0xc] sm:$0xff]  ;;  %v586_v63 = vshll.u32 %v2627_v46, 16  ;;  %v409_v16 = vshrl.u32 %v1948_v15, 16 }
  0x35   : > { %v571_v24 = vshrl.u32 %v2220_v31, 16  ;;  %v573_v34 = vshll.u32 %v2220_v31, 16  ;;  %v2067_v42 = vld [vmem:[#allocation2 + $0x4] sm:$0xe]  ;;  %v2009_v5 = vld [vmem:[#allocation2] sm:$0xe]  ;;  %1697 = vmatpush.bf16.msra.mxu0 %v2267_v3 }
  0x36   : > { %v2068_v45 = vor.u32 %v2238_v43, %v2067_v42  ;;  %v2038_v48 = vld [vmem:[#allocation2 + $0x4] sm:$0xe]  ;;  %v1034_v2 = vor.u32 %v1033_v58, %v1030_v57  ;;  %v881_v8 = vrot.slane %v2233_v60, 1  ;;  %v588_v10 = vrot.slane %v586_v63, 1  ;;  %v2240_v20 = vld [vmem:[#allocation2 + $0x14] sm:$0xff] }
  0x37   : > { %v575_v36 = vrot.slane %v573_v34, 1  ;;  %v2217_v54 = vld [vmem:[#allocation2 + $0x18] sm:$0xff]  ;;  %v2039_v61 = vor.u32 %v2232_v47, %v2038_v48  ;;  %v2226_v6 = vld [vmem:[#allocation2] sm:$0xf0]  ;;  %v743_v19 = vrot.slane %v2227_v11, 1  ;;  %v411_v21 = vrot.slane %v409_v16, 7 }
  0x38   : > { %v1020_v50 = vshrl.u32 %v2068_v45, 16  ;;  %v1023_v51 = vshll.u32 %v2068_v45, 16  ;;  %v2010_v13 = vor.u32 %v2226_v6, %v2009_v5  ;;  %v589_v14 = vsel %vm569_vm1, %v584_v9, %v588_v10  ;;  %v2223_v23 = vld [vmem:[#allocation2 + $0x18] sm:$0xff]  ;;  %v418_v30 = vld [vmem:[#allocation2 + $0x28] sm:$0xf] }
  0x39   : > { %v576_v38 = vor.u32 %v575_v36, %v571_v24  ;;  %v880_v7 = vrot.slane %v2039_v61, 1  ;;  %v412_v22 = vshll.u32 %v1948_v15, 16  ;;  %v1037_v25 = vshrl.u32 %v2240_v20, 16  ;;  %v2234_v31 = vld [vmem:[#allocation2 + $0x14] sm:$0xff]  ;;  %v2235_v48 = vld [vmem:[#allocation2 + $0x1c] sm:$0xff] }
  0x3a   : > { %v2218_v41 = vld [vmem:[#allocation2 + $0x20] sm:$0xff]  ;;  %v1022_v55 = vrot.slane %v1020_v50, 1  ;;  %v1025_v56 = vrot.slane %v1023_v51, 2  ;;  %v742_v18 = vrot.slane %v2010_v13, 1  ;;  %v1040_v26 = vshll.u32 %v2240_v20, 16  ;;  %v2229_v62 = vld [vmem:[#allocation2 + $0x18] sm:$0xff] }
  0x3b   : > { %v581_v40 = vsel %vm569_vm1, %v576_v38, %v580_v37  ;;  %1977 = vmatmul.msk.bf16.vlgmr.msra.gmra.mxu3 %vm467_vm9, %v2218_v41  ;;  %v882_v0 = vsel %vm741_vm11, %v880_v7, %v881_v8  ;;  %v414_v12 = vor.u32 %v412_v22, %v411_v21  ;;  %v1039_v17 = vrot.slane %v1037_v25, 1  ;;  %v2228_v38 = vld [vmem:[#allocation2 + $0x10] sm:$0xff]  ;;  %v2241_v41 = vld [vmem:[#allocation2 + $0x1c] sm:$0xff] }
  0x3c   : > { %1558 = vmatpush.bf16.msra.mxu3 %v2261_v39  ;;  %v1026_v1 = vor.u32 %v1025_v56, %v1022_v55  ;;  %v744_v27 = vsel %vm741_vm11, %v742_v18, %v743_v19  ;;  %v1042_v29 = vrot.slane %v1040_v26, 2  ;;  %v590_v28 = vshrl.u32 %v2627_v46, 16  ;;  %v2224_v42 = vld [vmem:[#allocation2 + $0x20] sm:$0xff]  ;;  %v421_v55 = vld [vmem:[#allocation2 + $0x2c] sm:$0x1] }
  0x3d   : > { %2002 = vmatmul.msk.bf16.vlgmr.msrb.gmra.mxu1 %vm467_vm9, %v581_v40  ;;  %v419_v32 = vsel %vm2572_vm6, %v414_v12, %v418_v30  ;;  %v594_v33 = vshll.u32 %v2223_v23, 16  ;;  %v883_v35 = vrot.slane %v2234_v31, 1  ;;  %v745_v40 = vrot.slane %v2228_v38, 1  ;;  %v2096_v30 = vld [vmem:[#allocation2 + $0x4] sm:$0xc] }
  0x3e   : > { %v1035_v4 = vsel %vm1018_vm10, %v1026_v1, %v1034_v2  ;;  %v1043_v24 = vor.u32 %v1042_v29, %v1039_v17  ;;  %420 = vst [vmem:[#allocation2 + $0x28] sm:$0xf] %v419_v32  ;;  %v592_v36 = vor.u32 %v590_v28, %v588_v10  ;;  %v1046_v43 = vshrl.u32 %v2241_v41, 16  ;;  %v2244_v31 = vld [vmem:[#allocation2 + $0x4] sm:$0xf0] }
  0x3f   : > { %v596_v37 = vrot.slane %v594_v33, 1  ;;  %v884_v39 = vsel %vm741_vm11, %v881_v8, %v883_v35  ;;  %v1049_v44 = vshll.u32 %v2241_v41, 16  ;;  %v746_v45 = vsel %vm741_vm11, %v743_v19, %v745_v40  ;;  %v2230_v19 = vld [vmem:[#allocation2 + $0x20] sm:$0xff] }
  0x40   : > { %v1044_v34 = vsel %vm1018_vm10, %v1034_v2, %v1043_v24  ;;  %v1048_v46 = vrot.slane %v1046_v43, 1  ;;  %v598_v50 = vshrl.u32 %v2223_v23, 16  ;;  %v602_v51 = vshll.u32 %v2224_v42, 16  ;;  %v2256_v43 = vld [vmem:[#allocation2 + $0x8] sm:$0xf0] }
  0x41   : > { %v597_v49 = vsel %vm569_vm1, %v592_v36, %v596_v37  ;;  %v1051_v47 = vrot.slane %v1049_v44, 2  ;;  %v415_v53 = vrot.slane %v411_v21, 4  ;;  %v885_v56 = vrot.slane %v2235_v48, 1 }
  0x42   : > { %v600_v58 = vor.u32 %v598_v50, %v596_v37  ;;  %v604_v60 = vrot.slane %v602_v51, 1  ;;  %v747_v3 = vrot.slane %v2229_v62, 1  ;;  %v606_v11 = vshrl.u32 %v2224_v42, 16  ;;  %v2154_v42 = vld [vmem:[#allocation2 + $0x8] sm:$0xc] }
  0x43   : > { %1976 = vmatmul.msk.bf16.gmra.mxu2 %vm467_vm9, %v2217_v54  ;;  %v1052_v52 = vor.u32 %v1051_v47, %v1048_v46  ;;  %v422_v57 = vsel %vm2591_vm8, %v415_v53, %v421_v55  ;;  %v886_v63 = vsel %vm741_vm11, %v883_v35, %v885_v56  ;;  %v749_v26 = vrot.slane %v2230_v19, 1  ;;  %v2245_v35 = vld [vmem:[#allocation2 + $0xc] sm:$0xff]  ;;  %v2183_v55 = vld [vmem:[#allocation2 + $0x8] sm:$0x8] }
  0x44   : > { %2089 = vmatmul.msk.bf16.vlgmr.msrb.gmra.mxu0 %vm467_vm9, %v1035_v4  ;;  %423 = vst [vmem:[#allocation2 + $0x2c] sm:$0x1] %v422_v57  ;;  %v605_v1 = vsel %vm569_vm1, %v600_v58, %v604_v60  ;;  %v748_v7 = vsel %vm741_vm11, %v745_v40, %v747_v3  ;;  %v608_v16 = vor.u32 %v606_v11, %v604_v60  ;;  %v1201_v41 = vrot.slane %v2245_v35, 2  ;;  %v2257_v46 = vld [vmem:[#allocation2 + $0x10] sm:$0xff] }
  0x45   : > { %v1053_v54 = vsel %vm1018_vm10, %v1043_v24, %v1052_v52  ;;  %v537_v61 = vld [vmem:[#allocation2 + $0x28] sm:$0x1]  ;;  %v750_v32 = vsel %vm741_vm11, %v747_v3, %v749_v26  ;;  %v2097_v36 = vor.u32 %v2244_v31, %v2096_v30  ;;  %vm1199_vm12 = vcmask 1045504   ;;  %v2263_v58 = vld [vmem:[#allocation2 + $0x10] sm:$0xff]  ;;  %v2259_v31 = vld [vmem:[#allocation2 + $0x20] sm:$0xff] }
  0x46   : > { %v562_v2 = vunpack.c.l.b16 %v537_v61  ;;  %v2242_v4 = vld [vmem:[#allocation2 + $0x24] sm:$0xff]  ;;  %v2155_v47 = vor.u32 %v2256_v43, %v2154_v42  ;;  %v1486_v53 = vshrl.u32 %v2257_v46, 16  ;;  %vm1657_vm13 = vcmask 1044480  }
  0x47   : > { %v1055_v6 = vshrl.u32 %v2242_v4, 16  ;;  %v1058_v59 = vshll.u32 %v2242_v4, 16  ;;  %v2236_v9 = vld [vmem:[#allocation2 + $0x24] sm:$0xff]  ;;  %v1200_v40 = vrot.slane %v2097_v36, 2  ;;  %v1659_v4 = vrot.slane %v2263_v58, 3 }
  0x48   : > { %v568_v5 = vpack.c.b16 %v562_v2, %v562_v2  ;;  %v709_v24 = vld [vmem:[#allocation2 + $0x28] sm:$0x1]  ;;  %v1478_v51 = vshrl.u32 %v2155_v47, 16  ;;  %v2246_v2 = vld [vmem:[#allocation2 + $0x14] sm:$0xff]  ;;  %vm1476_vm14 = vsmask.f32 5376 }
  0x49   : > { %v1057_v8 = vrot.slane %v1055_v6, 1  ;;  %v1060_v10 = vrot.slane %v1058_v59, 2  ;;  %v734_v38 = vunpack.c.l.b16 %v709_v24  ;;  %v1202_v48 = vsel %vm1199_vm12, %v1200_v40, %v1201_v41  ;;  %v2125_v6 = vld [vmem:[#allocation2 + $0x8] sm:$0xc]  ;;  %v2250_v59 = vld [vmem:[#allocation2 + $0x8] sm:$0xf0] }
  0x4a   : > { %v610_v13 = vshll.u32 %v568_v5, 16  ;;  %v1480_v61 = vrot.slane %v1478_v51, 2  ;;  %v2126_v11 = vor.u32 %v2250_v59, %v2125_v6  ;;  %v1504_v24 = vshrl.u32 %v2259_v31, 16  ;;  %v2265_v36 = vld [vmem:[#allocation2 + $0x20] sm:$0xff]  ;;  %v1444_v59 = vld [vmem:[#allocation2 + $0x30] sm:$0x7] }
  0x4b   : > { %2060 = vmatmul.msk.bf16.vlgmr.msrb.gmra.mxu3 %vm467_vm9, %v882_v0  ;;  %v1061_v0 = vor.u32 %v1060_v10, %v1057_v8  ;;  %v986_v21 = vld [vmem:[#allocation2 + $0x2c] sm:$0x3]  ;;  %v740_v44 = vpack.c.b16 %v734_v38, %v734_v38  ;;  %v2251_v10 = vld [vmem:[#allocation2 + $0x10] sm:$0xff]  ;;  %v2248_v40 = vld [vmem:[#allocation2 + $0x24] sm:$0xff] }
  0x4c   : > { %v612_v18 = vrot.slane %v610_v13, 1  ;;  %v848_v23 = vld [vmem:[#allocation2 + $0x2c] sm:$0x1]  ;;  %v1011_v25 = vunpack.c.l.b16 %v986_v21  ;;  %v2264_v21 = vld [vmem:[#allocation2 + $0x18] sm:$0xff]  ;;  %v1506_v38 = vrot.slane %v1504_v24, 2 }
  0x4d   : > { %2003 = vmatmul.msk.bf16.gmra.mxu1 %vm467_vm9, %v589_v14  ;;  %v887_v14 = vrot.slane %v2236_v9, 1  ;;  %v1062_v15 = vsel %vm1018_vm10, %v1052_v52, %v1061_v0  ;;  %v751_v50 = vrot.slane %v740_v44, 1  ;;  %v1481_v52 = vshll.u32 %v2155_v47, 16  ;;  %v2260_v51 = vld [vmem:[#allocation2 + $0x28] sm:$0xff] }
  0x4e   : > { %v613_v22 = vsel %vm569_vm1, %v608_v16, %v612_v18  ;;  %v1017_v12 = vpack.c.b16 %v1011_v25, %v1011_v25  ;;  %v1203_v9 = vrot.slane %v2246_v2, 2  ;;  %v1339_v16 = vrot.slane %v2251_v10, 2  ;;  %v2247_v25 = vld [vmem:[#allocation2 + $0x1c] sm:$0xff] }
  0x4f   : > { %v888_v20 = vsel %vm741_vm11, %v885_v56, %v887_v14  ;;  %v2262_v56 = vld [vmem:[#allocation2 + $0x8] sm:$0xf0]  ;;  %v752_v57 = vsel %vm741_vm11, %v749_v26, %v751_v50  ;;  %v1483_v62 = vrot.slane %v1481_v52, 3  ;;  %v1661_v26 = vrot.slane %v2264_v21, 3 }
  0x50   : > { %v1064_v17 = vshrl.u32 %v1017_v12, 16  ;;  %v1067_v29 = vshll.u32 %v1017_v12, 16  ;;  %v2184_v60 = vor.u32 %v2262_v56, %v2183_v55  ;;  %v1167_v55 = vld [vmem:[#allocation2 + $0x2c] sm:$0x3]  ;;  %v1516_v58 = vshll.u32 %v2260_v51, 16 }
  0x51   : > { %v1662_v12 = vsel %vm1657_vm13, %v1659_v4, %v1661_v26 }
  0x52   : > { %v1066_v28 = vrot.slane %v1064_v17, 1  ;;  %v1069_v33 = vrot.slane %v1067_v29, 2  ;;  %v1658_v3 = vrot.slane %v2184_v60, 3  ;;  %v1205_v17 = vrot.slane %v2247_v25, 2  ;;  %v2252_v29 = vld [vmem:[#allocation2 + $0x18] sm:$0xff] }
  0x53   : > { %2031 = vmatmul.msk.bf16.vlgmr.msrb.gmra.mxu2 %vm467_vm9, %v744_v27  ;;  %v873_v27 = vunpack.c.l.b16 %v848_v23 }
  0x54   : > { %2090 = vmatmul.msk.bf16.gmra.mxu0 %vm467_vm9, %v1044_v34  ;;  %v1070_v37 = vor.u32 %v1069_v33, %v1066_v28  ;;  %v1660_v5 = vsel %vm1657_vm13, %v1658_v3, %v1659_v4  ;;  %v1206_v28 = vsel %vm1199_vm12, %v1203_v9, %v1205_v17  ;;  %v1341_v33 = vrot.slane %v2252_v29, 2 }
  0x55   : > { %v879_v34 = vpack.c.b16 %v873_v27, %v873_v27  ;;  %v1518_v4 = vrot.slane %v1516_v58, 3 }
  0x56   : > { %v1342_v35 = vsel %vm1199_vm12, %v1339_v16, %v1341_v33 }
  0x5b   : > { %2061 = vmatmul.msk.bf16.gmra.mxu3 %vm467_vm9, %v884_v39  ;;  %v1071_v39 = vsel %vm1018_vm10, %v1061_v0, %v1070_v37  ;;  %v2258_v0 = vld [vmem:[#allocation2 + $0x18] sm:$0xff] }
  0x5c   : > { %v1495_v18 = vshrl.u32 %v2258_v0, 16  ;;  %v1498_v19 = vshll.u32 %v2258_v0, 16 }
  0x5d   : > { %2004 = vmatmul.msk.bf16.gmra.mxu1 %vm467_vm9, %v597_v49  ;;  %v889_v49 = vrot.slane %v879_v34, 1  ;;  %v1507_v34 = vshll.u32 %v2259_v31, 16 }
  0x5e   : > { %v1500_v23 = vrot.slane %v1498_v19, 3 }
  0x63   : > { %2032 = vmatmul.msk.bf16.gmra.mxu2 %vm467_vm9, %v746_v45  ;;  %v890_v45 = vsel %vm741_vm11, %v887_v14, %v889_v49  ;;  %v1204_v14 = vsel %vm1199_vm12, %v1201_v41, %v1203_v9  ;;  %v1663_v41 = vrot.slane %v2265_v36, 3 }
  0x64   : > { %2091 = vmatmul.msk.bf16.gmra.mxu0 %vm467_vm9, %v1053_v54  ;;  %v1489_v54 = vshll.u32 %v2257_v46, 16  ;;  %v2700_v46 = vld [vmem:[#allocation2 + $0x20] sm:$0xff] }
  0x65   : > { %v1664_v42 = vsel %vm1657_vm13, %v1661_v26, %v1663_v41  ;;  %v1343_v56 = vrot.slane %v2700_v46, 2 }
  0x6b   : > { %2062 = vmatmul.msk.bf16.gmra.mxu3 %vm467_vm9, %v886_v63  ;;  %v1488_v63 = vrot.slane %v1486_v53, 2 }
  0x6d   : > { %2005 = vmatmul.msk.bf16.gmra.mxu1 %vm467_vm9, %v605_v1  ;;  %v1491_v1 = vrot.slane %v1489_v54, 3 }
  0x6f   : > { %v1492_v8 = vor.u32 %v1491_v1, %v1488_v63  ;;  %v1344_v63 = vsel %vm1199_vm12, %v1341_v33, %v1343_v56  ;;  %v2266_v1 = vld [vmem:[#allocation2 + $0x28] sm:$0xff]  ;;  %v1306_v33 = vld [vmem:[#allocation2 + $0x30] sm:$0x3] }
  0x73   : > { %2033 = vmatmul.msk.bf16.gmra.mxu2 %vm467_vm9, %v748_v7  ;;  %v1484_v7 = vor.u32 %v1483_v62, %v1480_v61  ;;  %v1192_v61 = vunpack.c.l.b16 %v1167_v55 }
  0x74   : > { %2092 = vmatmul.msk.bf16.gmra.mxu0 %vm467_vm9, %v1062_v15  ;;  %v1338_v15 = vrot.slane %v2126_v11, 2 }
  0x75   : > { %v1493_v13 = vsel %vm1476_vm14, %v1484_v7, %v1492_v8  ;;  %v1198_v6 = vpack.c.b16 %v1192_v61, %v1192_v61  ;;  %v1665_v7 = vrot.slane %v2266_v1, 3 }
  0x77   : > { %v1666_v10 = vsel %vm1657_vm13, %v1663_v41, %v1665_v7 }
  0x7b   : > { %2063 = vmatmul.msk.bf16.gmra.mxu3 %vm467_vm9, %v888_v20  ;;  %v1340_v20 = vsel %vm1199_vm12, %v1338_v15, %v1339_v16  ;;  %v2254_v16 = vld [vmem:[#allocation2 + $0x28] sm:$0xff] }
  0x7c   : > { %v1345_v25 = vrot.slane %v2254_v16, 2 }
  0x7d   : > { %2006 = vmatmul.msk.bf16.gmra.mxu1 %vm467_vm9, %v613_v22  ;;  %v1497_v22 = vrot.slane %v1495_v18, 2 }
  0x7f   : > { %v1501_v27 = vor.u32 %v1500_v23, %v1497_v22 }
  0x81   : > { %v1502_v30 = vsel %vm1476_vm14, %v1492_v8, %v1501_v27 }
  0x83   : > { %2034 = vmatmul.msk.bf16.gmra.mxu2 %vm467_vm9, %v750_v32 }
  0x84   : > { %2093 = vmatmul.msk.bf16.gmra.mxu0 %vm467_vm9, %v1071_v39  ;;  %v1509_v39 = vrot.slane %v1507_v34, 3 }
  0x86   : > { %v1510_v43 = vor.u32 %v1509_v39, %v1506_v38 }
  0x88   : > { %v1511_v50 = vsel %vm1476_vm14, %v1501_v27, %v1510_v43 }
  0x8b   : > { %2064 = vmatmul.msk.bf16.gmra.mxu3 %vm467_vm9, %v890_v45  ;;  %v1207_v45 = vrot.slane %v2248_v40, 2 }
  0x8d   : > { %2118 = vmatmul.msk.bf16.vlgmr.msra.gmra.mxu1 %vm467_vm9, %v1202_v48  ;;  %v1208_v53 = vsel %vm1199_vm12, %v1205_v17, %v1207_v45  ;;  %v1625_v17 = vld [vmem:[#allocation2 + $0x30] sm:$0x7] }
  0x93   : > { %2035 = vmatmul.msk.bf16.gmra.mxu2 %vm467_vm9, %v752_v57  ;;  %v1513_v57 = vshrl.u32 %v2260_v51, 16 }
  0x94   : > { %2205 = vmatmul.msk.bf16.vlgmr.msra.gmra.mxu0 %vm467_vm9, %v1660_v5 }
  0x95   : > { %v1515_v3 = vrot.slane %v1513_v57, 2 }
  0x97   : > { %v1519_v11 = vor.u32 %v1518_v4, %v1515_v3 }
  0x99   : > { %v1520_v18 = vsel %vm1476_vm14, %v1510_v43, %v1519_v11 }
  0x9b   : > { %2176 = vmatmul.msk.bf16.vlgmr.msra.gmra.mxu3 %vm467_vm9, %v1493_v13  ;;  %v1469_v13 = vunpack.c.l.b16 %v1444_v59 }
  0x9d   : > { %2119 = vmatmul.msk.bf16.gmra.mxu1 %vm467_vm9, %v1204_v14  ;;  %v1209_v14 = vrot.slane %v1198_v6, 2  ;;  %v1475_v19 = vpack.c.b16 %v1469_v13, %v1469_v13 }
  0x9f   : > { %v1210_v22 = vsel %vm1199_vm12, %v1207_v45, %v1209_v14  ;;  %v1522_v26 = vshrl.u32 %v1475_v19, 16 }
  0xa1   : > { %v1524_v24 = vrot.slane %v1522_v26, 2 }
  0xa3   : > { %2147 = vmatmul.msk.bf16.vlgmr.msra.gmra.mxu2 %vm467_vm9, %v1340_v20 }
  0xa4   : > { %2206 = vmatmul.msk.bf16.gmra.mxu0 %vm467_vm9, %v1662_v12  ;;  %v1525_v12 = vshll.u32 %v1475_v19, 16 }
  0xa6   : > { %v1527_v34 = vrot.slane %v1525_v12, 3 }
  0xa8   : > { %v1528_v41 = vor.u32 %v1527_v34, %v1524_v24 }
  0xaa   : > { %v497_v32 = vpop.f32.mrf.mxu1 }
  0xab   : > { %519 = vst.msk [vmem:[#allocation3 + $0x10] sm:$0xff] %vm467_vm9, %v497_v32  ;;  %2177 = vmatmul.msk.bf16.gmra.mxu3 %vm467_vm9, %v1502_v30  ;;  %v1650_v30 = vunpack.c.l.b16 %v1625_v17  ;;  %v1346_v32 = vsel %vm1199_vm12, %v1343_v56, %v1345_v25 }
  0xad   : > { %2120 = vmatmul.msk.bf16.gmra.mxu1 %vm467_vm9, %v1206_v28  ;;  %v1656_v28 = vpack.c.b16 %v1650_v30, %v1650_v30 }
  0xb1   : > { %v492_v37 = vpop.f32.mrf.mxu0 }
  0xb2   : > { %v499_v49 = vpop.f32.mrf.mxu1  ;;  %517 = vst.msk [vmem:[#allocation3] sm:$0xff] %vm467_vm9, %v492_v37  ;;  %v671_v21 = vld [vmem:[#allocation3 + $0x10] sm:$0xff]  ;;  %v1667_v37 = vrot.slane %v1656_v28, 3 }
  0xb3   : > { %2148 = vmatmul.msk.bf16.gmra.mxu2 %vm467_vm9, %v1342_v35  ;;  %520 = vst.msk [vmem:[#allocation3 + $0x18] sm:$0xff] %vm467_vm9, %v499_v49  ;;  %v1331_v49 = vunpack.c.l.b16 %v1306_v33 }
  0xb4   : > { %2207 = vmatmul.msk.bf16.gmra.mxu0 %vm467_vm9, %v1664_v42  ;;  %v1668_v40 = vsel %vm1657_vm13, %v1665_v7, %v1667_v37 }
  0xb5   : > { %v1337_v46 = vpack.c.b16 %v1331_v49, %v1331_v49 }
  0xb6   : > { %v502_v44 = vpop.f32.mrf.mxu2 }
  0xb7   : > { %521 = vst.msk [vmem:[#allocation3 + $0x20] sm:$0xff] %vm467_vm9, %v502_v44 }
  0xb9   : > { %v669_v47 = vld [vmem:[#allocation3] sm:$0xff]  ;;  %v494_v48 = vpop.f32.mrf.mxu0 }
  0xba   : > { %v644_v52 = vpop.f32.mrf.mxu1  ;;  %518 = vst.msk [vmem:[#allocation3 + $0x8] sm:$0xff] %vm467_vm9, %v494_v48  ;;  %v672_v36 = vld [vmem:[#allocation3 + $0x18] sm:$0xff] }
  0xbb   : > { %v679_v54 = vadd.f32 %v669_v47, %v644_v52  ;;  %2178 = vmatmul.msk.bf16.gmra.mxu3 %vm467_vm9, %v1511_v50  ;;  %v1529_v47 = vsel %vm1476_vm14, %v1519_v11, %v1528_v41  ;;  %v1347_v52 = vrot.slane %v1337_v46, 2 }
  0xbd   : > { %689 = vst.msk [vmem:[#allocation3] sm:$0xff] %vm467_vm9, %v679_v54  ;;  %2121 = vmatmul.msk.bf16.gmra.mxu1 %vm467_vm9, %v1208_v53  ;;  %v1348_v58 = vsel %vm1199_vm12, %v1345_v25, %v1347_v52 }
  0xbe   : > { %v504_v60 = vpop.f32.mrf.mxu2  ;;  %v512_v62 = vpop.f32.mrf.mxu3  ;;  %v673_v50 = vld [vmem:[#allocation3 + $0x20] sm:$0xff] }
  0xbf   : > { %522 = vst.msk [vmem:[#allocation3 + $0x28] sm:$0xff] %vm467_vm9, %v504_v60 }
  0xc0   : > { %525 = vst.msk [vmem:[#allocation3 + $0x40] sm:$0xff] %vm467_vm9, %v512_v62 }
  0xc1   : > { %v670_v2 = vld [vmem:[#allocation3 + $0x8] sm:$0xff]  ;;  %v2713_v9 = vpop.f32.mrf.mxu0 }
  0xc2   : > { %v646_v5 = vpop.f32.mrf.mxu1 }
  0xc3   : > { %2149 = vmatmul.msk.bf16.gmra.mxu2 %vm467_vm9, %v1344_v63  ;;  %v680_v8 = vadd.f32 %v670_v2, %v646_v5 }
  0xc4   : > { %2208 = vmatmul.msk.bf16.gmra.mxu0 %vm467_vm9, %v1666_v10  ;;  %v808_v39 = vld [vmem:[#allocation3] sm:$0xff] }
  0xc5   : > { %690 = vst.msk [vmem:[#allocation3 + $0x8] sm:$0xff] %vm467_vm9, %v680_v8 }
  0xc6   : > { %v507_v0 = vpop.f32.mrf.mxu2  ;;  %v514_v15 = vpop.f32.mrf.mxu3  ;;  %v674_v63 = vld [vmem:[#allocation3 + $0x28] sm:$0xff] }
  0xc7   : > { %523 = vst.msk [vmem:[#allocation3 + $0x30] sm:$0xff] %vm467_vm9, %v507_v0  ;;  %v677_v24 = vld [vmem:[#allocation3 + $0x40] sm:$0xff] }
  0xc8   : > { %526 = vst.msk [vmem:[#allocation3 + $0x48] sm:$0xff] %vm467_vm9, %v514_v15 }
  0xc9   : > { %v2725_v27 = vpop.f32.mrf.mxu0 }
  0xca   : > { %v649_v20 = vpop.f32.mrf.mxu1 }
  0xcb   : > { %v681_v23 = vadd.f32 %v671_v21, %v649_v20  ;;  %2179 = vmatmul.msk.bf16.gmra.mxu3 %vm467_vm9, %v1520_v18 }
  0xcc   : > { %v809_v54 = vld [vmem:[#allocation3 + $0x8] sm:$0xff] }
  0xcd   : > { %691 = vst.msk [vmem:[#allocation3 + $0x10] sm:$0xff] %vm467_vm9, %v681_v23  ;;  %2122 = vmatmul.msk.bf16.gmra.mxu1 %vm467_vm9, %v1210_v22 }
  0xce   : > { %v509_v29 = vpop.f32.mrf.mxu2  ;;  %v921_v31 = vpop.f32.mrf.mxu3  ;;  %v675_v10 = vld [vmem:[#allocation3 + $0x30] sm:$0xff] }
  0xcf   : > { %524 = vst.msk [vmem:[#allocation3 + $0x38] sm:$0xff] %vm467_vm9, %v509_v29 }
  0xd1   : > { %v2733_v45 = vpop.f32.mrf.mxu0 }
  0xd2   : > { %v651_v35 = vpop.f32.mrf.mxu1 }
  0xd3   : > { %2150 = vmatmul.msk.bf16.gmra.mxu2 %vm467_vm9, %v1346_v32  ;;  %v682_v38 = vadd.f32 %v672_v36, %v651_v35 }
  0xd4   : > { %2209 = vmatmul.msk.bf16.gmra.mxu0 %vm467_vm9, %v1668_v40  ;;  %v810_v3 = vld [vmem:[#allocation3 + $0x10] sm:$0xff] }
  0xd5   : > { %692 = vst.msk [vmem:[#allocation3 + $0x18] sm:$0xff] %vm467_vm9, %v682_v38 }
  0xd6   : > { %v783_v42 = vpop.f32.mrf.mxu2  ;;  %v923_v44 = vpop.f32.mrf.mxu3  ;;  %v676_v23 = vld [vmem:[#allocation3 + $0x38] sm:$0xff] }
  0xd7   : > { %v818_v43 = vadd.f32 %v808_v39, %v783_v42 }
  0xd9   : > { %828 = vst.msk [vmem:[#allocation3] sm:$0xff] %vm467_vm9, %v818_v43  ;;  %v2741_v61 = vpop.f32.mrf.mxu0  ;;  %v678_v43 = vld [vmem:[#allocation3 + $0x48] sm:$0xff] }
  0xda   : > { %v654_v48 = vpop.f32.mrf.mxu1 }
  0xdb   : > { %v683_v51 = vadd.f32 %v673_v50, %v654_v48  ;;  %2180 = vmatmul.msk.bf16.gmra.mxu3 %vm467_vm9, %v1529_v47 }
  0xdc   : > { %v811_v15 = vld [vmem:[#allocation3 + $0x18] sm:$0xff] }
  0xdd   : > { %693 = vst.msk [vmem:[#allocation3 + $0x20] sm:$0xff] %vm467_vm9, %v683_v51 }
  0xde   : > { %v785_v53 = vpop.f32.mrf.mxu2  ;;  %v926_v56 = vpop.f32.mrf.mxu3 }
  0xdf   : > { %v819_v55 = vadd.f32 %v809_v54, %v785_v53 }
  0xe0   : > { %v946_v57 = vld [vmem:[#allocation3] sm:$0xff] }
  0xe1   : > { %v956_v60 = vadd.f32 %v946_v57, %v921_v31  ;;  %829 = vst.msk [vmem:[#allocation3 + $0x8] sm:$0xff] %vm467_vm9, %v819_v55  ;;  %v1112_v0 = vpop.f32.mrf.mxu0 }
  0xe2   : > { %v656_v62 = vpop.f32.mrf.mxu1 }
  0xe3   : > { %966 = vst.msk [vmem:[#allocation3] sm:$0xff] %vm467_vm9, %v956_v60  ;;  %2151 = vmatmul.msk.bf16.gmra.mxu2 %vm467_vm9, %v1348_v58  ;;  %v684_v1 = vadd.f32 %v674_v63, %v656_v62 }
  0xe4   : > { %v812_v17 = vld [vmem:[#allocation3 + $0x20] sm:$0xff] }
  0xe5   : > { %694 = vst.msk [vmem:[#allocation3 + $0x28] sm:$0xff] %vm467_vm9, %v684_v1 }
  0xe6   : > { %v788_v2 = vpop.f32.mrf.mxu2  ;;  %v928_v5 = vpop.f32.mrf.mxu3 }
  0xe7   : > { %v820_v4 = vadd.f32 %v810_v3, %v788_v2 }
  0xe8   : > { %v947_v6 = vld [vmem:[#allocation3 + $0x8] sm:$0xff] }
  0xe9   : > { %v957_v59 = vadd.f32 %v947_v6, %v923_v44  ;;  %830 = vst.msk [vmem:[#allocation3 + $0x10] sm:$0xff] %vm467_vm9, %v820_v4  ;;  %v1114_v26 = vpop.f32.mrf.mxu0 }
  0xea   : > { %v1127_v7 = vld [vmem:[#allocation3] sm:$0xff]  ;;  %v659_v8 = vpop.f32.mrf.mxu1 }
  0xeb   : > { %967 = vst.msk [vmem:[#allocation3 + $0x8] sm:$0xff] %vm467_vm9, %v957_v59  ;;  %v1137_v11 = vadd.f32 %v1127_v7, %v2713_v9  ;;  %v685_v13 = vadd.f32 %v675_v10, %v659_v8 }
  0xec   : > { %v813_v36 = vld [vmem:[#allocation3 + $0x28] sm:$0xff] }
  0xed   : > { %1147 = vst.msk [vmem:[#allocation3] sm:$0xff] %vm467_vm9, %v1137_v11 }
  0xee   : > { %v790_v14 = vpop.f32.mrf.mxu2  ;;  %695 = vst.msk [vmem:[#allocation3 + $0x30] sm:$0xff] %vm467_vm9, %v685_v13  ;;  %v931_v18 = vpop.f32.mrf.mxu3 }
  0xef   : > { %v821_v16 = vadd.f32 %v811_v15, %v790_v14 }
  0xf0   : > { %v948_v19 = vld [vmem:[#allocation3 + $0x10] sm:$0xff] }
  0xf1   : > { %v958_v20 = vadd.f32 %v948_v19, %v926_v56  ;;  %831 = vst.msk [vmem:[#allocation3 + $0x18] sm:$0xff] %vm467_vm9, %v821_v16  ;;  %v1117_v39 = vpop.f32.mrf.mxu0 }
  0xf2   : > { %v1128_v21 = vld [vmem:[#allocation3 + $0x8] sm:$0xff]  ;;  %v661_v22 = vpop.f32.mrf.mxu1 }
  0xf3   : > { %968 = vst.msk [vmem:[#allocation3 + $0x10] sm:$0xff] %vm467_vm9, %v958_v20  ;;  %v1138_v9 = vadd.f32 %v1128_v21, %v2725_v27  ;;  %v686_v25 = vadd.f32 %v676_v23, %v661_v22 }
  0xf4   : > { %v1266_v56 = vld [vmem:[#allocation3] sm:$0xff] }
  0xf5   : > { %1148 = vst.msk [vmem:[#allocation3 + $0x8] sm:$0xff] %vm467_vm9, %v1138_v9  ;;  %v814_v47 = vld [vmem:[#allocation3 + $0x30] sm:$0xff] }
  0xf6   : > { %v793_v12 = vpop.f32.mrf.mxu2  ;;  %696 = vst.msk [vmem:[#allocation3 + $0x38] sm:$0xff] %vm467_vm9, %v686_v25  ;;  %v933_v30 = vpop.f32.mrf.mxu3 }
  0xf7   : > { %v822_v29 = vadd.f32 %v812_v17, %v793_v12 }
  0xf8   : > { %v949_v31 = vld [vmem:[#allocation3 + $0x18] sm:$0xff] }
  0xf9   : > { %v959_v32 = vadd.f32 %v949_v31, %v928_v5  ;;  %832 = vst.msk [vmem:[#allocation3 + $0x20] sm:$0xff] %vm467_vm9, %v822_v29  ;;  %v1119_v53 = vpop.f32.mrf.mxu0 }
  0xfa   : > { %v1129_v28 = vld [vmem:[#allocation3 + $0x10] sm:$0xff]  ;;  %v664_v33 = vpop.f32.mrf.mxu1 }
  0xfb   : > { %969 = vst.msk [vmem:[#allocation3 + $0x18] sm:$0xff] %vm467_vm9, %v959_v32  ;;  %v1139_v27 = vadd.f32 %v1129_v28, %v2733_v45  ;;  %v687_v34 = vadd.f32 %v677_v24, %v664_v33 }
  0xfc   : > { %v1267_v5 = vld [vmem:[#allocation3 + $0x8] sm:$0xff] }
  0xfd   : > { %1149 = vst.msk [vmem:[#allocation3 + $0x10] sm:$0xff] %vm467_vm9, %v1139_v27 }
  0xfe   : > { %v795_v35 = vpop.f32.mrf.mxu2  ;;  %697 = vst.msk [vmem:[#allocation3 + $0x40] sm:$0xff] %vm467_vm9, %v687_v34  ;;  %v936_v38 = vpop.f32.mrf.mxu3 }
  0xff   : > { %v823_v37 = vadd.f32 %v813_v36, %v795_v35 }
 0x100   : > { %v950_v49 = vld [vmem:[#allocation3 + $0x20] sm:$0xff] }
 0x101   : > { %v960_v40 = vadd.f32 %v950_v49, %v931_v18  ;;  %833 = vst.msk [vmem:[#allocation3 + $0x28] sm:$0xff] %vm467_vm9, %v823_v37  ;;  %v1122_v7 = vpop.f32.mrf.mxu0 }
 0x102   : > { %v1130_v41 = vld [vmem:[#allocation3 + $0x18] sm:$0xff]  ;;  %v666_v42 = vpop.f32.mrf.mxu1 }
 0x103   : > { %970 = vst.msk [vmem:[#allocation3 + $0x20] sm:$0xff] %vm467_vm9, %v960_v40  ;;  %v1140_v44 = vadd.f32 %v1130_v41, %v2741_v61  ;;  %v688_v45 = vadd.f32 %v678_v43, %v666_v42  ;;  %v815_v61 = vld [vmem:[#allocation3 + $0x38] sm:$0xff] }
 0x104   : > { %v1268_v18 = vld [vmem:[#allocation3 + $0x10] sm:$0xff] }
 0x105   : > { %1150 = vst.msk [vmem:[#allocation3 + $0x18] sm:$0xff] %vm467_vm9, %v1140_v44  ;;  %v816_v10 = vld [vmem:[#allocation3 + $0x40] sm:$0xff] }
 0x106   : > { %v798_v46 = vpop.f32.mrf.mxu2  ;;  %698 = vst.msk [vmem:[#allocation3 + $0x48] sm:$0xff] %vm467_vm9, %v688_v45  ;;  %v938_v50 = vpop.f32.mrf.mxu3 }
 0x107   : > { %v824_v48 = vadd.f32 %v814_v47, %v798_v46 }
 0x108   : > { %v951_v51 = vld [vmem:[#allocation3 + $0x28] sm:$0xff] }
 0x109   : > { %v961_v52 = vadd.f32 %v951_v51, %v933_v30  ;;  %834 = vst.msk [vmem:[#allocation3 + $0x30] sm:$0xff] %vm467_vm9, %v824_v48  ;;  %v1124_v21 = vpop.f32.mrf.mxu0 }
 0x10a   : > { %v1131_v54 = vld [vmem:[#allocation3 + $0x20] sm:$0xff]  ;;  %v1241_v55 = vpop.f32.mrf.mxu1 }
 0x10b   : > { %971 = vst.msk [vmem:[#allocation3 + $0x28] sm:$0xff] %vm467_vm9, %v961_v52  ;;  %v1141_v57 = vadd.f32 %v1131_v54, %v1112_v0  ;;  %v1276_v58 = vadd.f32 %v1266_v56, %v1241_v55 }
 0x10c   : > { %v1269_v30 = vld [vmem:[#allocation3 + $0x18] sm:$0xff] }
 0x10d   : > { %1151 = vst.msk [vmem:[#allocation3 + $0x20] sm:$0xff] %vm467_vm9, %v1141_v57  ;;  %v817_v23 = vld [vmem:[#allocation3 + $0x48] sm:$0xff] }
 0x10e   : > { %v800_v60 = vpop.f32.mrf.mxu2  ;;  %1286 = vst.msk [vmem:[#allocation3] sm:$0xff] %vm467_vm9, %v1276_v58  ;;  %v941_v63 = vpop.f32.mrf.mxu3 }
 0x10f   : > { %v825_v62 = vadd.f32 %v815_v61, %v800_v60 }
 0x110   : > { %v952_v1 = vld [vmem:[#allocation3 + $0x30] sm:$0xff] }
 0x111   : > { %v962_v2 = vadd.f32 %v952_v1, %v936_v38  ;;  %835 = vst.msk [vmem:[#allocation3 + $0x38] sm:$0xff] %vm467_vm9, %v825_v62  ;;  %v1699_v27 = vpop.f32.mrf.mxu0 }
 0x112   : > { %v1132_v3 = vld [vmem:[#allocation3 + $0x28] sm:$0xff]  ;;  %v1243_v4 = vpop.f32.mrf.mxu1 }
 0x113   : > { %972 = vst.msk [vmem:[#allocation3 + $0x30] sm:$0xff] %vm467_vm9, %v962_v2  ;;  %v1142_v6 = vadd.f32 %v1132_v3, %v1114_v26  ;;  %v1277_v59 = vadd.f32 %v1267_v5, %v1243_v4 }
 0x115   : > { %1152 = vst.msk [vmem:[#allocation3 + $0x28] sm:$0xff] %vm467_vm9, %v1142_v6  ;;  %v1404_v33 = vld [vmem:[#allocation3] sm:$0xff] }
 0x116   : > { %v803_v8 = vpop.f32.mrf.mxu2  ;;  %1287 = vst.msk [vmem:[#allocation3 + $0x8] sm:$0xff] %vm467_vm9, %v1277_v59  ;;  %v943_v13 = vpop.f32.mrf.mxu3 }
 0x117   : > { %v826_v11 = vadd.f32 %v816_v10, %v803_v8 }
 0x118   : > { %v953_v0 = vld [vmem:[#allocation3 + $0x38] sm:$0xff] }
 0x119   : > { %v963_v14 = vadd.f32 %v953_v0, %v938_v50  ;;  %836 = vst.msk [vmem:[#allocation3 + $0x40] sm:$0xff] %vm467_vm9, %v826_v11  ;;  %v1701_v46 = vpop.f32.mrf.mxu0 }
 0x11a   : > { %v1133_v15 = vld [vmem:[#allocation3 + $0x30] sm:$0xff]  ;;  %v1246_v16 = vpop.f32.mrf.mxu1 }
 0x11b   : > { %973 = vst.msk [vmem:[#allocation3 + $0x38] sm:$0xff] %vm467_vm9, %v963_v14  ;;  %v1143_v19 = vadd.f32 %v1133_v15, %v1117_v39  ;;  %v1278_v20 = vadd.f32 %v1268_v18, %v1246_v16  ;;  %v1270_v39 = vld [vmem:[#allocation3 + $0x20] sm:$0xff] }
 0x11c   : > { %v1271_v50 = vld [vmem:[#allocation3 + $0x28] sm:$0xff] }
 0x11d   : > { %1153 = vst.msk [vmem:[#allocation3 + $0x30] sm:$0xff] %vm467_vm9, %v1143_v19  ;;  %v1405_v42 = vld [vmem:[#allocation3 + $0x8] sm:$0xff] }
 0x11e   : > { %v805_v22 = vpop.f32.mrf.mxu2  ;;  %1288 = vst.msk [vmem:[#allocation3 + $0x10] sm:$0xff] %vm467_vm9, %v1278_v20  ;;  %v1560_v25 = vpop.f32.mrf.mxu3 }
 0x11f   : > { %v827_v9 = vadd.f32 %v817_v23, %v805_v22 }
 0x120   : > { %v954_v26 = vld [vmem:[#allocation3 + $0x40] sm:$0xff] }
 0x121   : > { %v964_v12 = vadd.f32 %v954_v26, %v941_v63  ;;  %837 = vst.msk [vmem:[#allocation3 + $0x48] sm:$0xff] %vm467_vm9, %v827_v9  ;;  %v1704_v2 = vpop.f32.mrf.mxu0 }
 0x122   : > { %v1134_v17 = vld [vmem:[#allocation3 + $0x38] sm:$0xff]  ;;  %v1248_v29 = vpop.f32.mrf.mxu1 }
 0x123   : > { %974 = vst.msk [vmem:[#allocation3 + $0x40] sm:$0xff] %vm467_vm9, %v964_v12  ;;  %v1144_v31 = vadd.f32 %v1134_v17, %v1119_v53  ;;  %v1279_v32 = vadd.f32 %v1269_v30, %v1248_v29 }
 0x124   : > { %v1272_v62 = vld [vmem:[#allocation3 + $0x30] sm:$0xff] }
 0x125   : > { %1154 = vst.msk [vmem:[#allocation3 + $0x38] sm:$0xff] %vm467_vm9, %v1144_v31  ;;  %v1406_v55 = vld [vmem:[#allocation3 + $0x10] sm:$0xff] }
 0x126   : > { %v1379_v28 = vpop.f32.mrf.mxu2  ;;  %1289 = vst.msk [vmem:[#allocation3 + $0x18] sm:$0xff] %vm467_vm9, %v1279_v32  ;;  %v1562_v35 = vpop.f32.mrf.mxu3 }
 0x127   : > { %v1414_v24 = vadd.f32 %v1404_v33, %v1379_v28 }
 0x128   : > { %v955_v34 = vld [vmem:[#allocation3 + $0x48] sm:$0xff] }
 0x129   : > { %v965_v36 = vadd.f32 %v955_v34, %v943_v13  ;;  %1424 = vst.msk [vmem:[#allocation3] sm:$0xff] %vm467_vm9, %v1414_v24  ;;  %v1706_v18 = vpop.f32.mrf.mxu0 }
 0x12a   : > { %v1135_v37 = vld [vmem:[#allocation3 + $0x40] sm:$0xff]  ;;  %v1251_v38 = vpop.f32.mrf.mxu1 }
 0x12b   : > { %975 = vst.msk [vmem:[#allocation3 + $0x48] sm:$0xff] %vm467_vm9, %v965_v36  ;;  %v1145_v49 = vadd.f32 %v1135_v37, %v1122_v7  ;;  %v1280_v40 = vadd.f32 %v1270_v39, %v1251_v38  ;;  %v2319_v7 = vld [vmem:[#allocation6] ss:$0 sm:$0xff] }
 0x12c   : > { %v1273_v13 = vld [vmem:[#allocation3 + $0x38] sm:$0xff] }
 0x12d   : > { %1155 = vst.msk [vmem:[#allocation3 + $0x40] sm:$0xff] %vm467_vm9, %v1145_v49  ;;  %v1407_v5 = vld [vmem:[#allocation3 + $0x18] sm:$0xff] }
 0x12e   : > { %v1381_v41 = vpop.f32.mrf.mxu2  ;;  %1290 = vst.msk [vmem:[#allocation3 + $0x20] sm:$0xff] %vm467_vm9, %v1280_v40  ;;  %v1565_v51 = vpop.f32.mrf.mxu3 }
 0x12f   : > { %v1415_v43 = vadd.f32 %v1405_v42, %v1381_v41 }
 0x130   : > { %v1585_v44 = vld [vmem:[#allocation3] sm:$0xff] }
 0x131   : > { %v1595_v45 = vadd.f32 %v1585_v44, %v1560_v25  ;;  %1425 = vst.msk [vmem:[#allocation3 + $0x8] sm:$0xff] %vm467_vm9, %v1415_v43  ;;  %v1709_v24 = vpop.f32.mrf.mxu0 }
 0x132   : > { %v1136_v47 = vld [vmem:[#allocation3 + $0x48] sm:$0xff]  ;;  %v1253_v48 = vpop.f32.mrf.mxu1 }
 0x133   : > { %1605 = vst.msk [vmem:[#allocation3] sm:$0xff] %vm467_vm9, %v1595_v45  ;;  %v1146_v52 = vadd.f32 %v1136_v47, %v1124_v21  ;;  %v1281_v53 = vadd.f32 %v1271_v50, %v1253_v48 }
 0x134   : > { %v1274_v29 = vld [vmem:[#allocation3 + $0x40] sm:$0xff] }
 0x135   : > { %1156 = vst.msk [vmem:[#allocation3 + $0x48] sm:$0xff] %vm467_vm9, %v1146_v52  ;;  %v1408_v20 = vld [vmem:[#allocation3 + $0x20] sm:$0xff]  ;;  %v2321_v52 = vld [vmem:[#allocation6] ss:$0 sm:$0xff] }
 0x136   : > { %v1384_v54 = vpop.f32.mrf.mxu2  ;;  %1291 = vst.msk [vmem:[#allocation3 + $0x28] sm:$0xff] %vm467_vm9, %v1281_v53  ;;  %v1567_v3 = vpop.f32.mrf.mxu3 }
 0x137   : > { %v1416_v56 = vadd.f32 %v1406_v55, %v1384_v54 }
 0x138   : > { %v1586_v57 = vld [vmem:[#allocation3 + $0x8] sm:$0xff] }
 0x139   : > { %v1596_v58 = vadd.f32 %v1586_v57, %v1562_v35  ;;  %1426 = vst.msk [vmem:[#allocation3 + $0x10] sm:$0xff] %vm467_vm9, %v1416_v56  ;;  %v2320_v35 = vld [vmem:[#allocation6] ss:$0 sm:$0xff] }
 0x13a   : > { %v1724_v60 = vld [vmem:[#allocation3] sm:$0xff]  ;;  %v1256_v61 = vpop.f32.mrf.mxu1 }
 0x13b   : > { %1606 = vst.msk [vmem:[#allocation3 + $0x8] sm:$0xff] %vm467_vm9, %v1596_v58  ;;  %v1734_v63 = vadd.f32 %v1724_v60, %v1699_v27  ;;  %v1282_v1 = vadd.f32 %v1272_v62, %v1256_v61 }
 0x13c   : > { %v1275_v38 = vld [vmem:[#allocation3 + $0x48] sm:$0xff] }
 0x13d   : > { %1744 = vst.msk [vmem:[#allocation3] sm:$0xff] %vm467_vm9, %v1734_v63  ;;  %v1409_v28 = vld [vmem:[#allocation3 + $0x28] sm:$0xff] }
 0x13e   : > { %v1386_v4 = vpop.f32.mrf.mxu2  ;;  %1292 = vst.msk [vmem:[#allocation3 + $0x30] sm:$0xff] %vm467_vm9, %v1282_v1  ;;  %v1570_v21 = vpop.f32.mrf.mxu3  ;;  %v2322_v1 = vld [vmem:[#allocation6] ss:$0 sm:$0xff] }
 0x13f   : > { %v1417_v6 = vadd.f32 %v1407_v5, %v1386_v4 }
 0x140   : > { %v1587_v59 = vld [vmem:[#allocation3 + $0x10] sm:$0xff] }
 0x141   : > { %v1597_v8 = vadd.f32 %v1587_v59, %v1565_v51  ;;  %1427 = vst.msk [vmem:[#allocation3 + $0x18] sm:$0xff] %vm467_vm9, %v1417_v6  ;;  %v1711_v51 = vpop.f32.mrf.mxu0 }
 0x142   : > { %v1725_v10 = vld [vmem:[#allocation3 + $0x8] sm:$0xff]  ;;  %v1258_v11 = vpop.f32.mrf.mxu1 }
 0x143   : > { %1607 = vst.msk [vmem:[#allocation3 + $0x10] sm:$0xff] %vm467_vm9, %v1597_v8  ;;  %v1735_v0 = vadd.f32 %v1725_v10, %v1701_v46  ;;  %v1283_v14 = vadd.f32 %v1273_v13, %v1258_v11 }
 0x144   : > { %v1754_v15 = vld [vmem:[#allocation3] sm:$0xff] }
 0x145   : > { %v1759_v16 = vadd.f32 %v2319_v7, %v1754_v15  ;;  %1745 = vst.msk [vmem:[#allocation3 + $0x8] sm:$0xff] %vm467_vm9, %v1735_v0  ;;  %v1410_v44 = vld [vmem:[#allocation3 + $0x30] sm:$0xff] }
 0x146   : > { %v1389_v19 = vpop.f32.mrf.mxu2  ;;  %1293 = vst.msk [vmem:[#allocation3 + $0x38] sm:$0xff] %vm467_vm9, %v1283_v14  ;;  %v1572_v34 = vpop.f32.mrf.mxu3 }
 0x147   : > { %v1760_v22 = vmax.f32 %v1759_v16, 0.0  ;;  %v1418_v23 = vadd.f32 %v1408_v20, %v1389_v19 }
 0x148   : > { %v1588_v9 = vld [vmem:[#allocation3 + $0x18] sm:$0xff] }
 0x149   : > { %v1761_v25 = vpack.c.bf16 %v1760_v22, %v1760_v22  ;;  %v1598_v26 = vadd.f32 %v1588_v9, %v1567_v3  ;;  %1428 = vst.msk [vmem:[#allocation3 + $0x20] sm:$0xff] %vm467_vm9, %v1418_v23  ;;  %v1714_v5 = vpop.f32.mrf.mxu0 }
 0x14a   : > { %v1726_v12 = vld [vmem:[#allocation3 + $0x10] sm:$0xff]  ;;  %v1261_v17 = vpop.f32.mrf.mxu1 }
 0x14b   : > { %1762 = vst.msk [vmem:[%s2803_s10] sm:$0xf] %vm237_vm0, %v1761_v25  ;;  %v1736_v30 = vadd.f32 %v1726_v12, %v1704_v2  ;;  %v1284_v31 = vadd.f32 %v1274_v29, %v1261_v17 }
 0x14c   : > { %1608 = vst.msk [vmem:[#allocation3 + $0x18] sm:$0xff] %vm467_vm9, %v1598_v26 }
 0x14d   : > { %1746 = vst.msk [vmem:[#allocation3 + $0x10] sm:$0xff] %vm467_vm9, %v1736_v30  ;;  %v1411_v60 = vld [vmem:[#allocation3 + $0x38] sm:$0xff] }
 0x14e   : > { %v1391_v32 = vpop.f32.mrf.mxu2  ;;  %1294 = vst.msk [vmem:[#allocation3 + $0x40] sm:$0xff] %vm467_vm9, %v1284_v31  ;;  %v1575_v54 = vpop.f32.mrf.mxu3 }
 0x14f   : > { %v1419_v33 = vadd.f32 %v1409_v28, %v1391_v32 }
 0x150   : > { %v1589_v27 = vld [vmem:[#allocation3 + $0x20] sm:$0xff] }
 0x151   : > { %v1599_v36 = vadd.f32 %v1589_v27, %v1570_v21  ;;  %1429 = vst.msk [vmem:[#allocation3 + $0x28] sm:$0xff] %vm467_vm9, %v1419_v33  ;;  %v1716_v22 = vpop.f32.mrf.mxu0 }
 0x152   : > { %v1263_v37 = vpop.f32.mrf.mxu1 }
 0x153   : > { %1609 = vst.msk [vmem:[#allocation3 + $0x20] sm:$0xff] %vm467_vm9, %v1599_v36  ;;  %v1727_v39 = vld [vmem:[#allocation3 + $0x18] sm:$0xff]  ;;  %v1285_v49 = vadd.f32 %v1275_v38, %v1263_v37 }
 0x154   : > { %v1763_v40 = vld [vmem:[#allocation3 + $0xa] sm:$0xff]  ;;  %v1737_v41 = vadd.f32 %v1727_v39, %v1706_v18  ;;  %v2323_v18 = vld [vmem:[#allocation6] ss:$0 sm:$0xff] }
 0x155   : > { %v1768_v42 = vadd.f32 %v2320_v35, %v1763_v40  ;;  %1295 = vst.msk [vmem:[#allocation3 + $0x48] sm:$0xff] %vm467_vm9, %v1285_v49  ;;  %v1412_v11 = vld [vmem:[#allocation3 + $0x40] sm:$0xff]  ;;  %v2324_v35 = vld [vmem:[#allocation6] ss:$0 sm:$0xff] }
 0x156   : > { %1747 = vst.msk [vmem:[#allocation3 + $0x18] sm:$0xff] %vm467_vm9, %v1737_v41  ;;  %v1394_v43 = vpop.f32.mrf.mxu2  ;;  %v1577_v7 = vpop.f32.mrf.mxu3  ;;  %v2325_v40 = vld [vmem:[#allocation6] ss:$0 sm:$0xff] }
 0x157   : > { %v1769_v45 = vmax.f32 %v1768_v42, 0.0  ;;  %v1420_v46 = vadd.f32 %v1410_v44, %v1394_v43 }
 0x158   : > { %v1590_v47 = vld [vmem:[#allocation3 + $0x28] sm:$0xff] }
 0x159   : > { %v1770_v48 = vpack.c.bf16 %v1769_v45, %v1769_v45  ;;  %v1600_v50 = vadd.f32 %v1590_v47, %v1572_v34  ;;  %1430 = vst.msk [vmem:[#allocation3 + $0x30] sm:$0xff] %vm467_vm9, %v1420_v46  ;;  %v1719_v27 = vpop.f32.mrf.mxu0 }
 0x15a   : > { %v1728_v53 = vld [vmem:[#allocation3 + $0x20] sm:$0xff] }
 0x15b   : > { %1771 = vst.msk [vmem:[%s2803_s10 + $0x4] sm:$0xf] %vm237_vm0, %v1770_v48  ;;  %v1738_v55 = vadd.f32 %v1728_v53, %v1709_v24 }
 0x15c   : > { %1610 = vst.msk [vmem:[#allocation3 + $0x28] sm:$0xff] %vm467_vm9, %v1600_v50  ;;  %v1413_v26 = vld [vmem:[#allocation3 + $0x48] sm:$0xff]  ;;  %v2326_v50 = vld [vmem:[#allocation6] ss:$0 sm:$0xff] }
 0x15d   : > { %v1772_v56 = vld [vmem:[#allocation3 + $0x14] sm:$0xff]  ;;  %1748 = vst.msk [vmem:[#allocation3 + $0x20] sm:$0xff] %vm467_vm9, %v1738_v55 }
 0x15e   : > { %v1777_v57 = vadd.f32 %v2321_v52, %v1772_v56  ;;  %v1396_v58 = vpop.f32.mrf.mxu2  ;;  %v1580_v9 = vpop.f32.mrf.mxu3 }
 0x15f   : > { %v1421_v61 = vadd.f32 %v1411_v60, %v1396_v58 }
 0x160   : > { %v1778_v62 = vmax.f32 %v1777_v57, 0.0  ;;  %v1591_v63 = vld [vmem:[#allocation3 + $0x30] sm:$0xff] }
 0x161   : > { %v1601_v2 = vadd.f32 %v1591_v63, %v1575_v54  ;;  %1431 = vst.msk [vmem:[#allocation3 + $0x38] sm:$0xff] %vm467_vm9, %v1421_v61  ;;  %v1721_v42 = vpop.f32.mrf.mxu0 }
 0x162   : > { %v1779_v3 = vpack.c.bf16 %v1778_v62, %v1778_v62 }
 0x163   : > { %1611 = vst.msk [vmem:[#allocation3 + $0x30] sm:$0xff] %vm467_vm9, %v1601_v2  ;;  %v1729_v4 = vld [vmem:[#allocation3 + $0x28] sm:$0xff] }
 0x164   : > { %1780 = vst.msk [vmem:[%s2803_s10 + $0x8] sm:$0xf] %vm237_vm0, %v1779_v3  ;;  %v1781_v6 = vld [vmem:[#allocation3 + $0x1e] sm:$0xff]  ;;  %v1739_v59 = vadd.f32 %v1729_v4, %v1711_v51 }
 0x165   : > { %v1786_v8 = vadd.f32 %v2322_v1, %v1781_v6 }
 0x166   : > { %1749 = vst.msk [vmem:[#allocation3 + $0x28] sm:$0xff] %vm467_vm9, %v1739_v59  ;;  %v1399_v10 = vpop.f32.mrf.mxu2  ;;  %v1582_v33 = vpop.f32.mrf.mxu3 }
 0x167   : > { %v1787_v13 = vmax.f32 %v1786_v8, 0.0  ;;  %v1422_v0 = vadd.f32 %v1412_v11, %v1399_v10 }
 0x168   : > { %v1592_v14 = vld [vmem:[#allocation3 + $0x38] sm:$0xff] }
 0x169   : > { %v1788_v15 = vpack.c.bf16 %v1787_v13, %v1787_v13  ;;  %v1602_v16 = vadd.f32 %v1592_v14, %v1577_v7  ;;  %1432 = vst.msk [vmem:[#allocation3 + $0x40] sm:$0xff] %vm467_vm9, %v1422_v0 }
 0x16a   : > { %v1730_v19 = vld [vmem:[#allocation3 + $0x30] sm:$0xff] }
 0x16b   : > { %1789 = vst.msk [vmem:[%s2803_s10 + $0xc] sm:$0xf] %vm237_vm0, %v1788_v15  ;;  %v1740_v20 = vadd.f32 %v1730_v19, %v1714_v5 }
 0x16c   : > { %1612 = vst.msk [vmem:[#allocation3 + $0x38] sm:$0xff] %vm467_vm9, %v1602_v16 }
 0x16d   : > { %v1790_v21 = vld [vmem:[#allocation3 + $0x28] sm:$0xff]  ;;  %1750 = vst.msk [vmem:[#allocation3 + $0x30] sm:$0xff] %vm467_vm9, %v1740_v20 }
 0x16e   : > { %v1795_v23 = vadd.f32 %v2323_v18, %v1790_v21  ;;  %v1401_v25 = vpop.f32.mrf.mxu2 }
 0x16f   : > { %v1423_v12 = vadd.f32 %v1413_v26, %v1401_v25 }
 0x170   : > { %v1796_v17 = vmax.f32 %v1795_v23, 0.0  ;;  %v1593_v29 = vld [vmem:[#allocation3 + $0x40] sm:$0xff] }
 0x171   : > { %v1603_v30 = vadd.f32 %v1593_v29, %v1580_v9  ;;  %1433 = vst.msk [vmem:[#allocation3 + $0x48] sm:$0xff] %vm467_vm9, %v1423_v12 }
 0x172   : > { %v1797_v31 = vpack.c.bf16 %v1796_v17, %v1796_v17 }
 0x173   : > { %1613 = vst.msk [vmem:[#allocation3 + $0x40] sm:$0xff] %vm467_vm9, %v1603_v30  ;;  %v1731_v32 = vld [vmem:[#allocation3 + $0x38] sm:$0xff] }
 0x174   : > { %1798 = vst.msk [vmem:[%s2803_s10 + $0x10] sm:$0xf] %vm237_vm0, %v1797_v31  ;;  %v1741_v28 = vadd.f32 %v1731_v32, %v1716_v22 }
 0x176   : > { %1751 = vst.msk [vmem:[#allocation3 + $0x38] sm:$0xff] %vm467_vm9, %v1741_v28 }
 0x178   : > { %v1594_v24 = vld [vmem:[#allocation3 + $0x48] sm:$0xff] }
 0x179   : > { %v1604_v34 = vadd.f32 %v1594_v24, %v1582_v33 }
 0x17a   : > { %v1732_v36 = vld [vmem:[#allocation3 + $0x40] sm:$0xff] }
 0x17b   : > { %1614 = vst.msk [vmem:[#allocation3 + $0x48] sm:$0xff] %vm467_vm9, %v1604_v34  ;;  %v1742_v37 = vadd.f32 %v1732_v36, %v1719_v27 }
 0x17d   : > { %v1799_v38 = vld [vmem:[#allocation3 + $0x32] sm:$0xff]  ;;  %1752 = vst.msk [vmem:[#allocation3 + $0x40] sm:$0xff] %vm467_vm9, %v1742_v37 }
 0x17e   : > { %v1804_v39 = vadd.f32 %v2324_v35, %v1799_v38 }
 0x180   : > { %v1805_v49 = vmax.f32 %v1804_v39, 0.0 }
 0x182   : > { %v1806_v41 = vpack.c.bf16 %v1805_v49, %v1805_v49  ;;  %v1733_v43 = vld [vmem:[#allocation3 + $0x48] sm:$0xff] }
 0x183   : > { %v1743_v44 = vadd.f32 %v1733_v43, %v1721_v42 }
 0x184   : > { %1807 = vst.msk [vmem:[%s2803_s10 + $0x14] sm:$0xf] %vm237_vm0, %v1806_v41  ;;  %v1808_v45 = vld [vmem:[#allocation3 + $0x3c] sm:$0xff] }
 0x185   : > { %v1813_v46 = vadd.f32 %v2325_v40, %v1808_v45  ;;  %1753 = vst.msk [vmem:[#allocation3 + $0x48] sm:$0xff] %vm467_vm9, %v1743_v44 }
 0x187   : > { %v1814_v47 = vmax.f32 %v1813_v46, 0.0 }
 0x189   : > { %v1815_v48 = vpack.c.bf16 %v1814_v47, %v1814_v47 }
 0x18b   : > { %1816 = vst.msk [vmem:[%s2803_s10 + $0x18] sm:$0xf] %vm237_vm0, %v1815_v48 }
 0x18c   : > { %v1817_v51 = vld [vmem:[#allocation3 + $0x46] sm:$0xff] }
 0x18d   : > { %v1822_v52 = vadd.f32 %v2326_v50, %v1817_v51 }
 0x18f   : > { %v1823_v53 = vmax.f32 %v1822_v52, 0.0 }
 0x191   : > { %v1824_v54 = vpack.c.bf16 %v1823_v53, %v1823_v53 }
 0x193   : > { %1825 = vst.msk [vmem:[%s2803_s10 + $0x1c] sm:$0xf] %vm237_vm0, %v1824_v54 }
 0x194 PF: > { %s15_s14 = sadd.s32 1, %s2417_s14   ;;  %s2875_s12 = smov %s2413_s13 }
 0x195   : > { %p12_p8 = scmp.ge.s32.totalorder %s15_s14, 4   ;;  %s2876_s13 = smov %s2878_s16 }
 0x197   :  { %14 = sbr.rel (!%p12_p8) target bundleno = 3 (0x3), region = 88 }
 0x19c   :  { %1853 = vsyncpa [#allocation5], 1 }
 0x19d   :  { %1855 = vsyncpa [#allocation5 + $0x1], 1 }
 0x19e   :  { %1856 = vsyncpa [#allocation7], 1 }

</bundles_post_ra>
